<compile_context>
chip_gen: v7x
topology: tpu7x:2x2x1
jax: 0.10.0
libtpu: 0.0.40
codegen_flags: <defaults>
</compile_context>

<pallas_src>
import functools

import jax
import jax.numpy as jnp
import numpy as np
from jax.experimental import pallas as pl
from jax.experimental.pallas import tpu as pltpu

_PADL = 128   # left lane pad: inter-layer writebacks land 128-lane aligned
_PADR = 19    # right lane pad: covers the max +(W+2+1) lane shift of a tap


def _unet_kernel(x_ref, mask_ref,
                 w0_ref, b0_ref, w1_ref, b1_ref,
                 w2_ref, b2_ref, w3_ref, b3_ref,
                 o_ref, a_ref, *, padded_width):
    """Fused UNet forward for one grid step (a block of images).

    x_ref   : (1, Cin, TOT)       padded input, spatial flattened into lanes
    mask_ref: (1, LW)             1.0 on interior pixels, 0.0 on padding ring
    wi_ref  : (9, Cout_i, Cin_i)  per-tap transposed conv weights
    bi_ref  : (Cout_i, 1)
    o_ref   : (1, Cout_last, LW)  lane-dense output block (already "NC(HW)")
    a_ref   : (C, TOT)            VMEM scratch reused for every hidden layer
    """
    C, TOT = a_ref.shape
    LW = TOT - _PADL - _PADR            # images_per_step * (H+2)*(W+2)

    mask = mask_ref[...]                # (1, LW)

    # Only the outer lane strips must be zero (they feed the masked ring
    # positions of the shifted tap reads); the interior is fully overwritten
    # before any layer reads a_ref.  A handful of vector stores per step.
    a_ref[:, :_PADL] = jnp.zeros((C, _PADL), jnp.float32)
    a_ref[:, _PADL + LW:] = jnp.zeros((C, _PADR), jnp.float32)

    # Lane shift of each 3x3 tap within the flattened padded grid.
    offs = tuple((ky - 1) * padded_width + (kx - 1)
                 for ky in range(3) for kx in range(3))

    def conv(src, w_ref, b_ref, relu, masked):
        # src: (Cin_l, TOT) value. 9 accumulated (Cout,Cin_l)@(Cin_l,LW) MXU
        # matmuls on lane-shifted slices; f32 accumulate.
        acc = None
        for k, off in enumerate(offs):
            tap = src[:, _PADL + off:_PADL + off + LW]           # (Cin_l, LW)
            part = jnp.dot(w_ref[k], tap, preferred_element_type=jnp.float32)
            acc = part if acc is None else acc + part
        acc = acc + b_ref[...]                                   # bias (lanes bcast)
        if relu:
            acc = jnp.maximum(acc, 0.0)
        if masked:
            acc = acc * mask   # zero the ring -> valid "same" padding next layer
        return acc                                               # (Cout_l, LW)

    def write_back(h):
        a_ref[:, _PADL:_PADL + LW] = h       # 128-aligned lane-dense store

    # encoder: conv -> ReLU -> conv
    write_back(conv(x_ref[0], w0_ref, b0_ref, relu=True, masked=True))
    write_back(conv(a_ref[...], w1_ref, b1_ref, relu=False, masked=True))
    # decoder: conv -> ReLU -> conv
    write_back(conv(a_ref[...], w2_ref, b2_ref, relu=True, masked=True))
    o_ref[0] = conv(a_ref[...], w3_ref, b3_ref,
                    relu=False, masked=False).astype(o_ref.dtype)


def _prepare_params(params):
    """(3,3,Cin,Cout) weights -> per-tap transposed (9,Cout,Cin); bias (Cout,1)."""
    out = []
    for w, b in params:
        kh, kw, cin, cout = w.shape
        wt = jnp.transpose(w, (0, 1, 3, 2)).reshape(kh * kw, cout, cin)
        out.append((wt, b.reshape(cout, 1)))
    return out


def _interior_mask(H, W, B):
    m = np.zeros((H + 2, W + 2), np.float32)
    m[1:H + 1, 1:W + 1] = 1.0
    return jnp.asarray(np.tile(m.reshape(-1), B).reshape(1, -1))


@functools.partial(jax.jit, static_argnames=("images_per_step",))
def unet_forward(x_nchw, params, images_per_step=1):
    """Forward pass. Input/output are NCHW to match the PyTorch module."""
    N, Cin, H, W = x_nchw.shape
    B = images_per_step
    assert N % B == 0, "batch must be divisible by images_per_step"
    G = N // B
    PH, PW = H + 2, W + 2
    S = PH * PW                      # flattened padded spatial size per image
    LW = B * S
    TOT = _PADL + LW + _PADR
    C = params[0][0].shape[-1]       # hidden_dim

    (w0, b0), (w1, b1), (w2, b2), (w3, b3) = _prepare_params(params)

    # Zero-pad spatially, flatten (H+2)*(W+2) into the lane axis, pack B
    # images per grid step, and add the left/right lane strips for tap shifts.
    xp = jnp.pad(x_nchw.astype(jnp.float32), ((0, 0), (0, 0), (1, 1), (1, 1)))
    xf = jnp.transpose(xp.reshape(G, B, Cin, S), (0, 2, 1, 3)).reshape(G, Cin, LW)
    xf = jnp.pad(xf, ((0, 0), (0, 0), (_PADL, _PADR)))

    mask = _interior_mask(H, W, B)

    c2 = lambda g: (0, 0)
    c3 = lambda g: (0, 0, 0)
    out = pl.pallas_call(
        functools.partial(_unet_kernel, padded_width=PW),
        out_shape=jax.ShapeDtypeStruct((G, Cin, LW), x_nchw.dtype),
        grid_spec=pltpu.PrefetchScalarGridSpec(
            num_scalar_prefetch=0,
            grid=(G,),
            in_specs=[
                pl.BlockSpec((1, Cin, TOT), lambda g: (g, 0, 0)),
                pl.BlockSpec((1, LW), c2),
                pl.BlockSpec((9, C, Cin), c3), pl.BlockSpec((C, 1), c2),
                pl.BlockSpec((9, C, C), c3),   pl.BlockSpec((C, 1), c2),
                pl.BlockSpec((9, C, C), c3),   pl.BlockSpec((C, 1), c2),
                pl.BlockSpec((9, Cin, C), c3), pl.BlockSpec((Cin, 1), c2),
            ],
            out_specs=pl.BlockSpec((1, Cin, LW), lambda g: (g, 0, 0)),
            # Per-step VMEM: scratch (C, TOT) ~64 KiB + resident weights
            # <0.5 MiB -> far below every generation's scoped default, so no
            # explicit vmem_limit_bytes is required at these sizes.
            scratch_shapes=[pltpu.VMEM((C, TOT), jnp.float32)],
        ),
        compiler_params=pltpu.CompilerParams(
            dimension_semantics=("parallel",)),
    )(xf, mask, w0, b0, w1, b1, w2, b2, w3, b3)

    # (G, Cin, B*S) is already channel-major; drop the padding ring and undo
    # the per-step image packing (tiny XLA slice/reshape outside the kernel).
    out = out.reshape(G, Cin, B, PH, PW)[:, :, :, 1:H + 1, 1:W + 1]
    return jnp.transpose(out, (0, 2, 1, 3, 4)).reshape(N, Cin, H, W)


def init_unet_params(key, input_dim, hidden_dim):
    """Deterministic parameter init matching the PyTorch layer shapes.

    Weights stored as (kh, kw, Cin, Cout).
    """
    dims = [
        (input_dim, hidden_dim),   # encoder conv 1
        (hidden_dim, hidden_dim),  # encoder conv 2
        (hidden_dim, hidden_dim),  # decoder conv 1
        (hidden_dim, input_dim),   # decoder conv 2
    ]
    params = []
    for (cin, cout) in dims:
        key, kw_, kb_ = jax.random.split(key, 3)
        fan_in = cin * 3 * 3
        bound = 1.0 / jnp.sqrt(fan_in)
        w = jax.random.uniform(kw_, (3, 3, cin, cout), jnp.float32, -bound, bound)
        b = jax.random.uniform(kb_, (cout,), jnp.float32, -bound, bound)
        params.append((w, b))
    return params


def _ref_forward(x_nchw, params):
    """Pure-JAX reference (lax conv) for a correctness sanity check."""
    x = x_nchw
    relu_flags = [True, False, True, False]
    for (w, b), do_relu in zip(params, relu_flags):
        w_oihw = jnp.transpose(w, (3, 2, 0, 1))      # (kh,kw,Cin,Cout) -> OIHW
        x = jax.lax.conv_general_dilated(
            x, w_oihw, window_strides=(1, 1), padding="SAME",
            dimension_numbers=("NCHW", "OIHW", "NCHW"))
        x = x + b.reshape(1, -1, 1, 1)
        if do_relu:
            x = jnp.maximum(x, 0.0)
    return x


if __name__ == "__main__":
    input_dim, hidden_dim = 4, 32
    N, H, W = 2, 16, 16

    key = jax.random.PRNGKey(0)
    k_x, k_p = jax.random.split(key)
    x = jax.random.normal(k_x, (N, input_dim, H, W), jnp.float32)
    params = init_unet_params(k_p, input_dim, hidden_dim)

    out = unet_forward(x, params)      # images_per_step=1 -> even grid of 2
    out = jax.block_until_ready(out)
    assert out.shape == (N, input_dim, H, W), out.shape

    ref = _ref_forward(x, params)
    assert jnp.allclose(out, ref, atol=1e-4, rtol=1e-4), (
        float(jnp.max(jnp.abs(out - ref))))

    print("KERNEL_OK")
</pallas_src>

<mosaic_0001>
module attributes {stable_mosaic.version = 11 : i64} {
  func.func @_unet_kernel(%arg0: i32, %arg1: memref<1x4x471xf32, #tpu.memory_space<vmem>>, %arg2: memref<1x324xf32, #tpu.memory_space<vmem>>, %arg3: memref<9x32x4xf32, #tpu.memory_space<vmem>>, %arg4: memref<32x1xf32, #tpu.memory_space<vmem>>, %arg5: memref<9x32x32xf32, #tpu.memory_space<vmem>>, %arg6: memref<32x1xf32, #tpu.memory_space<vmem>>, %arg7: memref<9x32x32xf32, #tpu.memory_space<vmem>>, %arg8: memref<32x1xf32, #tpu.memory_space<vmem>>, %arg9: memref<9x4x32xf32, #tpu.memory_space<vmem>>, %arg10: memref<4x1xf32, #tpu.memory_space<vmem>>, %arg11: memref<1x4x324xf32, #tpu.memory_space<vmem>>, %arg12: memref<32x471xf32, #tpu.memory_space<vmem>>) attributes {dimension_semantics = [#tpu.dimension_semantics<parallel>], iteration_bounds = array<i64: 2>, scalar_prefetch = 0 : i64, scratch_operands = 1 : i64, tpu.core_type = #tpu.core_type<tc>, window_params = [{transform_indices = @transform_0, window_bounds = array<i64: 1, 4, 471>}, {pipeline_mode = #tpu.pipeline_mode<synchronous>, transform_indices = @transform_1, window_bounds = array<i64: 1, 324>}, {pipeline_mode = #tpu.pipeline_mode<synchronous>, transform_indices = @transform_2, window_bounds = array<i64: 9, 32, 4>}, {pipeline_mode = #tpu.pipeline_mode<synchronous>, transform_indices = @transform_3, window_bounds = array<i64: 32, 1>}, {pipeline_mode = #tpu.pipeline_mode<synchronous>, transform_indices = @transform_4, window_bounds = array<i64: 9, 32, 32>}, {pipeline_mode = #tpu.pipeline_mode<synchronous>, transform_indices = @transform_5, window_bounds = array<i64: 32, 1>}, {pipeline_mode = #tpu.pipeline_mode<synchronous>, transform_indices = @transform_6, window_bounds = array<i64: 9, 32, 32>}, {pipeline_mode = #tpu.pipeline_mode<synchronous>, transform_indices = @transform_7, window_bounds = array<i64: 32, 1>}, {pipeline_mode = #tpu.pipeline_mode<synchronous>, transform_indices = @transform_8, window_bounds = array<i64: 9, 4, 32>}, {pipeline_mode = #tpu.pipeline_mode<synchronous>, transform_indices = @transform_9, window_bounds = array<i64: 4, 1>}, {transform_indices = @transform_10, window_bounds = array<i64: 1, 4, 324>}]} {
    %c0 = arith.constant 0 : index
    %c0_0 = arith.constant 0 : index
    %0 = vector.load %arg2[%c0, %c0_0] : memref<1x324xf32, #tpu.memory_space<vmem>>, vector<1x324xf32>
    %cst = arith.constant 0.000000e+00 : f32
    %1 = vector.broadcast %cst : f32 to vector<32x128xf32>
    %c0_1 = arith.constant 0 : index
    %c0_2 = arith.constant 0 : index
    %2 = vector.load %arg12[%c0_1, %c0_2] : memref<32x471xf32, #tpu.memory_space<vmem>>, vector<32x128xf32>
    tpu.vector_store %arg12[%c0_1, %c0_2], %1 {strides = array<i32>} : memref<32x471xf32, #tpu.memory_space<vmem>>, vector<32x128xf32>,
    %cst_3 = arith.constant 0.000000e+00 : f32
    %3 = vector.broadcast %cst_3 : f32 to vector<32x19xf32>
    %c0_4 = arith.constant 0 : index
    %c452 = arith.constant 452 : index
    %4 = vector.load %arg12[%c0_4, %c452] : memref<32x471xf32, #tpu.memory_space<vmem>>, vector<32x19xf32>
    tpu.vector_store %arg12[%c0_4, %c452], %3 {strides = array<i32>} : memref<32x471xf32, #tpu.memory_space<vmem>>, vector<32x19xf32>,
    %c0_5 = arith.constant 0 : index
    %c0_6 = arith.constant 0 : index
    %c0_7 = arith.constant 0 : index
    %5 = vector.load %arg1[%c0_5, %c0_6, %c0_7] : memref<1x4x471xf32, #tpu.memory_space<vmem>>, vector<1x4x471xf32>
    %6 = vector.shape_cast %5 : vector<1x4x471xf32> to vector<4x471xf32>
    %7 = vector.extract_strided_slice %6 {offsets = [0, 109], sizes = [4, 324], strides = [1, 1]} : vector<4x471xf32> to vector<4x324xf32>
    %c0_8 = arith.constant 0 : index
    %c0_9 = arith.constant 0 : index
    %c0_10 = arith.constant 0 : index
    %8 = vector.load %arg3[%c0_8, %c0_9, %c0_10] : memref<9x32x4xf32, #tpu.memory_space<vmem>>, vector<1x32x4xf32>
    %9 = vector.shape_cast %8 : vector<1x32x4xf32> to vector<32x4xf32>
    %cst_11 = arith.constant dense<0.000000e+00> : vector<32x324xf32>
    %10 = tpu.matmul %9, %7, %cst_11 {dimension_numbers = #tpu.dot_dimension_numbers<[1], [0], [0], [1], [0, 0, 1, 1], [], []>} : vector<32x4xf32>, vector<4x324xf32>, vector<32x324xf32> -> vector<32x324xf32>
    %11 = vector.extract_strided_slice %6 {offsets = [0, 110], sizes = [4, 324], strides = [1, 1]} : vector<4x471xf32> to vector<4x324xf32>
    %c1 = arith.constant 1 : index
    %c0_12 = arith.constant 0 : index
    %c0_13 = arith.constant 0 : index
    %12 = vector.load %arg3[%c1, %c0_12, %c0_13] : memref<9x32x4xf32, #tpu.memory_space<vmem>>, vector<1x32x4xf32>
    %13 = vector.shape_cast %12 : vector<1x32x4xf32> to vector<32x4xf32>
    %cst_14 = arith.constant dense<0.000000e+00> : vector<32x324xf32>
    %14 = tpu.matmul %13, %11, %cst_14 {dimension_numbers = #tpu.dot_dimension_numbers<[1], [0], [0], [1], [0, 0, 1, 1], [], []>} : vector<32x4xf32>, vector<4x324xf32>, vector<32x324xf32> -> vector<32x324xf32>
    %15 = arith.addf %10, %14 : vector<32x324xf32>
    %16 = vector.extract_strided_slice %6 {offsets = [0, 111], sizes = [4, 324], strides = [1, 1]} : vector<4x471xf32> to vector<4x324xf32>
    %c2 = arith.constant 2 : index
    %c0_15 = arith.constant 0 : index
    %c0_16 = arith.constant 0 : index
    %17 = vector.load %arg3[%c2, %c0_15, %c0_16] : memref<9x32x4xf32, #tpu.memory_space<vmem>>, vector<1x32x4xf32>
    %18 = vector.shape_cast %17 : vector<1x32x4xf32> to vector<32x4xf32>
    %cst_17 = arith.constant dense<0.000000e+00> : vector<32x324xf32>
    %19 = tpu.matmul %18, %16, %cst_17 {dimension_numbers = #tpu.dot_dimension_numbers<[1], [0], [0], [1], [0, 0, 1, 1], [], []>} : vector<32x4xf32>, vector<4x324xf32>, vector<32x324xf32> -> vector<32x324xf32>
    %20 = arith.addf %15, %19 : vector<32x324xf32>
    %21 = vector.extract_strided_slice %6 {offsets = [0, 127], sizes = [4, 324], strides = [1, 1]} : vector<4x471xf32> to vector<4x324xf32>
    %c3 = arith.constant 3 : index
    %c0_18 = arith.constant 0 : index
    %c0_19 = arith.constant 0 : index
    %22 = vector.load %arg3[%c3, %c0_18, %c0_19] : memref<9x32x4xf32, #tpu.memory_space<vmem>>, vector<1x32x4xf32>
    %23 = vector.shape_cast %22 : vector<1x32x4xf32> to vector<32x4xf32>
    %cst_20 = arith.constant dense<0.000000e+00> : vector<32x324xf32>
    %24 = tpu.matmul %23, %21, %cst_20 {dimension_numbers = #tpu.dot_dimension_numbers<[1], [0], [0], [1], [0, 0, 1, 1], [], []>} : vector<32x4xf32>, vector<4x324xf32>, vector<32x324xf32> -> vector<32x324xf32>
    %25 = arith.addf %20, %24 : vector<32x324xf32>
    %26 = vector.extract_strided_slice %6 {offsets = [0, 128], sizes = [4, 324], strides = [1, 1]} : vector<4x471xf32> to vector<4x324xf32>
    %c4 = arith.constant 4 : index
    %c0_21 = arith.constant 0 : index
    %c0_22 = arith.constant 0 : index
    %27 = vector.load %arg3[%c4, %c0_21, %c0_22] : memref<9x32x4xf32, #tpu.memory_space<vmem>>, vector<1x32x4xf32>
    %28 = vector.shape_cast %27 : vector<1x32x4xf32> to vector<32x4xf32>
    %cst_23 = arith.constant dense<0.000000e+00> : vector<32x324xf32>
    %29 = tpu.matmul %28, %26, %cst_23 {dimension_numbers = #tpu.dot_dimension_numbers<[1], [0], [0], [1], [0, 0, 1, 1], [], []>} : vector<32x4xf32>, vector<4x324xf32>, vector<32x324xf32> -> vector<32x324xf32>
    %30 = arith.addf %25, %29 : vector<32x324xf32>
    %31 = vector.extract_strided_slice %6 {offsets = [0, 129], sizes = [4, 324], strides = [1, 1]} : vector<4x471xf32> to vector<4x324xf32>
    %c5 = arith.constant 5 : index
    %c0_24 = arith.constant 0 : index
    %c0_25 = arith.constant 0 : index
    %32 = vector.load %arg3[%c5, %c0_24, %c0_25] : memref<9x32x4xf32, #tpu.memory_space<vmem>>, vector<1x32x4xf32>
    %33 = vector.shape_cast %32 : vector<1x32x4xf32> to vector<32x4xf32>
    %cst_26 = arith.constant dense<0.000000e+00> : vector<32x324xf32>
    %34 = tpu.matmul %33, %31, %cst_26 {dimension_numbers = #tpu.dot_dimension_numbers<[1], [0], [0], [1], [0, 0, 1, 1], [], []>} : vector<32x4xf32>, vector<4x324xf32>, vector<32x324xf32> -> vector<32x324xf32>
    %35 = arith.addf %30, %34 : vector<32x324xf32>
    %36 = vector.extract_strided_slice %6 {offsets = [0, 145], sizes = [4, 324], strides = [1, 1]} : vector<4x471xf32> to vector<4x324xf32>
    %c6 = arith.constant 6 : index
    %c0_27 = arith.constant 0 : index
    %c0_28 = arith.constant 0 : index
    %37 = vector.load %arg3[%c6, %c0_27, %c0_28] : memref<9x32x4xf32, #tpu.memory_space<vmem>>, vector<1x32x4xf32>
    %38 = vector.shape_cast %37 : vector<1x32x4xf32> to vector<32x4xf32>
    %cst_29 = arith.constant dense<0.000000e+00> : vector<32x324xf32>
    %39 = tpu.matmul %38, %36, %cst_29 {dimension_numbers = #tpu.dot_dimension_numbers<[1], [0], [0], [1], [0, 0, 1, 1], [], []>} : vector<32x4xf32>, vector<4x324xf32>, vector<32x324xf32> -> vector<32x324xf32>
    %40 = arith.addf %35, %39 : vector<32x324xf32>
    %41 = vector.extract_strided_slice %6 {offsets = [0, 146], sizes = [4, 324], strides = [1, 1]} : vector<4x471xf32> to vector<4x324xf32>
    %c7 = arith.constant 7 : index
    %c0_30 = arith.constant 0 : index
    %c0_31 = arith.constant 0 : index
    %42 = vector.load %arg3[%c7, %c0_30, %c0_31] : memref<9x32x4xf32, #tpu.memory_space<vmem>>, vector<1x32x4xf32>
    %43 = vector.shape_cast %42 : vector<1x32x4xf32> to vector<32x4xf32>
    %cst_32 = arith.constant dense<0.000000e+00> : vector<32x324xf32>
    %44 = tpu.matmul %43, %41, %cst_32 {dimension_numbers = #tpu.dot_dimension_numbers<[1], [0], [0], [1], [0, 0, 1, 1], [], []>} : vector<32x4xf32>, vector<4x324xf32>, vector<32x324xf32> -> vector<32x324xf32>
    %45 = arith.addf %40, %44 : vector<32x324xf32>
    %46 = vector.extract_strided_slice %6 {offsets = [0, 147], sizes = [4, 324], strides = [1, 1]} : vector<4x471xf32> to vector<4x324xf32>
    %c8 = arith.constant 8 : index
    %c0_33 = arith.constant 0 : index
    %c0_34 = arith.constant 0 : index
    %47 = vector.load %arg3[%c8, %c0_33, %c0_34] : memref<9x32x4xf32, #tpu.memory_space<vmem>>, vector<1x32x4xf32>
    %48 = vector.shape_cast %47 : vector<1x32x4xf32> to vector<32x4xf32>
    %cst_35 = arith.constant dense<0.000000e+00> : vector<32x324xf32>
    %49 = tpu.matmul %48, %46, %cst_35 {dimension_numbers = #tpu.dot_dimension_numbers<[1], [0], [0], [1], [0, 0, 1, 1], [], []>} : vector<32x4xf32>, vector<4x324xf32>, vector<32x324xf32> -> vector<32x324xf32>
    %50 = arith.addf %45, %49 : vector<32x324xf32>
    %c0_36 = arith.constant 0 : index
    %c0_37 = arith.constant 0 : index
    %51 = vector.load %arg4[%c0_36, %c0_37] : memref<32x1xf32, #tpu.memory_space<vmem>>, vector<32x1xf32>
    %52 = vector.broadcast %51 : vector<32x1xf32> to vector<32x324xf32>
    %53 = arith.addf %50, %52 : vector<32x324xf32>
    %cst_38 = arith.constant 0.000000e+00 : f32
    %54 = vector.broadcast %cst_38 : f32 to vector<32x324xf32>
    %55 = arith.maximumf %53, %54 : vector<32x324xf32>
    %56 = vector.broadcast %0 : vector<1x324xf32> to vector<32x324xf32>
    %57 = arith.mulf %55, %56 : vector<32x324xf32>
    %c0_39 = arith.constant 0 : index
    %c128 = arith.constant 128 : index
    %58 = vector.load %arg12[%c0_39, %c128] : memref<32x471xf32, #tpu.memory_space<vmem>>, vector<32x324xf32>
    tpu.vector_store %arg12[%c0_39, %c128], %57 {strides = array<i32>} : memref<32x471xf32, #tpu.memory_space<vmem>>, vector<32x324xf32>,
    %c0_40 = arith.constant 0 : index
    %c0_41 = arith.constant 0 : index
    %59 = vector.load %arg12[%c0_40, %c0_41] : memref<32x471xf32, #tpu.memory_space<vmem>>, vector<32x471xf32>
    %60 = vector.extract_strided_slice %59 {offsets = [0, 109], sizes = [32, 324], strides = [1, 1]} : vector<32x471xf32> to vector<32x324xf32>
    %c0_42 = arith.constant 0 : index
    %c0_43 = arith.constant 0 : index
    %c0_44 = arith.constant 0 : index
    %61 = vector.load %arg5[%c0_42, %c0_43, %c0_44] : memref<9x32x32xf32, #tpu.memory_space<vmem>>, vector<1x32x32xf32>
    %62 = vector.shape_cast %61 : vector<1x32x32xf32> to vector<32x32xf32>
    %cst_45 = arith.constant dense<0.000000e+00> : vector<32x324xf32>
    %63 = tpu.matmul %62, %60, %cst_45 {dimension_numbers = #tpu.dot_dimension_numbers<[1], [0], [0], [1], [0, 0, 1, 1], [], []>} : vector<32x32xf32>, vector<32x324xf32>, vector<32x324xf32> -> vector<32x324xf32>
    %64 = vector.extract_strided_slice %59 {offsets = [0, 110], sizes = [32, 324], strides = [1, 1]} : vector<32x471xf32> to vector<32x324xf32>
    %c1_46 = arith.constant 1 : index
    %c0_47 = arith.constant 0 : index
    %c0_48 = arith.constant 0 : index
    %65 = vector.load %arg5[%c1_46, %c0_47, %c0_48] : memref<9x32x32xf32, #tpu.memory_space<vmem>>, vector<1x32x32xf32>
    %66 = vector.shape_cast %65 : vector<1x32x32xf32> to vector<32x32xf32>
    %cst_49 = arith.constant dense<0.000000e+00> : vector<32x324xf32>
    %67 = tpu.matmul %66, %64, %cst_49 {dimension_numbers = #tpu.dot_dimension_numbers<[1], [0], [0], [1], [0, 0, 1, 1], [], []>} : vector<32x32xf32>, vector<32x324xf32>, vector<32x324xf32> -> vector<32x324xf32>
    %68 = arith.addf %63, %67 : vector<32x324xf32>
    %69 = vector.extract_strided_slice %59 {offsets = [0, 111], sizes = [32, 324], strides = [1, 1]} : vector<32x471xf32> to vector<32x324xf32>
    %c2_50 = arith.constant 2 : index
    %c0_51 = arith.constant 0 : index
    %c0_52 = arith.constant 0 : index
    %70 = vector.load %arg5[%c2_50, %c0_51, %c0_52] : memref<9x32x32xf32, #tpu.memory_space<vmem>>, vector<1x32x32xf32>
    %71 = vector.shape_cast %70 : vector<1x32x32xf32> to vector<32x32xf32>
    %cst_53 = arith.constant dense<0.000000e+00> : vector<32x324xf32>
    %72 = tpu.matmul %71, %69, %cst_53 {dimension_numbers = #tpu.dot_dimension_numbers<[1], [0], [0], [1], [0, 0, 1, 1], [], []>} : vector<32x32xf32>, vector<32x324xf32>, vector<32x324xf32> -> vector<32x324xf32>
    %73 = arith.addf %68, %72 : vector<32x324xf32>
    %74 = vector.extract_strided_slice %59 {offsets = [0, 127], sizes = [32, 324], strides = [1, 1]} : vector<32x471xf32> to vector<32x324xf32>
    %c3_54 = arith.constant 3 : index
    %c0_55 = arith.constant 0 : index
    %c0_56 = arith.constant 0 : index
    %75 = vector.load %arg5[%c3_54, %c0_55, %c0_56] : memref<9x32x32xf32, #tpu.memory_space<vmem>>, vector<1x32x32xf32>
    %76 = vector.shape_cast %75 : vector<1x32x32xf32> to vector<32x32xf32>
    %cst_57 = arith.constant dense<0.000000e+00> : vector<32x324xf32>
    %77 = tpu.matmul %76, %74, %cst_57 {dimension_numbers = #tpu.dot_dimension_numbers<[1], [0], [0], [1], [0, 0, 1, 1], [], []>} : vector<32x32xf32>, vector<32x324xf32>, vector<32x324xf32> -> vector<32x324xf32>
    %78 = arith.addf %73, %77 : vector<32x324xf32>
    %79 = vector.extract_strided_slice %59 {offsets = [0, 128], sizes = [32, 324], strides = [1, 1]} : vector<32x471xf32> to vector<32x324xf32>
    %c4_58 = arith.constant 4 : index
    %c0_59 = arith.constant 0 : index
    %c0_60 = arith.constant 0 : index
    %80 = vector.load %arg5[%c4_58, %c0_59, %c0_60] : memref<9x32x32xf32, #tpu.memory_space<vmem>>, vector<1x32x32xf32>
    %81 = vector.shape_cast %80 : vector<1x32x32xf32> to vector<32x32xf32>
    %cst_61 = arith.constant dense<0.000000e+00> : vector<32x324xf32>
    %82 = tpu.matmul %81, %79, %cst_61 {dimension_numbers = #tpu.dot_dimension_numbers<[1], [0], [0], [1], [0, 0, 1, 1], [], []>} : vector<32x32xf32>, vector<32x324xf32>, vector<32x324xf32> -> vector<32x324xf32>
    %83 = arith.addf %78, %82 : vector<32x324xf32>
    %84 = vector.extract_strided_slice %59 {offsets = [0, 129], sizes = [32, 324], strides = [1, 1]} : vector<32x471xf32> to vector<32x324xf32>
    %c5_62 = arith.constant 5 : index
    %c0_63 = arith.constant 0 : index
    %c0_64 = arith.constant 0 : index
    %85 = vector.load %arg5[%c5_62, %c0_63, %c0_64] : memref<9x32x32xf32, #tpu.memory_space<vmem>>, vector<1x32x32xf32>
    %86 = vector.shape_cast %85 : vector<1x32x32xf32> to vector<32x32xf32>
    %cst_65 = arith.constant dense<0.000000e+00> : vector<32x324xf32>
    %87 = tpu.matmul %86, %84, %cst_65 {dimension_numbers = #tpu.dot_dimension_numbers<[1], [0], [0], [1], [0, 0, 1, 1], [], []>} : vector<32x32xf32>, vector<32x324xf32>, vector<32x324xf32> -> vector<32x324xf32>
    %88 = arith.addf %83, %87 : vector<32x324xf32>
    %89 = vector.extract_strided_slice %59 {offsets = [0, 145], sizes = [32, 324], strides = [1, 1]} : vector<32x471xf32> to vector<32x324xf32>
    %c6_66 = arith.constant 6 : index
    %c0_67 = arith.constant 0 : index
    %c0_68 = arith.constant 0 : index
    %90 = vector.load %arg5[%c6_66, %c0_67, %c0_68] : memref<9x32x32xf32, #tpu.memory_space<vmem>>, vector<1x32x32xf32>
    %91 = vector.shape_cast %90 : vector<1x32x32xf32> to vector<32x32xf32>
    %cst_69 = arith.constant dense<0.000000e+00> : vector<32x324xf32>
    %92 = tpu.matmul %91, %89, %cst_69 {dimension_numbers = #tpu.dot_dimension_numbers<[1], [0], [0], [1], [0, 0, 1, 1], [], []>} : vector<32x32xf32>, vector<32x324xf32>, vector<32x324xf32> -> vector<32x324xf32>
    %93 = arith.addf %88, %92 : vector<32x324xf32>
    %94 = vector.extract_strided_slice %59 {offsets = [0, 146], sizes = [32, 324], strides = [1, 1]} : vector<32x471xf32> to vector<32x324xf32>
    %c7_70 = arith.constant 7 : index
    %c0_71 = arith.constant 0 : index
    %c0_72 = arith.constant 0 : index
    %95 = vector.load %arg5[%c7_70, %c0_71, %c0_72] : memref<9x32x32xf32, #tpu.memory_space<vmem>>, vector<1x32x32xf32>
    %96 = vector.shape_cast %95 : vector<1x32x32xf32> to vector<32x32xf32>
    %cst_73 = arith.constant dense<0.000000e+00> : vector<32x324xf32>
    %97 = tpu.matmul %96, %94, %cst_73 {dimension_numbers = #tpu.dot_dimension_numbers<[1], [0], [0], [1], [0, 0, 1, 1], [], []>} : vector<32x32xf32>, vector<32x324xf32>, vector<32x324xf32> -> vector<32x324xf32>
    %98 = arith.addf %93, %97 : vector<32x324xf32>
    %99 = vector.extract_strided_slice %59 {offsets = [0, 147], sizes = [32, 324], strides = [1, 1]} : vector<32x471xf32> to vector<32x324xf32>
    %c8_74 = arith.constant 8 : index
    %c0_75 = arith.constant 0 : index
    %c0_76 = arith.constant 0 : index
    %100 = vector.load %arg5[%c8_74, %c0_75, %c0_76] : memref<9x32x32xf32, #tpu.memory_space<vmem>>, vector<1x32x32xf32>
    %101 = vector.shape_cast %100 : vector<1x32x32xf32> to vector<32x32xf32>
    %cst_77 = arith.constant dense<0.000000e+00> : vector<32x324xf32>
    %102 = tpu.matmul %101, %99, %cst_77 {dimension_numbers = #tpu.dot_dimension_numbers<[1], [0], [0], [1], [0, 0, 1, 1], [], []>} : vector<32x32xf32>, vector<32x324xf32>, vector<32x324xf32> -> vector<32x324xf32>
    %103 = arith.addf %98, %102 : vector<32x324xf32>
    %c0_78 = arith.constant 0 : index
    %c0_79 = arith.constant 0 : index
    %104 = vector.load %arg6[%c0_78, %c0_79] : memref<32x1xf32, #tpu.memory_space<vmem>>, vector<32x1xf32>
    %105 = vector.broadcast %104 : vector<32x1xf32> to vector<32x324xf32>
    %106 = arith.addf %103, %105 : vector<32x324xf32>
    %107 = vector.broadcast %0 : vector<1x324xf32> to vector<32x324xf32>
    %108 = arith.mulf %106, %107 : vector<32x324xf32>
    %c0_80 = arith.constant 0 : index
    %c128_81 = arith.constant 128 : index
    %109 = vector.load %arg12[%c0_80, %c128_81] : memref<32x471xf32, #tpu.memory_space<vmem>>, vector<32x324xf32>
    tpu.vector_store %arg12[%c0_80, %c128_81], %108 {strides = array<i32>} : memref<32x471xf32, #tpu.memory_space<vmem>>, vector<32x324xf32>,
    %c0_82 = arith.constant 0 : index
    %c0_83 = arith.constant 0 : index
    %110 = vector.load %arg12[%c0_82, %c0_83] : memref<32x471xf32, #tpu.memory_space<vmem>>, vector<32x471xf32>
    %111 = vector.extract_strided_slice %110 {offsets = [0, 109], sizes = [32, 324], strides = [1, 1]} : vector<32x471xf32> to vector<32x324xf32>
    %c0_84 = arith.constant 0 : index
    %c0_85 = arith.constant 0 : index
    %c0_86 = arith.constant 0 : index
    %112 = vector.load %arg7[%c0_84, %c0_85, %c0_86] : memref<9x32x32xf32, #tpu.memory_space<vmem>>, vector<1x32x32xf32>
    %113 = vector.shape_cast %112 : vector<1x32x32xf32> to vector<32x32xf32>
    %cst_87 = arith.constant dense<0.000000e+00> : vector<32x324xf32>
    %114 = tpu.matmul %113, %111, %cst_87 {dimension_numbers = #tpu.dot_dimension_numbers<[1], [0], [0], [1], [0, 0, 1, 1], [], []>} : vector<32x32xf32>, vector<32x324xf32>, vector<32x324xf32> -> vector<32x324xf32>
    %115 = vector.extract_strided_slice %110 {offsets = [0, 110], sizes = [32, 324], strides = [1, 1]} : vector<32x471xf32> to vector<32x324xf32>
    %c1_88 = arith.constant 1 : index
    %c0_89 = arith.constant 0 : index
    %c0_90 = arith.constant 0 : index
    %116 = vector.load %arg7[%c1_88, %c0_89, %c0_90] : memref<9x32x32xf32, #tpu.memory_space<vmem>>, vector<1x32x32xf32>
    %117 = vector.shape_cast %116 : vector<1x32x32xf32> to vector<32x32xf32>
    %cst_91 = arith.constant dense<0.000000e+00> : vector<32x324xf32>
    %118 = tpu.matmul %117, %115, %cst_91 {dimension_numbers = #tpu.dot_dimension_numbers<[1], [0], [0], [1], [0, 0, 1, 1], [], []>} : vector<32x32xf32>, vector<32x324xf32>, vector<32x324xf32> -> vector<32x324xf32>
    %119 = arith.addf %114, %118 : vector<32x324xf32>
    %120 = vector.extract_strided_slice %110 {offsets = [0, 111], sizes = [32, 324], strides = [1, 1]} : vector<32x471xf32> to vector<32x324xf32>
    %c2_92 = arith.constant 2 : index
    %c0_93 = arith.constant 0 : index
    %c0_94 = arith.constant 0 : index
    %121 = vector.load %arg7[%c2_92, %c0_93, %c0_94] : memref<9x32x32xf32, #tpu.memory_space<vmem>>, vector<1x32x32xf32>
    %122 = vector.shape_cast %121 : vector<1x32x32xf32> to vector<32x32xf32>
    %cst_95 = arith.constant dense<0.000000e+00> : vector<32x324xf32>
    %123 = tpu.matmul %122, %120, %cst_95 {dimension_numbers = #tpu.dot_dimension_numbers<[1], [0], [0], [1], [0, 0, 1, 1], [], []>} : vector<32x32xf32>, vector<32x324xf32>, vector<32x324xf32> -> vector<32x324xf32>
    %124 = arith.addf %119, %123 : vector<32x324xf32>
    %125 = vector.extract_strided_slice %110 {offsets = [0, 127], sizes = [32, 324], strides = [1, 1]} : vector<32x471xf32> to vector<32x324xf32>
    %c3_96 = arith.constant 3 : index
    %c0_97 = arith.constant 0 : index
    %c0_98 = arith.constant 0 : index
    %126 = vector.load %arg7[%c3_96, %c0_97, %c0_98] : memref<9x32x32xf32, #tpu.memory_space<vmem>>, vector<1x32x32xf32>
    %127 = vector.shape_cast %126 : vector<1x32x32xf32> to vector<32x32xf32>
    %cst_99 = arith.constant dense<0.000000e+00> : vector<32x324xf32>
    %128 = tpu.matmul %127, %125, %cst_99 {dimension_numbers = #tpu.dot_dimension_numbers<[1], [0], [0], [1], [0, 0, 1, 1], [], []>} : vector<32x32xf32>, vector<32x324xf32>, vector<32x324xf32> -> vector<32x324xf32>
    %129 = arith.addf %124, %128 : vector<32x324xf32>
    %130 = vector.extract_strided_slice %110 {offsets = [0, 128], sizes = [32, 324], strides = [1, 1]} : vector<32x471xf32> to vector<32x324xf32>
    %c4_100 = arith.constant 4 : index
    %c0_101 = arith.constant 0 : index
    %c0_102 = arith.constant 0 : index
    %131 = vector.load %arg7[%c4_100, %c0_101, %c0_102] : memref<9x32x32xf32, #tpu.memory_space<vmem>>, vector<1x32x32xf32>
    %132 = vector.shape_cast %131 : vector<1x32x32xf32> to vector<32x32xf32>
    %cst_103 = arith.constant dense<0.000000e+00> : vector<32x324xf32>
    %133 = tpu.matmul %132, %130, %cst_103 {dimension_numbers = #tpu.dot_dimension_numbers<[1], [0], [0], [1], [0, 0, 1, 1], [], []>} : vector<32x32xf32>, vector<32x324xf32>, vector<32x324xf32> -> vector<32x324xf32>
    %134 = arith.addf %129, %133 : vector<32x324xf32>
    %135 = vector.extract_strided_slice %110 {offsets = [0, 129], sizes = [32, 324], strides = [1, 1]} : vector<32x471xf32> to vector<32x324xf32>
    %c5_104 = arith.constant 5 : index
    %c0_105 = arith.constant 0 : index
    %c0_106 = arith.constant 0 : index
    %136 = vector.load %arg7[%c5_104, %c0_105, %c0_106] : memref<9x32x32xf32, #tpu.memory_space<vmem>>, vector<1x32x32xf32>
    %137 = vector.shape_cast %136 : vector<1x32x32xf32> to vector<32x32xf32>
    %cst_107 = arith.constant dense<0.000000e+00> : vector<32x324xf32>
    %138 = tpu.matmul %137, %135, %cst_107 {dimension_numbers = #tpu.dot_dimension_numbers<[1], [0], [0], [1], [0, 0, 1, 1], [], []>} : vector<32x32xf32>, vector<32x324xf32>, vector<32x324xf32> -> vector<32x324xf32>
    %139 = arith.addf %134, %138 : vector<32x324xf32>
    %140 = vector.extract_strided_slice %110 {offsets = [0, 145], sizes = [32, 324], strides = [1, 1]} : vector<32x471xf32> to vector<32x324xf32>
    %c6_108 = arith.constant 6 : index
    %c0_109 = arith.constant 0 : index
    %c0_110 = arith.constant 0 : index
    %141 = vector.load %arg7[%c6_108, %c0_109, %c0_110] : memref<9x32x32xf32, #tpu.memory_space<vmem>>, vector<1x32x32xf32>
    %142 = vector.shape_cast %141 : vector<1x32x32xf32> to vector<32x32xf32>
    %cst_111 = arith.constant dense<0.000000e+00> : vector<32x324xf32>
    %143 = tpu.matmul %142, %140, %cst_111 {dimension_numbers = #tpu.dot_dimension_numbers<[1], [0], [0], [1], [0, 0, 1, 1], [], []>} : vector<32x32xf32>, vector<32x324xf32>, vector<32x324xf32> -> vector<32x324xf32>
    %144 = arith.addf %139, %143 : vector<32x324xf32>
    %145 = vector.extract_strided_slice %110 {offsets = [0, 146], sizes = [32, 324], strides = [1, 1]} : vector<32x471xf32> to vector<32x324xf32>
    %c7_112 = arith.constant 7 : index
    %c0_113 = arith.constant 0 : index
    %c0_114 = arith.constant 0 : index
    %146 = vector.load %arg7[%c7_112, %c0_113, %c0_114] : memref<9x32x32xf32, #tpu.memory_space<vmem>>, vector<1x32x32xf32>
    %147 = vector.shape_cast %146 : vector<1x32x32xf32> to vector<32x32xf32>
    %cst_115 = arith.constant dense<0.000000e+00> : vector<32x324xf32>
    %148 = tpu.matmul %147, %145, %cst_115 {dimension_numbers = #tpu.dot_dimension_numbers<[1], [0], [0], [1], [0, 0, 1, 1], [], []>} : vector<32x32xf32>, vector<32x324xf32>, vector<32x324xf32> -> vector<32x324xf32>
    %149 = arith.addf %144, %148 : vector<32x324xf32>
    %150 = vector.extract_strided_slice %110 {offsets = [0, 147], sizes = [32, 324], strides = [1, 1]} : vector<32x471xf32> to vector<32x324xf32>
    %c8_116 = arith.constant 8 : index
    %c0_117 = arith.constant 0 : index
    %c0_118 = arith.constant 0 : index
    %151 = vector.load %arg7[%c8_116, %c0_117, %c0_118] : memref<9x32x32xf32, #tpu.memory_space<vmem>>, vector<1x32x32xf32>
    %152 = vector.shape_cast %151 : vector<1x32x32xf32> to vector<32x32xf32>
    %cst_119 = arith.constant dense<0.000000e+00> : vector<32x324xf32>
    %153 = tpu.matmul %152, %150, %cst_119 {dimension_numbers = #tpu.dot_dimension_numbers<[1], [0], [0], [1], [0, 0, 1, 1], [], []>} : vector<32x32xf32>, vector<32x324xf32>, vector<32x324xf32> -> vector<32x324xf32>
    %154 = arith.addf %149, %153 : vector<32x324xf32>
    %c0_120 = arith.constant 0 : index
    %c0_121 = arith.constant 0 : index
    %155 = vector.load %arg8[%c0_120, %c0_121] : memref<32x1xf32, #tpu.memory_space<vmem>>, vector<32x1xf32>
    %156 = vector.broadcast %155 : vector<32x1xf32> to vector<32x324xf32>
    %157 = arith.addf %154, %156 : vector<32x324xf32>
    %cst_122 = arith.constant 0.000000e+00 : f32
    %158 = vector.broadcast %cst_122 : f32 to vector<32x324xf32>
    %159 = arith.maximumf %157, %158 : vector<32x324xf32>
    %160 = vector.broadcast %0 : vector<1x324xf32> to vector<32x324xf32>
    %161 = arith.mulf %159, %160 : vector<32x324xf32>
    %c0_123 = arith.constant 0 : index
    %c128_124 = arith.constant 128 : index
    %162 = vector.load %arg12[%c0_123, %c128_124] : memref<32x471xf32, #tpu.memory_space<vmem>>, vector<32x324xf32>
    tpu.vector_store %arg12[%c0_123, %c128_124], %161 {strides = array<i32>} : memref<32x471xf32, #tpu.memory_space<vmem>>, vector<32x324xf32>,
    %c0_125 = arith.constant 0 : index
    %c0_126 = arith.constant 0 : index
    %163 = vector.load %arg12[%c0_125, %c0_126] : memref<32x471xf32, #tpu.memory_space<vmem>>, vector<32x471xf32>
    %164 = vector.extract_strided_slice %163 {offsets = [0, 109], sizes = [32, 324], strides = [1, 1]} : vector<32x471xf32> to vector<32x324xf32>
    %c0_127 = arith.constant 0 : index
    %c0_128 = arith.constant 0 : index
    %c0_129 = arith.constant 0 : index
    %165 = vector.load %arg9[%c0_127, %c0_128, %c0_129] : memref<9x4x32xf32, #tpu.memory_space<vmem>>, vector<1x4x32xf32>
    %166 = vector.shape_cast %165 : vector<1x4x32xf32> to vector<4x32xf32>
    %cst_130 = arith.constant dense<0.000000e+00> : vector<4x324xf32>
    %167 = tpu.matmul %166, %164, %cst_130 {dimension_numbers = #tpu.dot_dimension_numbers<[1], [0], [0], [1], [0, 0, 1, 1], [], []>} : vector<4x32xf32>, vector<32x324xf32>, vector<4x324xf32> -> vector<4x324xf32>
    %168 = vector.extract_strided_slice %163 {offsets = [0, 110], sizes = [32, 324], strides = [1, 1]} : vector<32x471xf32> to vector<32x324xf32>
    %c1_131 = arith.constant 1 : index
    %c0_132 = arith.constant 0 : index
    %c0_133 = arith.constant 0 : index
    %169 = vector.load %arg9[%c1_131, %c0_132, %c0_133] : memref<9x4x32xf32, #tpu.memory_space<vmem>>, vector<1x4x32xf32>
    %170 = vector.shape_cast %169 : vector<1x4x32xf32> to vector<4x32xf32>
    %cst_134 = arith.constant dense<0.000000e+00> : vector<4x324xf32>
    %171 = tpu.matmul %170, %168, %cst_134 {dimension_numbers = #tpu.dot_dimension_numbers<[1], [0], [0], [1], [0, 0, 1, 1], [], []>} : vector<4x32xf32>, vector<32x324xf32>, vector<4x324xf32> -> vector<4x324xf32>
    %172 = arith.addf %167, %171 : vector<4x324xf32>
    %173 = vector.extract_strided_slice %163 {offsets = [0, 111], sizes = [32, 324], strides = [1, 1]} : vector<32x471xf32> to vector<32x324xf32>
    %c2_135 = arith.constant 2 : index
    %c0_136 = arith.constant 0 : index
    %c0_137 = arith.constant 0 : index
    %174 = vector.load %arg9[%c2_135, %c0_136, %c0_137] : memref<9x4x32xf32, #tpu.memory_space<vmem>>, vector<1x4x32xf32>
    %175 = vector.shape_cast %174 : vector<1x4x32xf32> to vector<4x32xf32>
    %cst_138 = arith.constant dense<0.000000e+00> : vector<4x324xf32>
    %176 = tpu.matmul %175, %173, %cst_138 {dimension_numbers = #tpu.dot_dimension_numbers<[1], [0], [0], [1], [0, 0, 1, 1], [], []>} : vector<4x32xf32>, vector<32x324xf32>, vector<4x324xf32> -> vector<4x324xf32>
    %177 = arith.addf %172, %176 : vector<4x324xf32>
    %178 = vector.extract_strided_slice %163 {offsets = [0, 127], sizes = [32, 324], strides = [1, 1]} : vector<32x471xf32> to vector<32x324xf32>
    %c3_139 = arith.constant 3 : index
    %c0_140 = arith.constant 0 : index
    %c0_141 = arith.constant 0 : index
    %179 = vector.load %arg9[%c3_139, %c0_140, %c0_141] : memref<9x4x32xf32, #tpu.memory_space<vmem>>, vector<1x4x32xf32>
    %180 = vector.shape_cast %179 : vector<1x4x32xf32> to vector<4x32xf32>
    %cst_142 = arith.constant dense<0.000000e+00> : vector<4x324xf32>
    %181 = tpu.matmul %180, %178, %cst_142 {dimension_numbers = #tpu.dot_dimension_numbers<[1], [0], [0], [1], [0, 0, 1, 1], [], []>} : vector<4x32xf32>, vector<32x324xf32>, vector<4x324xf32> -> vector<4x324xf32>
    %182 = arith.addf %177, %181 : vector<4x324xf32>
    %183 = vector.extract_strided_slice %163 {offsets = [0, 128], sizes = [32, 324], strides = [1, 1]} : vector<32x471xf32> to vector<32x324xf32>
    %c4_143 = arith.constant 4 : index
    %c0_144 = arith.constant 0 : index
    %c0_145 = arith.constant 0 : index
    %184 = vector.load %arg9[%c4_143, %c0_144, %c0_145] : memref<9x4x32xf32, #tpu.memory_space<vmem>>, vector<1x4x32xf32>
    %185 = vector.shape_cast %184 : vector<1x4x32xf32> to vector<4x32xf32>
    %cst_146 = arith.constant dense<0.000000e+00> : vector<4x324xf32>
    %186 = tpu.matmul %185, %183, %cst_146 {dimension_numbers = #tpu.dot_dimension_numbers<[1], [0], [0], [1], [0, 0, 1, 1], [], []>} : vector<4x32xf32>, vector<32x324xf32>, vector<4x324xf32> -> vector<4x324xf32>
    %187 = arith.addf %182, %186 : vector<4x324xf32>
    %188 = vector.extract_strided_slice %163 {offsets = [0, 129], sizes = [32, 324], strides = [1, 1]} : vector<32x471xf32> to vector<32x324xf32>
    %c5_147 = arith.constant 5 : index
    %c0_148 = arith.constant 0 : index
    %c0_149 = arith.constant 0 : index
    %189 = vector.load %arg9[%c5_147, %c0_148, %c0_149] : memref<9x4x32xf32, #tpu.memory_space<vmem>>, vector<1x4x32xf32>
    %190 = vector.shape_cast %189 : vector<1x4x32xf32> to vector<4x32xf32>
    %cst_150 = arith.constant dense<0.000000e+00> : vector<4x324xf32>
    %191 = tpu.matmul %190, %188, %cst_150 {dimension_numbers = #tpu.dot_dimension_numbers<[1], [0], [0], [1], [0, 0, 1, 1], [], []>} : vector<4x32xf32>, vector<32x324xf32>, vector<4x324xf32> -> vector<4x324xf32>
    %192 = arith.addf %187, %191 : vector<4x324xf32>
    %193 = vector.extract_strided_slice %163 {offsets = [0, 145], sizes = [32, 324], strides = [1, 1]} : vector<32x471xf32> to vector<32x324xf32>
    %c6_151 = arith.constant 6 : index
    %c0_152 = arith.constant 0 : index
    %c0_153 = arith.constant 0 : index
    %194 = vector.load %arg9[%c6_151, %c0_152, %c0_153] : memref<9x4x32xf32, #tpu.memory_space<vmem>>, vector<1x4x32xf32>
    %195 = vector.shape_cast %194 : vector<1x4x32xf32> to vector<4x32xf32>
    %cst_154 = arith.constant dense<0.000000e+00> : vector<4x324xf32>
    %196 = tpu.matmul %195, %193, %cst_154 {dimension_numbers = #tpu.dot_dimension_numbers<[1], [0], [0], [1], [0, 0, 1, 1], [], []>} : vector<4x32xf32>, vector<32x324xf32>, vector<4x324xf32> -> vector<4x324xf32>
    %197 = arith.addf %192, %196 : vector<4x324xf32>
    %198 = vector.extract_strided_slice %163 {offsets = [0, 146], sizes = [32, 324], strides = [1, 1]} : vector<32x471xf32> to vector<32x324xf32>
    %c7_155 = arith.constant 7 : index
    %c0_156 = arith.constant 0 : index
    %c0_157 = arith.constant 0 : index
    %199 = vector.load %arg9[%c7_155, %c0_156, %c0_157] : memref<9x4x32xf32, #tpu.memory_space<vmem>>, vector<1x4x32xf32>
    %200 = vector.shape_cast %199 : vector<1x4x32xf32> to vector<4x32xf32>
    %cst_158 = arith.constant dense<0.000000e+00> : vector<4x324xf32>
    %201 = tpu.matmul %200, %198, %cst_158 {dimension_numbers = #tpu.dot_dimension_numbers<[1], [0], [0], [1], [0, 0, 1, 1], [], []>} : vector<4x32xf32>, vector<32x324xf32>, vector<4x324xf32> -> vector<4x324xf32>
    %202 = arith.addf %197, %201 : vector<4x324xf32>
    %203 = vector.extract_strided_slice %163 {offsets = [0, 147], sizes = [32, 324], strides = [1, 1]} : vector<32x471xf32> to vector<32x324xf32>
    %c8_159 = arith.constant 8 : index
    %c0_160 = arith.constant 0 : index
    %c0_161 = arith.constant 0 : index
    %204 = vector.load %arg9[%c8_159, %c0_160, %c0_161] : memref<9x4x32xf32, #tpu.memory_space<vmem>>, vector<1x4x32xf32>
    %205 = vector.shape_cast %204 : vector<1x4x32xf32> to vector<4x32xf32>
    %cst_162 = arith.constant dense<0.000000e+00> : vector<4x324xf32>
    %206 = tpu.matmul %205, %203, %cst_162 {dimension_numbers = #tpu.dot_dimension_numbers<[1], [0], [0], [1], [0, 0, 1, 1], [], []>} : vector<4x32xf32>, vector<32x324xf32>, vector<4x324xf32> -> vector<4x324xf32>
    %207 = arith.addf %202, %206 : vector<4x324xf32>
    %c0_163 = arith.constant 0 : index
    %c0_164 = arith.constant 0 : index
    %208 = vector.load %arg10[%c0_163, %c0_164] : memref<4x1xf32, #tpu.memory_space<vmem>>, vector<4x1xf32>
    %209 = vector.broadcast %208 : vector<4x1xf32> to vector<4x324xf32>
    %210 = arith.addf %207, %209 : vector<4x324xf32>
    %c0_165 = arith.constant 0 : index
    %c0_166 = arith.constant 0 : index
    %c0_167 = arith.constant 0 : index
    %211 = vector.load %arg11[%c0_165, %c0_166, %c0_167] : memref<1x4x324xf32, #tpu.memory_space<vmem>>, vector<1x4x324xf32>
    %212 = vector.shape_cast %211 : vector<1x4x324xf32> to vector<4x324xf32>
    %213 = vector.shape_cast %210 : vector<4x324xf32> to vector<1x4x324xf32>
    tpu.vector_store %arg11[%c0_165, %c0_166, %c0_167], %213 {strides = array<i32>} : memref<1x4x324xf32, #tpu.memory_space<vmem>>, vector<1x4x324xf32>,
    return
  }
  func.func @transform_0(%arg0: i32) -> (i32, i32, i32) {
    %c0_i32 = arith.constant 0 : i32
    %c0_i32_0 = arith.constant 0 : i32
    %c0_i32_1 = arith.constant 0 : i32
    return %arg0, %c0_i32, %c0_i32_0 : i32, i32, i32
  }
  func.func @transform_1(%arg0: i32) -> (i32, i32) {
    %c0_i32 = arith.constant 0 : i32
    %c0_i32_0 = arith.constant 0 : i32
    %c0_i32_1 = arith.constant 0 : i32
    return %c0_i32, %c0_i32_0 : i32, i32
  }
  func.func @transform_2(%arg0: i32) -> (i32, i32, i32) {
    %c0_i32 = arith.constant 0 : i32
    %c0_i32_0 = arith.constant 0 : i32
    %c0_i32_1 = arith.constant 0 : i32
    %c0_i32_2 = arith.constant 0 : i32
    return %c0_i32, %c0_i32_0, %c0_i32_1 : i32, i32, i32
  }
  func.func @transform_3(%arg0: i32) -> (i32, i32) {
    %c0_i32 = arith.constant 0 : i32
    %c0_i32_0 = arith.constant 0 : i32
    %c0_i32_1 = arith.constant 0 : i32
    return %c0_i32, %c0_i32_0 : i32, i32
  }
  func.func @transform_4(%arg0: i32) -> (i32, i32, i32) {
    %c0_i32 = arith.constant 0 : i32
    %c0_i32_0 = arith.constant 0 : i32
    %c0_i32_1 = arith.constant 0 : i32
    %c0_i32_2 = arith.constant 0 : i32
    return %c0_i32, %c0_i32_0, %c0_i32_1 : i32, i32, i32
  }
  func.func @transform_5(%arg0: i32) -> (i32, i32) {
    %c0_i32 = arith.constant 0 : i32
    %c0_i32_0 = arith.constant 0 : i32
    %c0_i32_1 = arith.constant 0 : i32
    return %c0_i32, %c0_i32_0 : i32, i32
  }
  func.func @transform_6(%arg0: i32) -> (i32, i32, i32) {
    %c0_i32 = arith.constant 0 : i32
    %c0_i32_0 = arith.constant 0 : i32
    %c0_i32_1 = arith.constant 0 : i32
    %c0_i32_2 = arith.constant 0 : i32
    return %c0_i32, %c0_i32_0, %c0_i32_1 : i32, i32, i32
  }
  func.func @transform_7(%arg0: i32) -> (i32, i32) {
    %c0_i32 = arith.constant 0 : i32
    %c0_i32_0 = arith.constant 0 : i32
    %c0_i32_1 = arith.constant 0 : i32
    return %c0_i32, %c0_i32_0 : i32, i32
  }
  func.func @transform_8(%arg0: i32) -> (i32, i32, i32) {
    %c0_i32 = arith.constant 0 : i32
    %c0_i32_0 = arith.constant 0 : i32
    %c0_i32_1 = arith.constant 0 : i32
    %c0_i32_2 = arith.constant 0 : i32
    return %c0_i32, %c0_i32_0, %c0_i32_1 : i32, i32, i32
  }
  func.func @transform_9(%arg0: i32) -> (i32, i32) {
    %c0_i32 = arith.constant 0 : i32
    %c0_i32_0 = arith.constant 0 : i32
    %c0_i32_1 = arith.constant 0 : i32
    return %c0_i32, %c0_i32_0 : i32, i32
  }
  func.func @transform_10(%arg0: i32) -> (i32, i32, i32) {
    %c0_i32 = arith.constant 0 : i32
    %c0_i32_0 = arith.constant 0 : i32
    %c0_i32_1 = arith.constant 0 : i32
    return %arg0, %c0_i32, %c0_i32_0 : i32, i32, i32
  }
}

</mosaic_0001>

<bundles_post_ra>
// kernel: unet_forward.1
= control target key start
LH: loop header
LB: loop body
LE: loop exit
PB: predicated region body
PF: predicated region fallthrough
CT: control target
= control target key end

     0   :  { %s11541_s13 = smov 0   ;;  %s13344_s0 = inlined_call_operand.vmem [shape: f32[2,4,471], index: 0, kind: input, shape index: {}]   ;;  %s13345_s1 = inlined_call_operand.vmem [shape: f32[1,324], index: 1, kind: input, shape index: {}]   ;;  %s13346_s2 = inlined_call_operand.vmem [shape: f32[9,32,4], index: 2, kind: input, shape index: {}]   ;;  %s13347_s3 = inlined_call_operand.vmem [shape: f32[32,1], index: 3, kind: input, shape index: {}]   ;;  %s13348_s4 = inlined_call_operand.vmem [shape: f32[9,32,32], index: 4, kind: input, shape index: {}]   ;;  %s13349_s5 = inlined_call_operand.vmem [shape: f32[32,1], index: 5, kind: input, shape index: {}]   ;;  %s13350_s6 = inlined_call_operand.vmem [shape: f32[9,32,32], index: 6, kind: input, shape index: {}]   ;;  %s13351_s7 = inlined_call_operand.vmem [shape: f32[32,1], index: 7, kind: input, shape index: {}]   ;;  %s13352_s8 = inlined_call_operand.vmem [shape: f32[9,4,32], index: 8, kind: input, shape index: {}]   ;;  %s13353_s9 = inlined_call_operand.vmem [shape: f32[4,1], index: 9, kind: input, shape index: {}]   ;;  %s13354_s10 = inlined_call_operand.vmem [shape: f32[2,4,324], index: 10, kind: output, shape index: {}]  }
   0x1 LB: > { %s8845_s14 = sadd.s32 4294967295, %s11472_s13   ;;  %p8849_p0 = scmp.ge.s32.totalorder %s11472_s13, 1  ;;  %s11472_s13 = sphi %s11541_s13, %s20_s13  }
   0x2   : > { %p312_p1 = scmp.lt.s32.totalorder %s11472_s13, 3 }
   0x4   : > { %p313_p2 = pnand %p8849_p0, %p312_p1 }
   0x5   : > { %p350_p3 = scmp.lt.s32.totalorder (!%p313_p2), %s8845_s14, 1  ;;  %v11474_v0 = vmov (!%p313_p2), 0.0   ;;  %s11475_s19 = smov (!%p313_p2), 18   ;;  %vm393_vm0 = vcmask (!%p313_p2), 146432   ;;  %vm410_vm1 = vcmask (!%p313_p2), 1043456   ;;  %vm599_vm2 = vcmask (!%p313_p2), 154624  }
   0x6   : > { %316 = sbr.rel (%p313_p2) target bundleno = 2045 (0x7fd), region = 60  ;;  %481 = vmatprep.mubr.f32.mxu0 (!%p313_p2), %v11474_v0  ;;  %361 = vst [vmem:[#allocation2] sm:$0xff] (!%p313_p2), %v11474_v0  ;;  %499 = vmatprep.mubr.f32.mxu1 (!%p313_p2), %v11474_v0  ;;  %s11476_s20 = smov (!%p313_p2), 19   ;;  %v8853_v10 = vld [vmem:[%s13346_s2 + $0x20] sm:$0xff] (!%p313_p2)  ;;  %vm397_vm3 = vcmask (!%p313_p2), 31744   ;;  %v11628_v11 = vld [vmem:[%s13346_s2 + $0x38] sm:$0xff] (!%p313_p2) }
   0x7   : > { %s11477_s21 = smov (!%p313_p2), 17   ;;  %s11478_s22 = smov (!%p313_p2), 1   ;;  %v8854_v17 = vld [vmem:[%s13346_s2 + $0x28] sm:$0xff] (!%p313_p2)  ;;  %vm808_vm4 = vcmask (!%p313_p2), 138240   ;;  %v8855_v20 = vld [vmem:[%s13346_s2 + $0x30] sm:$0xff] (!%p313_p2)  ;;  %v2318_v25 = vld [vmem:[%s13347_s3] sm:$0xff] (!%p313_p2) }
   0x8   : > { %s11479_s23 = smov (!%p313_p2), 127   ;;  %s11480_s24 = smov (!%p313_p2), 111   ;;  %v2319_v24 = vld [vmem:[%s13347_s3 + $0x8] sm:$0xff] (!%p313_p2)  ;;  %v372_v26 = vld [vmem:[%s13346_s2] sm:$0xff] (!%p313_p2)  ;;  %v11483_v27 = vmov (!%p313_p2), 0   ;;  %vm1029_vm5 = vcmask (!%p313_p2), 7168  }
   0x9   : > { %s11481_s25 = smov (!%p313_p2), 110   ;;  %s11482_s26 = smov (!%p313_p2), 109   ;;  %10620 = vset.pattern.permute.xlu1 (!%p313_p2), %v11483_v27  ;;  %10619 = vset.pattern.permute.xlu0 (!%p313_p2), %v11483_v27  ;;  %v2320_v30 = vld [vmem:[%s13347_s3 + $0x10] sm:$0xff] (!%p313_p2)  ;;  %v2321_v32 = vld [vmem:[%s13347_s3 + $0x18] sm:$0xff] (!%p313_p2)  ;;  %v373_v33 = vld [vmem:[%s13346_s2 + $0x8] sm:$0xff] (!%p313_p2)  ;;  %vm1457_vm6 = vcmask (!%p313_p2), 1039360  }
   0xa   : > { %v374_v37 = vld [vmem:[%s13346_s2 + $0x10] sm:$0xff] (!%p313_p2)  ;;  %v375_v41 = vld [vmem:[%s13346_s2 + $0x18] sm:$0xff] (!%p313_p2)  ;;  %v8879_v44 = vld [vmem:[%s13346_s2 + $0x40] sm:$0xff] (!%p313_p2)  ;;  %vm1675_vm7 = vcmask (!%p313_p2), 908288   ;;  %vm1893_vm8 = vcmask (!%p313_p2), 900096   ;;  %vm365_vm9 = vcmask (!%p313_p2), 712224  }
   0xb   : > { %v8880_v49 = vld [vmem:[%s13346_s2 + $0x48] sm:$0xff] (!%p313_p2)  ;;  %v8881_v52 = vld [vmem:[%s13346_s2 + $0x50] sm:$0xff] (!%p313_p2)  ;;  %v8882_v54 = vld [vmem:[%s13346_s2 + $0x58] sm:$0xff] (!%p313_p2)  ;;  %367 = vst.msk [vmem:[#allocation2 + $0x38] sm:$0xff] (!%p313_p2), %vm365_vm9, %v11474_v0  ;;  %vm2111_vm10 = vcmask (!%p313_p2), 891904   ;;  %vm2396_vm11 = vcmask (!%p313_p2), 556032  }
   0xc   : > { %v8894_v56 = vld [vmem:[%s13346_s2 + $0x60] sm:$0xff] (!%p313_p2)  ;;  %v8895_v58 = vld [vmem:[%s13346_s2 + $0x68] sm:$0xff] (!%p313_p2)  ;;  %v8896_v60 = vld [vmem:[%s13346_s2 + $0x70] sm:$0xff] (!%p313_p2)  ;;  %366 = vst.msk [vmem:[#allocation2 + $0x18] sm:$0xff] (!%p313_p2), %vm365_vm9, %v11474_v0  ;;  %vm2504_vm12 = vcmask (!%p313_p2), 261120   ;;  %vm11485_vm13 = vmmov (!%p313_p2), 0  }
   0xd   : > { %s13356_s14 = smov (!%p350_p3, %s8845_s14), 1  ;;  %v8897_v61 = vld [vmem:[%s13346_s2 + $0x78] sm:$0xff]  ;;  %v8909_v62 = vld [vmem:[%s13346_s2 + $0x80] sm:$0xff]  ;;  %v8910_v63 = vld [vmem:[%s13346_s2 + $0x88] sm:$0xff]  ;;  %368 = vst.msk [vmem:[#allocation2 + $0x58] sm:$0xff] %vm365_vm9, %v11474_v0  ;;  %vm8788_vm14 = vcmask 551936  }
   0xe   : > { %s9220_s15 = sshll.u32 %s13356_s14, 4  ;;  %369 = vst.msk [vmem:[#allocation2 + $0x78] sm:$0xff] %vm365_vm9, %v11474_v0 }
   0xf   : > { %s354_s18 = scalar_lea.vmem %s13344_s0, %s9220_s15 }
  0x10   : > { %v370_v1 = vld [vmem:[%s354_s18] sm:$0xff]  ;;  %v11563_v3 = vld [vmem:[%s354_s18 + $0x8] sm:$0xff] }
  0x11   : > { %385 = vrot.lane.b32.xlu1 %v370_v1, %s11475_s19  ;;  %v11559_v2 = vcombine.high %v370_v1, %v370_v1  ;;  %v11581_v4 = vcombine.high %v11563_v3, %v11563_v3 }
  0x13   : > { %387 = vrot.lane.b32.xlu0 %v11559_v2, %s11475_s19 }
  0x15   : > { %593 = vrot.lane.b32.xlu1 %v11559_v2, %s11476_s20 }
  0x17   : > { %389 = vrot.lane.b32.xlu0 %v11563_v3, %s11475_s19 }
  0x19   : > { %591 = vrot.lane.b32.xlu1 %v370_v1, %s11476_s20 }
  0x1b   : > { %595 = vrot.lane.b32.xlu0 %v11563_v3, %s11476_s20 }
  0x1d   : > { %804 = vrot.lane.b32.xlu1 %v11563_v3, %s11477_s21 }
  0x1f   : > { %802 = vrot.lane.b32.xlu0 %v11559_v2, %s11477_s21 }
  0x21   : > { %1023 = vrot.lane.b32.xlu1 %v11559_v2, %s11478_s22 }
  0x23   : > { %800 = vrot.lane.b32.xlu0 %v370_v1, %s11477_s21 }
  0x25   : > { %1021 = vrot.lane.b32.xlu1 %v370_v1, %s11478_s22  ;;  %v8911_v1 = vld [vmem:[%s13346_s2 + $0x90] sm:$0xff] }
  0x27   : > { %1025 = vrot.lane.b32.xlu0 %v11563_v3, %s11478_s22 }
  0x29   : > { %1455 = vrot.lane.b32.xlu1 %v11581_v4, %s11479_s23 }
  0x2b   : > { %1453 = vrot.lane.b32.xlu0 %v11563_v3, %s11479_s23 }
  0x2d   : > { %391 = vrot.lane.b32.xlu1 %v11581_v4, %s11475_s19 }
  0x2f   : > { %1451 = vrot.lane.b32.xlu0 %v11559_v2, %s11479_s23 }
  0x31   : > { %1673 = vrot.lane.b32.xlu1 %v11581_v4, %s11480_s24 }
  0x33   : > { %1671 = vrot.lane.b32.xlu0 %v11563_v3, %s11480_s24 }
  0x35   : > { %597 = vrot.lane.b32.xlu1 %v11581_v4, %s11476_s20 }
  0x37   : > { %1669 = vrot.lane.b32.xlu0 %v11559_v2, %s11480_s24 }
  0x39   : > { %1889 = vrot.lane.b32.xlu1 %v11563_v3, %s11481_s25 }
  0x3b   : > { %806 = vrot.lane.b32.xlu0 %v11581_v4, %s11477_s21 }
  0x3d   : > { %1887 = vrot.lane.b32.xlu1 %v11559_v2, %s11481_s25 }
  0x3f   : > { %1891 = vrot.lane.b32.xlu0 %v11581_v4, %s11481_s25 }
  0x41   : > { %2107 = vrot.lane.b32.xlu1 %v11563_v3, %s11482_s26 }
  0x43   : > { %1027 = vrot.lane.b32.xlu0 %v11581_v4, %s11478_s22 }
  0x45   : > { %2105 = vrot.lane.b32.xlu1 %v11559_v2, %s11482_s26 }
  0x47   : > { %2109 = vrot.lane.b32.xlu0 %v11581_v4, %s11482_s26 }
  0x49   : > { %2329 = vperm.xlu1 %10620, %v2319_v24  }
  0x4b   : > { %2324 = vperm.xlu0 %10619, %v2318_v25   ;;  %v8972_v25 = vld [vmem:[%s13346_s2 + $0x118] sm:$0xff] }
  0x4d   : > { %2334 = vperm.xlu1 %10620, %v2320_v30  }
  0x4f   : > { %2339 = vperm.xlu0 %10619, %v2321_v32  }
  0x51   : > { %10622 = vrot.lane.b32.xlu1 %v11474_v0, %s11475_s19 }
  0x83   : > { %v386_v5 = vpop.permute.xlu1 %385 }
  0x85   : > { %v388_v6 = vpop.permute.xlu0 %387 }
  0x86   : > { %v394_v13 = vsel %vm393_vm0, %v386_v5, %v388_v6  ;;  %v8925_v5 = vld [vmem:[%s13346_s2 + $0xa8] sm:$0xff] }
  0x87   : > { %v594_v7 = vpop.permute.xlu1 %593 }
  0x89   : > { %v11618_v8 = vpop.permute.xlu0 %389 }
  0x8a   : > { %v395_v9 = vsel %vm393_vm0, %v388_v6, %v11618_v8 }
  0x8b   : > { %v592_v12 = vpop.permute.xlu1 %591  ;;  %8857 = vmatprep.subr.msk.mxu0 %vm410_vm1, %v395_v9  ;;  %10292 = vmatprep.subr.msk.mxu1 %vm410_vm1, %v395_v9  ;;  %v8939_v9 = vld [vmem:[%s13346_s2 + $0xc0] sm:$0xff] }
  0x8c   : > { %8858 = vmatpush1.msk.msra.mxu0 %vm410_vm1, %v394_v13  ;;  %10293 = vmatpush1.msk.msra.mxu1 %vm410_vm1, %v394_v13  ;;  %v600_v14 = vsel %vm599_vm2, %v592_v12, %v594_v7  ;;  %v8942_v13 = vld [vmem:[%s13346_s2 + $0xd8] sm:$0xff] }
  0x8d   : > { %8859 = vmatmul.mubr.msk.f32.vlgmr.msra.gmra.mrb[0].mxu0 %vm397_vm3, %v8853_v10  ;;  %v11637_v15 = vpop.permute.xlu0 %595  ;;  %8862 = vmatmul.mubr.msk.f32.vlgmr.msra.gmra.mrb[0].mxu1 %vm397_vm3, %v11628_v11 }
  0x8e   : > { %v601_v16 = vsel %vm599_vm2, %v594_v7, %v11637_v15  ;;  %487 = vmatprep.mubr.f32.mxu0 %v11474_v0  ;;  %9457 = vmatprep.mubr.msk.f32.mxu1 %vm397_vm3, %v8853_v10  ;;  %v8926_v7 = vld [vmem:[%s13346_s2 + $0xb0] sm:$0xff]  ;;  %v8940_v10 = vld [vmem:[%s13346_s2 + $0xc8] sm:$0xff] }
  0x8f   : > { %v11648_v18 = vpop.permute.xlu1 %804  ;;  %8868 = vmatprep.subr.msk.mxu0 %vm410_vm1, %v601_v16 }
  0x90   : > { %8869 = vmatpush1.msk.msra.mxu0 %vm410_vm1, %v600_v14  ;;  %v8954_v14 = vld [vmem:[%s13346_s2 + $0xe0] sm:$0xff] }
  0x91   : > { %8860 = vmatmul.mubr.msk.f32.gmra.mrb[2].mxu0 %vm397_vm3, %v8854_v17  ;;  %v803_v19 = vpop.permute.xlu0 %802 }
  0x92   : > { %493 = vmatprep.mubr.f32.mxu0 %v11474_v0  ;;  %v810_v21 = vsel %vm808_vm4, %v803_v19, %v11648_v18 }
  0x93   : > { %v1024_v22 = vpop.permute.xlu1 %1023  ;;  %8883 = vmatprep.subr.msk.mxu0 %vm410_vm1, %v810_v21  ;;  %v8969_v21 = vld [vmem:[%s13346_s2 + $0x100] sm:$0xff] }
  0x95   : > { %8861 = vmatmul.mubr.msk.f32.gmra.mrb[4].mxu0 %vm397_vm3, %v8855_v20  ;;  %v801_v23 = vpop.permute.xlu0 %800 }
  0x96   : > { %685 = vmatprep.mubr.f32.mxu0 %v11474_v0  ;;  %v809_v28 = vsel %vm808_vm4, %v801_v23, %v803_v19  ;;  %v8956_v19 = vld [vmem:[%s13346_s2 + $0xf0] sm:$0xff] }
  0x97   : > { %v1022_v29 = vpop.permute.xlu1 %1021  ;;  %v8971_v23 = vld [vmem:[%s13346_s2 + $0x110] sm:$0xff] }
  0x98   : > { %v1030_v45 = vsel %vm1029_vm5, %v1022_v29, %v1024_v22 }
  0x99   : > { %8870 = vmatmul.mubr.msk.f32.vlgmr.msra.gmra.mrb[0].mxu0 %vm397_vm3, %v372_v26  ;;  %v11676_v31 = vpop.permute.xlu0 %1025 }
  0x9a   : > { %8884 = vmatpush1.msk.msra.mxu0 %vm410_vm1, %v809_v28  ;;  %691 = vmatprep.mubr.f32.mxu0 %v11474_v0  ;;  %v1031_v34 = vsel %vm1029_vm5, %v1024_v22, %v11676_v31  ;;  %v8970_v22 = vld [vmem:[%s13346_s2 + $0x108] sm:$0xff] }
  0x9b   : > { %v11688_v35 = vpop.permute.xlu1 %1455  ;;  %8898 = vmatprep.subr.msk.mxu0 %vm410_vm1, %v1031_v34 }
  0x9d   : > { %8871 = vmatmul.mubr.msk.f32.gmra.mrb[2].mxu0 %vm397_vm3, %v373_v33  ;;  %v11692_v36 = vpop.permute.xlu0 %1453 }
  0x9e   : > { %697 = vmatprep.mubr.f32.mxu0 %v11474_v0  ;;  %v1459_v59 = vsel %vm1457_vm6, %v11692_v36, %v11688_v35 }
  0x9f   : > { %v392_v38 = vpop.permute.xlu1 %391 }
  0xa0   : > { %v396_v39 = vsel %vm393_vm0, %v11618_v8, %v392_v38  ;;  %v8927_v8 = vld [vmem:[%s13346_s2 + $0xb8] sm:$0xff]  ;;  %v360_v38 = vld [vmem:[%s13345_s1] sm:$0x7] }
  0xa1   : > { %9455 = vmatprep.subr.msk.mxu1 %vm410_vm1, %v396_v39  ;;  %8872 = vmatmul.mubr.msk.f32.gmra.mrb[4].mxu0 %vm397_vm3, %v374_v37  ;;  %v11702_v40 = vpop.permute.xlu0 %1451 }
  0xa2   : > { %9456 = vmatpush3.msk.msra.mxu1 %vm410_vm1, %v396_v39  ;;  %703 = vmatprep.mubr.f32.mxu0 %v11474_v0 }
  0xa3   : > { %v11709_v42 = vpop.permute.xlu1 %1673  ;;  %9458 = vmatmul.mubr.msk.f32.vlgmr.msra.gmra.mrb[2].mxu1 %vm397_vm3, %v8854_v17  ;;  %v8955_v17 = vld [vmem:[%s13346_s2 + $0xe8] sm:$0xff] }
  0xa4   : > { %9460 = vmatprep.mubr.msk.f32.mxu1 %vm397_vm3, %v8855_v20  ;;  %v8957_v20 = vld [vmem:[%s13346_s2 + $0xf8] sm:$0xff] }
  0xa5   : > { %8873 = vmatmul.mubr.msk.f32.gmra.mrb[6].mxu0 %vm397_vm3, %v375_v41  ;;  %v11714_v43 = vpop.permute.xlu0 %1671 }
  0xa6   : > { %894 = vmatprep.mubr.f32.mxu0 %v11474_v0  ;;  %v1677_v6 = vsel %vm1675_vm7, %v11714_v43, %v11709_v42 }
  0xa7   : > { %v598_v46 = vpop.permute.xlu1 %597  ;;  %9461 = vmatmul.mubr.msk.f32.gmra.mrb[4].mxu1 %vm397_vm3, %v11628_v11  ;;  %v8941_v11 = vld [vmem:[%s13346_s2 + $0xd0] sm:$0xff] }
  0xa8   : > { %v602_v47 = vsel %vm599_vm2, %v11637_v15, %v598_v46  ;;  %9465 = vmatprep.mubr.msk.f32.mxu1 %vm397_vm3, %v372_v26 }
  0xa9   : > { %9463 = vmatprep.subr.msk.mxu1 %vm410_vm1, %v602_v47  ;;  %8885 = vmatmul.mubr.msk.f32.vlgmr.msra.gmra.mrb[0].mxu0 %vm397_vm3, %v8879_v44  ;;  %v11728_v48 = vpop.permute.xlu0 %1669 }
  0xaa   : > { %9464 = vmatpush3.msk.msra.mxu1 %vm410_vm1, %v602_v47  ;;  %8899 = vmatpush1.msk.msra.mxu0 %vm410_vm1, %v1030_v45  ;;  %v1676_v16 = vsel %vm1675_vm7, %v11728_v48, %v11714_v43 }
  0xab   : > { %9466 = vmatmul.mubr.msk.f32.vlgmr.msra.gmra.mrb[2].mxu1 %vm397_vm3, %v373_v33  ;;  %900 = vmatprep.mubr.f32.mxu0 %v11474_v0  ;;  %v1890_v15 = vpop.permute.xlu1 %1889  ;;  %v2367_v33 = vlaneseq }
  0xac   : > { %9468 = vmatprep.mubr.msk.f32.mxu1 %vm397_vm3, %v374_v37  ;;  %8913 = vmatprep.subr.msk.mxu0 %vm410_vm1, %v11563_v3  ;;  %v8924_v3 = vld [vmem:[%s13346_s2 + $0xa0] sm:$0xff] }
  0xad   : > { %8886 = vmatmul.mubr.msk.f32.gmra.mrb[2].mxu0 %vm397_vm3, %v8880_v49  ;;  %v807_v50 = vpop.permute.xlu0 %806  ;;  %v2368_v34 = vshrl.u32 %v2367_v33, 7 }
  0xae   : > { %v811_v51 = vsel %vm808_vm4, %v11648_v18, %v807_v50  ;;  %906 = vmatprep.mubr.f32.mxu0 %v11474_v0 }
  0xaf   : > { %9469 = vmatmul.mubr.msk.f32.gmra.mrb[4].mxu1 %vm397_vm3, %v375_v41  ;;  %9471 = vmatprep.subr.msk.mxu1 %vm410_vm1, %v811_v51  ;;  %v1888_v24 = vpop.permute.xlu1 %1887  ;;  %v2377_v37 = vsub.s32 2, %v2368_v34 }
  0xb0   : > { %9472 = vmatpush3.msk.msra.mxu1 %vm410_vm1, %v811_v51  ;;  %9473 = vmatprep.mubr.msk.f32.mxu1 %vm397_vm3, %v8879_v44  ;;  %v1894_v26 = vsel %vm1893_vm8, %v1888_v24, %v1890_v15 }
  0xb1   : > { %8887 = vmatmul.mubr.msk.f32.gmra.mrb[4].mxu0 %vm397_vm3, %v8881_v52  ;;  %v11752_v53 = vpop.permute.xlu0 %1891  ;;  %v11970_v41 = vrot.slane %v360_v38, %v2377_v37 }
  0xb2   : > { %912 = vmatprep.mubr.f32.mxu0 %v11474_v0  ;;  %v1895_v18 = vsel %vm1893_vm8, %v1890_v15, %v11752_v53 }
  0xb3   : > { %9474 = vmatmul.mubr.msk.f32.vlgmr.msra.gmra.mrb[2].mxu1 %vm397_vm3, %v8880_v49  ;;  %v2108_v27 = vpop.permute.xlu1 %2107 }
  0xb4   : > { %9476 = vmatprep.mubr.msk.f32.mxu1 %vm397_vm3, %v8881_v52 }
  0xb5   : > { %8888 = vmatmul.mubr.msk.f32.gmra.mrb[6].mxu0 %vm397_vm3, %v8882_v54  ;;  %v1028_v55 = vpop.permute.xlu0 %1027 }
  0xb6   : > { %v1032_v57 = vsel %vm1029_vm5, %v11676_v31, %v1028_v55  ;;  %1115 = vmatprep.mubr.f32.mxu0 %v11474_v0 }
  0xb7   : > { %9477 = vmatmul.mubr.msk.f32.gmra.mrb[4].mxu1 %vm397_vm3, %v8882_v54  ;;  %9479 = vmatprep.subr.msk.mxu1 %vm410_vm1, %v1032_v57  ;;  %v2106_v29 = vpop.permute.xlu1 %2105 }
  0xb8   : > { %9480 = vmatpush3.msk.msra.mxu1 %vm410_vm1, %v1032_v57  ;;  %9481 = vmatprep.mubr.msk.f32.mxu1 %vm397_vm3, %v8894_v56  ;;  %v2112_v30 = vsel %vm2111_vm10, %v2106_v29, %v2108_v27 }
  0xb9   : > { %8900 = vmatmul.mubr.msk.f32.vlgmr.msra.gmra.mrb[0].mxu0 %vm397_vm3, %v8894_v56  ;;  %9487 = vmatprep.subr.msk.mxu1 %vm410_vm1, %v11581_v4  ;;  %v2110_v12 = vpop.permute.xlu0 %2109 }
  0xba   : > { %1121 = vmatprep.mubr.f32.mxu0 %v11474_v0  ;;  %8914 = vmatpush1.msk.msra.mxu0 %vm410_vm1, %v11559_v2  ;;  %v8912_v2 = vld [vmem:[%s13346_s2 + $0x98] sm:$0xff]  ;;  %v2113_v28 = vsel %vm2111_vm10, %v2108_v27, %v2110_v12 }
  0xbb   : > { %9482 = vmatmul.mubr.msk.f32.vlgmr.msra.gmra.mrb[2].mxu1 %vm397_vm3, %v8895_v58  ;;  %8928 = vmatprep.subr.msk.mxu0 %vm410_vm1, %v1459_v59  ;;  %v2373_v59 = vsub.s32 1, %v2368_v34 }
  0xbc   : > { %9484 = vmatprep.mubr.msk.f32.mxu1 %vm397_vm3, %v8896_v60  ;;  %9488 = vmatpush3.msk.msra.mxu1 %vm410_vm1, %v11581_v4  ;;  %v1458_v4 = vsel %vm1457_vm6, %v11702_v40, %v11692_v36 }
  0xbd   : > { %8901 = vmatmul.mubr.msk.f32.gmra.mrb[2].mxu0 %vm397_vm3, %v8895_v58  ;;  %9495 = vmatprep.subr.msk.mxu1 %vm410_vm1, %v11688_v35  ;;  %v2369_v58 = vsub.s32 0, %v2368_v34 }
  0xbe   : > { %1127 = vmatprep.mubr.f32.mxu0 %v11474_v0 }
  0xbf   : > { %9485 = vmatmul.mubr.msk.f32.gmra.mrb[4].mxu1 %vm397_vm3, %v8897_v61 }
  0xc0   : > { %9489 = vmatprep.mubr.msk.f32.mxu1 %vm397_vm3, %v8909_v62 }
  0xc1   : > { %8902 = vmatmul.mubr.msk.f32.gmra.mrb[4].mxu0 %vm397_vm3, %v8896_v60 }
  0xc2   : > { %1133 = vmatprep.mubr.f32.mxu0 %v11474_v0 }
  0xc3   : > { %9490 = vmatmul.mubr.msk.f32.vlgmr.msra.gmra.mrb[2].mxu1 %vm397_vm3, %v8910_v63 }
  0xc4   : > { %9492 = vmatprep.mubr.msk.f32.mxu1 %vm397_vm3, %v8911_v1  ;;  %9496 = vmatpush3.msk.msra.mxu1 %vm410_vm1, %v11688_v35 }
  0xc5   : > { %8903 = vmatmul.mubr.msk.f32.gmra.mrb[6].mxu0 %vm397_vm3, %v8897_v61  ;;  %9503 = vmatprep.subr.msk.mxu1 %vm410_vm1, %v11709_v42 }
  0xc6   : > { %1324 = vmatprep.mubr.f32.mxu0 %v11474_v0 }
  0xc7   : > { %9493 = vmatmul.mubr.msk.f32.gmra.mrb[4].mxu1 %vm397_vm3, %v8912_v2 }
  0xc8   : > { %9497 = vmatprep.mubr.msk.f32.mxu1 %vm397_vm3, %v8924_v3  ;;  %v2330_v36 = vpop.permute.xlu1 %2329 }
  0xc9   : > { %8915 = vmatmul.mubr.msk.f32.vlgmr.msra.gmra.mrb[0].mxu0 %vm397_vm3, %v8909_v62  ;;  %v11980_v62 = vrot.slane %v360_v38, %v2369_v58 }
  0xca   : > { %8929 = vmatpush1.msk.msra.mxu0 %vm410_vm1, %v1458_v4  ;;  %1330 = vmatprep.mubr.f32.mxu0 %v11474_v0  ;;  %v2325_v35 = vpop.permute.xlu0 %2324 }
  0xcb   : > { %9498 = vmatmul.mubr.msk.f32.vlgmr.msra.gmra.mrb[2].mxu1 %vm397_vm3, %v8925_v5  ;;  %8943 = vmatprep.subr.msk.mxu0 %vm410_vm1, %v1677_v6 }
  0xcc   : > { %9500 = vmatprep.mubr.msk.f32.mxu1 %vm397_vm3, %v8926_v7  ;;  %9504 = vmatpush3.msk.msra.mxu1 %vm410_vm1, %v11709_v42  ;;  %v2335_v46 = vpop.permute.xlu1 %2334 }
  0xcd   : > { %8916 = vmatmul.mubr.msk.f32.gmra.mrb[2].mxu0 %vm397_vm3, %v8910_v63  ;;  %9511 = vmatprep.subr.msk.mxu1 %vm410_vm1, %v11752_v53 }
  0xce   : > { %1336 = vmatprep.mubr.f32.mxu0 %v11474_v0  ;;  %v2340_v44 = vpop.permute.xlu0 %2339 }
  0xcf   : > { %9501 = vmatmul.mubr.msk.f32.gmra.mrb[4].mxu1 %vm397_vm3, %v8927_v8 }
  0xd0   : > { %9505 = vmatprep.mubr.msk.f32.mxu1 %vm397_vm3, %v8939_v9 }
  0xd1   : > { %8917 = vmatmul.mubr.msk.f32.gmra.mrb[4].mxu0 %vm397_vm3, %v8911_v1 }
  0xd2   : > { %1342 = vmatprep.mubr.f32.mxu0 %v11474_v0 }
  0xd3   : > { %9506 = vmatmul.mubr.msk.f32.vlgmr.msra.gmra.mrb[2].mxu1 %vm397_vm3, %v8940_v10 }
  0xd4   : > { %9508 = vmatprep.mubr.msk.f32.mxu1 %vm397_vm3, %v8941_v11  ;;  %9512 = vmatpush3.msk.msra.mxu1 %vm410_vm1, %v11752_v53 }
  0xd5   : > { %8918 = vmatmul.mubr.msk.f32.gmra.mrb[6].mxu0 %vm397_vm3, %v8912_v2  ;;  %9519 = vmatprep.subr.msk.mxu1 %vm410_vm1, %v2110_v12  ;;  %v11982_v2 = vrot.slane %v360_v38, %v2373_v59 }
  0xd6   : > { %1542 = vmatprep.mubr.f32.mxu0 %v11474_v0 }
  0xd7   : > { %9509 = vmatmul.mubr.msk.f32.gmra.mrb[4].mxu1 %vm397_vm3, %v8942_v13 }
  0xd8   : > { %9513 = vmatprep.mubr.msk.f32.mxu1 %vm397_vm3, %v8954_v14 }
  0xd9   : > { %8930 = vmatmul.mubr.msk.f32.vlgmr.msra.gmra.mrb[0].mxu0 %vm397_vm3, %v8924_v3 }
  0xda   : > { %8944 = vmatpush1.msk.msra.mxu0 %vm410_vm1, %v1676_v16  ;;  %1548 = vmatprep.mubr.f32.mxu0 %v11474_v0 }
  0xdb   : > { %9514 = vmatmul.mubr.msk.f32.vlgmr.msra.gmra.mrb[2].mxu1 %vm397_vm3, %v8955_v17  ;;  %8958 = vmatprep.subr.msk.mxu0 %vm410_vm1, %v1895_v18 }
  0xdc   : > { %9516 = vmatprep.mubr.msk.f32.mxu1 %vm397_vm3, %v8956_v19  ;;  %9520 = vmatpush3.msk.msra.mxu1 %vm410_vm1, %v2110_v12 }
  0xdd   : > { %8931 = vmatmul.mubr.msk.f32.gmra.mrb[2].mxu0 %vm397_vm3, %v8925_v5 }
  0xde   : > { %1554 = vmatprep.mubr.f32.mxu0 %v11474_v0 }
  0xdf   : > { %9517 = vmatmul.mubr.msk.f32.gmra.mrb[4].mxu1 %vm397_vm3, %v8957_v20 }
  0xe0   : > { %9521 = vmatprep.mubr.msk.f32.mxu1 %vm397_vm3, %v8969_v21 }
  0xe1   : > { %8932 = vmatmul.mubr.msk.f32.gmra.mrb[4].mxu0 %vm397_vm3, %v8926_v7 }
  0xe2   : > { %1560 = vmatprep.mubr.f32.mxu0 %v11474_v0 }
  0xe3   : > { %9522 = vmatmul.mubr.msk.f32.vlgmr.msra.gmra.mrb[2].mxu1 %vm397_vm3, %v8970_v22 }
  0xe4   : > { %9524 = vmatprep.mubr.msk.f32.mxu1 %vm397_vm3, %v8971_v23 }
  0xe5   : > { %8933 = vmatmul.mubr.msk.f32.gmra.mrb[6].mxu0 %vm397_vm3, %v8927_v8 }
  0xe6   : > { %1760 = vmatprep.mubr.f32.mxu0 %v11474_v0 }
  0xe7   : > { %9525 = vmatmul.mubr.msk.f32.gmra.mrb[4].mxu1 %vm397_vm3, %v8972_v25 }
  0xe8   : > { %2581 = vmatprep.mubr.f32.mxu1 %v11474_v0 }
  0xe9   : > { %8945 = vmatmul.mubr.msk.f32.vlgmr.msra.gmra.mrb[0].mxu0 %vm397_vm3, %v8939_v9 }
  0xea   : > { %8959 = vmatpush1.msk.msra.mxu0 %vm410_vm1, %v1894_v26  ;;  %1766 = vmatprep.mubr.f32.mxu0 %v11474_v0 }
  0xeb   : > { %8973 = vmatprep.subr.msk.mxu0 %vm410_vm1, %v2113_v28 }
  0xed   : > { %8946 = vmatmul.mubr.msk.f32.gmra.mrb[2].mxu0 %vm397_vm3, %v8940_v10 }
  0xee   : > { %1772 = vmatprep.mubr.f32.mxu0 %v11474_v0 }
  0xf1   : > { %8947 = vmatmul.mubr.msk.f32.gmra.mrb[4].mxu0 %vm397_vm3, %v8941_v11 }
  0xf2   : > { %1778 = vmatprep.mubr.f32.mxu0 %v11474_v0 }
  0xf5   : > { %8948 = vmatmul.mubr.msk.f32.gmra.mrb[6].mxu0 %vm397_vm3, %v8942_v13 }
  0xf6   : > { %1978 = vmatprep.mubr.f32.mxu0 %v11474_v0 }
  0xf9   : > { %8960 = vmatmul.mubr.msk.f32.vlgmr.msra.gmra.mrb[0].mxu0 %vm397_vm3, %v8954_v14 }
  0xfa   : > { %8974 = vmatpush1.msk.msra.mxu0 %vm410_vm1, %v2112_v30  ;;  %1984 = vmatprep.mubr.f32.mxu0 %v11474_v0 }
  0xfd   : > { %8961 = vmatmul.mubr.msk.f32.gmra.mrb[2].mxu0 %vm397_vm3, %v8955_v17 }
  0xfe   : > { %1990 = vmatprep.mubr.f32.mxu0 %v11474_v0 }
 0x101   : > { %8962 = vmatmul.mubr.msk.f32.gmra.mrb[4].mxu0 %vm397_vm3, %v8956_v19 }
 0x102   : > { %1996 = vmatprep.mubr.f32.mxu0 %v11474_v0 }
 0x105   : > { %8963 = vmatmul.mubr.msk.f32.gmra.mrb[6].mxu0 %vm397_vm3, %v8957_v20 }
 0x106   : > { %2196 = vmatprep.mubr.f32.mxu0 %v11474_v0 }
 0x109   : > { %8975 = vmatmul.mubr.msk.f32.vlgmr.msra.gmra.mrb[0].mxu0 %vm397_vm3, %v8969_v21 }
 0x10a   : > { %2202 = vmatprep.mubr.f32.mxu0 %v11474_v0 }
 0x10d   : > { %8976 = vmatmul.mubr.msk.f32.gmra.mrb[2].mxu0 %vm397_vm3, %v8970_v22 }
 0x10e   : > { %2208 = vmatprep.mubr.f32.mxu0 %v11474_v0 }
 0x111   : > { %8977 = vmatmul.mubr.msk.f32.gmra.mrb[4].mxu0 %vm397_vm3, %v8971_v23 }
 0x112   : > { %2214 = vmatprep.mubr.f32.mxu0 %v11474_v0 }
 0x115   : > { %8978 = vmatmul.mubr.msk.f32.gmra.mrb[6].mxu0 %vm397_vm3, %v8972_v25 }
 0x116   : > { %4875 = vmatprep.mubr.f32.mxu0 %v11474_v0 }
 0x160   : > { %v11961_v31 = vpop.f32.mrb[0].mxu1 }
 0x161   : > { %v11963_v32 = vpop.f32.mrb[1].mxu1 }
 0x1b6   : > { %v9523_v39 = vpop.f32.mrb[2].mxu1 }
 0x1b7   : > { %v2347_v40 = vadd.f32 %v9523_v39, %v2330_v36  ;;  %v2287_v42 = vpop.f32.mrb[3].mxu1 }
 0x1b8   : > { %v2344_v43 = vadd.f32 %v2325_v35, %v2287_v42 }
 0x1b9   : > { %v2359_v45 = vmax.f32 %v2347_v40, 0.0 }
 0x1ba   : > { %v2356_v47 = vmax.f32 %v2344_v43, 0.0  ;;  %v9526_v48 = vpop.f32.mrb[4].mxu1 }
 0x1bb   : > { %v2387_v49 = vmul.f32 %v11970_v41, %v2359_v45  ;;  %v2353_v50 = vadd.f32 %v9526_v48, %v2340_v44  ;;  %v2297_v51 = vpop.f32.mrb[5].mxu1 }
 0x1bc   : > { %v2384_v52 = vmul.f32 %v11970_v41, %v2356_v47  ;;  %v2350_v53 = vadd.f32 %v2335_v46, %v2297_v51 }
 0x1bd   : > { %2400 = vst.msk [vmem:[#allocation2 + $0x38] sm:$0xff] %vm2396_vm11, %v2387_v49  ;;  %v2365_v54 = vmax.f32 %v2353_v50, 0.0 }
 0x1be   : > { %2397 = vst.msk [vmem:[#allocation2 + $0x18] sm:$0xff] %vm2396_vm11, %v2384_v52  ;;  %v2362_v55 = vmax.f32 %v2350_v53, 0.0  ;;  %v10623_v53 = vpop.permute.xlu1 %10622 }
 0x1bf   : > { %v2393_v56 = vmul.f32 %v11970_v41, %v2365_v54  ;;  %v4643_v54 = vld [vmem:[%s13349_s5 + $0x8] sm:$0xff]  ;;  %v10624_v58 = vunpack.i.l.bf16 %v10623_v53 }
 0x1c0   : > { %v2390_v57 = vmul.f32 %v11970_v41, %v2362_v55 }
 0x1c1   : > { %2406 = vst.msk [vmem:[#allocation2 + $0x78] sm:$0xff] %vm2396_vm11, %v2393_v56  ;;  %v4642_v56 = vld [vmem:[%s13349_s5] sm:$0xff] }
 0x1c2   : > { %2403 = vst.msk [vmem:[#allocation2 + $0x58] sm:$0xff] %vm2396_vm11, %v2390_v57  ;;  %v10625_v57 = vunpack.i.h.bf16 %v10623_v53 }
 0x1c4   : > { %v12043_v47 = vld [vmem:[#allocation2 + $0x38] sm:$0xff] }
 0x1c9   : > { %v12027_v40 = vld [vmem:[#allocation2 + $0x58] sm:$0xff] }
 0x1dc   : > { %v2198_v60 = vpop.f32.mrb[0].mxu0 }
 0x1dd   : > { %v2342_v61 = vadd.f32 %v2325_v35, %v2198_v60  ;;  %v2200_v63 = vpop.f32.mrb[1].mxu0 }
 0x1de   : > { %v2343_v1 = vadd.f32 %v2325_v35, %v2200_v63 }
 0x1df   : > { %v2354_v3 = vmax.f32 %v2342_v61, 0.0  ;;  %v4645_v61 = vld [vmem:[%s13349_s5 + $0x18] sm:$0xff] }
 0x1e0   : > { %v2355_v4 = vmax.f32 %v2343_v1, 0.0  ;;  %v2204_v5 = vpop.f32.mrb[2].mxu0 }
 0x1e1   : > { %v11985_v6 = vmul.f32 %v11980_v62, %v2354_v3  ;;  %v2345_v7 = vadd.f32 %v2330_v36, %v2204_v5  ;;  %v2206_v8 = vpop.f32.mrb[3].mxu0 }
 0x1e2   : > { %v11988_v9 = vmul.f32 %v11982_v2, %v2355_v4  ;;  %v2346_v10 = vadd.f32 %v2330_v36, %v2206_v8  ;;  %v4644_v4 = vld [vmem:[%s13349_s5 + $0x10] sm:$0xff] }
 0x1e3   : > { %v2357_v11 = vmax.f32 %v2345_v7, 0.0 }
 0x1e4   : > { %v2358_v12 = vmax.f32 %v2346_v10, 0.0  ;;  %v2210_v13 = vpop.f32.mrb[4].mxu0  ;;  %v10626_v14 = vpack.i.bf16 %v11988_v9, %v11985_v6 }
 0x1e5   : > { %v11993_v15 = vmul.f32 %v11980_v62, %v2357_v11  ;;  %v2348_v16 = vadd.f32 %v2335_v46, %v2210_v13  ;;  %v2212_v17 = vpop.f32.mrb[5].mxu0 }
 0x1e6   : > { %v11996_v18 = vmul.f32 %v11982_v2, %v2358_v12  ;;  %v2349_v19 = vadd.f32 %v2335_v46, %v2212_v17  ;;  %10627 = vrot.lane.b32.xlu1 %v10626_v14, %s11475_s19  ;;  %v12041_v46 = vld [vmem:[#allocation2 + $0x18] sm:$0xff] }
 0x1e7   : > { %v2360_v20 = vmax.f32 %v2348_v16, 0.0  ;;  %v12001_v21 = vpack.i.bf16 %v11993_v15, %v11985_v6  ;;  %v9944_v22 = vpack.c.bf16 %v11993_v15, %v11985_v6  ;;  %v10651_v49 = vpack.i.bf16 %v12043_v47, %v12041_v46  ;;  %v9028_v6 = vld [vmem:[%s13348_s4 + $0x80] sm:$0xff] }
 0x1e8   : > { %v2361_v23 = vmax.f32 %v2349_v19, 0.0  ;;  %v2216_v24 = vpop.f32.mrb[6].mxu0  ;;  %v10631_v25 = vpack.i.bf16 %v11996_v18, %v11993_v15  ;;  %v9942_v26 = vpack.c.bf16 %v11996_v18, %v11988_v9  ;;  %v10786_v50 = vpack.i.bf16 %v12043_v47, %v11996_v18 }
 0x1e9   : > { %v12010_v27 = vmul.f32 %v11980_v62, %v2360_v20  ;;  %v10294_v28 = vadd.f32 %v2216_v24, %v11961_v31  ;;  %v2218_v29 = vpop.f32.mrb[7].mxu0  ;;  %v10781_v51 = vpack.i.bf16 %v12041_v46, %v11988_v9 }
 0x1ea   : > { %v12014_v30 = vmul.f32 %v11982_v2, %v2361_v23  ;;  %v10295_v33 = vadd.f32 %v2218_v29, %v11963_v32  ;;  %10632 = vrot.lane.b32.xlu0 %v10631_v25, %s11475_s19  ;;  %v12029_v32 = vld [vmem:[#allocation2 + $0x78] sm:$0xff] }
 0x1eb   : > { %v2351_v34 = vadd.f32 %v10294_v28, %v2340_v44  ;;  %v10656_v48 = vpack.i.bf16 %v12029_v32, %v12027_v40 }
 0x1ec   : > { %v2352_v35 = vadd.f32 %v10295_v33, %v2340_v44  ;;  %v10636_v36 = vpack.i.bf16 %v12014_v30, %v12010_v27  ;;  %v10796_v52 = vpack.i.bf16 %v12027_v40, %v12014_v30 }
 0x1ed   : > { %v2363_v37 = vmax.f32 %v2351_v34, 0.0 }
 0x1ee   : > { %v2364_v38 = vmax.f32 %v2352_v35, 0.0  ;;  %10637 = vrot.lane.b32.xlu0 %v10636_v36, %s11475_s19 }
 0x1ef   : > { %v12022_v39 = vmul.f32 %v11980_v62, %v2363_v37 }
 0x1f0   : > { %v12025_v31 = vmul.f32 %v11982_v2, %v2364_v38 }
 0x1f1   : > { %v10806_v42 = vpack.i.bf16 %v12022_v39, %v12010_v27  ;;  %v9948_v43 = vpack.c.bf16 %v12022_v39, %v12010_v27  ;;  %v9029_v27 = vld [vmem:[%s13348_s4 + $0x88] sm:$0xff] }
 0x1f2   : > { %10647 = vrot.lane.b32.xlu0 %v11474_v0, %s11475_s19  ;;  %v10641_v44 = vpack.i.bf16 %v12025_v31, %v12022_v39  ;;  %v9946_v45 = vpack.c.bf16 %v12025_v31, %v12014_v30 }
 0x1f4   : > { %10642 = vrot.lane.b32.xlu1 %v10641_v44, %s11475_s19 }
 0x1f6   : > { %10657 = vrot.lane.b32.xlu0 %v10656_v48, %s11475_s19 }
 0x1f8   : > { %10652 = vrot.lane.b32.xlu1 %v10651_v49, %s11475_s19 }
 0x1fa   : > { %10667 = vrot.lane.b32.xlu0 %v10631_v25, %s11476_s20 }
 0x1fc   : > { %10662 = vrot.lane.b32.xlu1 %v10626_v14, %s11476_s20 }
 0x1fe   : > { %10677 = vrot.lane.b32.xlu0 %v10636_v36, %s11476_s20 }
 0x200   : > { %10672 = vrot.lane.b32.xlu1 %v11474_v0, %s11476_s20 }
 0x202   : > { %10687 = vrot.lane.b32.xlu0 %v11474_v0, %s11476_s20 }
 0x204   : > { %10682 = vrot.lane.b32.xlu1 %v10641_v44, %s11476_s20 }
 0x206   : > { %10697 = vrot.lane.b32.xlu0 %v10656_v48, %s11476_s20 }
 0x208   : > { %10692 = vrot.lane.b32.xlu1 %v10651_v49, %s11476_s20 }
 0x20a   : > { %10707 = vrot.lane.b32.xlu0 %v10631_v25, %s11477_s21 }
 0x20c   : > { %10702 = vrot.lane.b32.xlu1 %v10626_v14, %s11477_s21 }
 0x20e   : > { %10717 = vrot.lane.b32.xlu0 %v10636_v36, %s11477_s21 }
 0x210   : > { %10712 = vrot.lane.b32.xlu1 %v11474_v0, %s11477_s21 }
 0x212   : > { %10727 = vrot.lane.b32.xlu0 %v11474_v0, %s11477_s21 }
 0x214   : > { %10722 = vrot.lane.b32.xlu1 %v10641_v44, %s11477_s21 }
 0x216   : > { %10737 = vrot.lane.b32.xlu0 %v10656_v48, %s11477_s21 }
 0x218   : > { %10732 = vrot.lane.b32.xlu1 %v10651_v49, %s11477_s21 }
 0x21a   : > { %10747 = vrot.lane.b32.xlu0 %v10631_v25, %s11478_s22 }
 0x21c   : > { %10742 = vrot.lane.b32.xlu1 %v10626_v14, %s11478_s22 }
 0x21e   : > { %10757 = vrot.lane.b32.xlu0 %v10636_v36, %s11478_s22 }
 0x220   : > { %10752 = vrot.lane.b32.xlu1 %v11474_v0, %s11478_s22 }
 0x222   : > { %10767 = vrot.lane.b32.xlu0 %v11474_v0, %s11478_s22  ;;  %v10801_v0 = vpack.i.bf16 %v12029_v32, %v12025_v31  ;;  %v9954_v31 = vpack.c.bf16 %v12029_v32, %v12027_v40  ;;  %v9030_v40 = vld [vmem:[%s13348_s4 + $0x90] sm:$0xff] }
 0x224   : > { %10762 = vrot.lane.b32.xlu1 %v10641_v44, %s11478_s22 }
 0x226   : > { %10777 = vrot.lane.b32.xlu0 %v10656_v48, %s11478_s22 }
 0x228   : > { %10772 = vrot.lane.b32.xlu1 %v10651_v49, %s11478_s22 }
 0x22a   : > { %10787 = vrot.lane.b32.xlu0 %v10786_v50, %s11479_s23 }
 0x22c   : > { %10782 = vrot.lane.b32.xlu1 %v10781_v51, %s11479_s23 }
 0x22e   : > { %10797 = vrot.lane.b32.xlu0 %v10796_v52, %s11479_s23 }
 0x230   : > { %10792 = vrot.lane.b32.xlu1 %v12001_v21, %s11479_s23 }
 0x232   : > { %10807 = vrot.lane.b32.xlu0 %v10806_v42, %s11479_s23 }
 0x234   : > { %10802 = vrot.lane.b32.xlu1 %v10801_v0, %s11479_s23 }
 0x236   : > { %10817 = vrot.lane.b32.xlu0 %v10786_v50, %s11480_s24 }
 0x238   : > { %10812 = vrot.lane.b32.xlu1 %v10781_v51, %s11480_s24 }
 0x23a   : > { %10827 = vrot.lane.b32.xlu0 %v10796_v52, %s11480_s24 }
 0x23c   : > { %10822 = vrot.lane.b32.xlu1 %v12001_v21, %s11480_s24 }
 0x23e   : > { %10837 = vrot.lane.b32.xlu0 %v10806_v42, %s11480_s24 }
 0x240   : > { %10832 = vrot.lane.b32.xlu1 %v10801_v0, %s11480_s24 }
 0x242   : > { %10847 = vrot.lane.b32.xlu0 %v10786_v50, %s11481_s25 }
 0x244   : > { %10842 = vrot.lane.b32.xlu1 %v10781_v51, %s11481_s25 }
 0x246   : > { %10857 = vrot.lane.b32.xlu0 %v10796_v52, %s11481_s25 }
 0x248   : > { %10852 = vrot.lane.b32.xlu1 %v12001_v21, %s11481_s25 }
 0x24a   : > { %10867 = vrot.lane.b32.xlu0 %v10806_v42, %s11481_s25 }
 0x24c   : > { %10862 = vrot.lane.b32.xlu1 %v10801_v0, %s11481_s25 }
 0x24e   : > { %10877 = vrot.lane.b32.xlu0 %v10786_v50, %s11482_s26  ;;  %v8984_v50 = vld [vmem:[%s13348_s4 + $0x20] sm:$0xff] }
 0x250   : > { %10872 = vrot.lane.b32.xlu1 %v10781_v51, %s11482_s26 }
 0x252   : > { %10887 = vrot.lane.b32.xlu0 %v10796_v52, %s11482_s26 }
 0x254   : > { %10882 = vrot.lane.b32.xlu1 %v12001_v21, %s11482_s26 }
 0x256   : > { %10897 = vrot.lane.b32.xlu0 %v10806_v42, %s11482_s26 }
 0x258   : > { %v10628_v55 = vpop.permute.xlu1 %10627  ;;  %10892 = vrot.lane.b32.xlu1 %v10801_v0, %s11482_s26 }
 0x259   : > { %v10630_v59 = vunpack.i.h.bf16 %v10628_v55  ;;  %v10629_v60 = vunpack.i.l.bf16 %v10628_v55 }
 0x25a   : > { %4653 = vperm.xlu0 %10619, %v4643_v54  }
 0x25b   : > { %v2480_v5 = vsel %vm393_vm0, %v10624_v58, %v10629_v60  ;;  %v2481_v8 = vsel %vm393_vm0, %v10629_v60, %v10630_v59 }
 0x25c   : > { %4648 = vperm.xlu1 %10620, %v4642_v56   ;;  %v10633_v63 = vpop.permute.xlu0 %10632 }
 0x25d   : > { %v10635_v1 = vunpack.i.h.bf16 %v10633_v63  ;;  %v10634_v3 = vunpack.i.l.bf16 %v10633_v63  ;;  %v8985_v63 = vld [vmem:[%s13348_s4 + $0x28] sm:$0xff] }
 0x25e   : > { %4663 = vperm.xlu0 %10619, %v4645_v61  }
 0x25f   : > { %v2483_v7 = vsel %vm393_vm0, %v10625_v57, %v10634_v3  ;;  %v2484_v10 = vsel %vm393_vm0, %v10634_v3, %v10635_v1 }
 0x260   : > { %4658 = vperm.xlu1 %10620, %v4644_v4   ;;  %v10638_v11 = vpop.permute.xlu0 %10637  ;;  %v9878_v12 = vpack.c.bf16 %v2484_v10, %v2481_v8  ;;  %v9880_v13 = vpack.c.bf16 %v2483_v7, %v2480_v5  ;;  %v8986_v8 = vld [vmem:[%s13348_s4 + $0x30] sm:$0xff] }
 0x261   : > { %v10640_v14 = vunpack.i.h.bf16 %v10638_v11  ;;  %v10639_v16 = vunpack.i.l.bf16 %v10638_v11 }
 0x262   : > { %9879 = vmatprep.subr.bf16.mxu1 %v9878_v12 }
 0x263   : > { %9881 = vmatpush1.bf16.msra.mxu1 %v9880_v13  ;;  %v2487_v29 = vsel %vm393_vm0, %v10639_v16, %v10640_v14 }
 0x264   : > { %v10648_v17 = vpop.permute.xlu0 %10647 }
 0x265   : > { %v10650_v19 = vunpack.i.h.bf16 %v10648_v17  ;;  %v10649_v20 = vunpack.i.l.bf16 %v10648_v17  ;;  %v8987_v17 = vld [vmem:[%s13348_s4 + $0x38] sm:$0xff] }
 0x266   : > { %v10643_v21 = vpop.permute.xlu1 %10642 }
 0x267   : > { %v10645_v23 = vunpack.i.h.bf16 %v10643_v21  ;;  %v10644_v24 = vunpack.i.l.bf16 %v10643_v21  ;;  %v2486_v25 = vsel %vm393_vm0, %v10649_v20, %v10639_v16 }
 0x268   : > { %v10658_v28 = vpop.permute.xlu0 %10657 }
 0x269   : > { %v2489_v33 = vsel %vm393_vm0, %v10650_v19, %v10644_v24  ;;  %v10660_v34 = vunpack.i.h.bf16 %v10658_v28  ;;  %v10659_v35 = vunpack.i.l.bf16 %v10658_v28  ;;  %v2490_v36 = vsel %vm393_vm0, %v10644_v24, %v10645_v23 }
 0x26a   : > { %v10653_v37 = vpop.permute.xlu1 %10652  ;;  %v9882_v38 = vpack.c.bf16 %v2490_v36, %v2487_v29  ;;  %v9884_v42 = vpack.c.bf16 %v2489_v33, %v2486_v25 }
 0x26b   : > { %v10655_v44 = vunpack.i.h.bf16 %v10653_v37  ;;  %v10654_v48 = vunpack.i.l.bf16 %v10653_v37  ;;  %v2488_v0 = vsel %vm393_vm0, %v10640_v14, %v10659_v35  ;;  %v2491_v53 = vsel %vm393_vm0, %v10645_v23, %v10660_v34 }
 0x26c   : > { %v12138_v49 = vpop.permute.xlu0 %10667  ;;  %9883 = vmatprep.subr.bf16.mxu1 %v9882_v38  ;;  %v9890_v61 = vpack.c.bf16 %v2491_v53, %v2488_v0 }
 0x26d   : > { %9885 = vmatpush1.bf16.msra.mxu1 %v9884_v42  ;;  %v2482_v51 = vsel %vm393_vm0, %v10630_v59, %v10654_v48  ;;  %v2485_v52 = vsel %vm393_vm0, %v10635_v1, %v10655_v44  ;;  %v10670_v56 = vunpack.i.h.bf16 %v12138_v49  ;;  %v10669_v57 = vunpack.i.l.bf16 %v12138_v49  ;;  %v12150_v59 = vld [vmem:[#allocation2] sm:$0xff] }
 0x26e   : > { %v10663_v54 = vpop.permute.xlu1 %10662  ;;  %v9886_v55 = vpack.c.bf16 %v2485_v52, %v2482_v51 }
 0x26f   : > { %v10665_v58 = vunpack.i.h.bf16 %v10663_v54  ;;  %v10664_v60 = vunpack.i.l.bf16 %v10663_v54  ;;  %v2727_v5 = vsel %vm599_vm2, %v10669_v57, %v10670_v56 }
 0x270   : > { %8988 = vmatmul.mubr.msk.f32.vlgmr.msra.gmra.mrb[6].mxu1 %vm2504_vm12, %v8984_v50  ;;  %9887 = vmatprep.subr.bf16.mxu1 %v9886_v55  ;;  %v10678_v3 = vpop.permute.xlu0 %10677 }
 0x271   : > { %9889 = vmatpush3.bf16.msra.mxu1 %v9886_v55  ;;  %2587 = vmatprep.mubr.f32.mxu1 %v12150_v59  ;;  %v2724_v1 = vsel %vm599_vm2, %v10664_v60, %v10665_v58  ;;  %v10680_v20 = vunpack.i.h.bf16 %v10678_v3  ;;  %v10679_v21 = vunpack.i.l.bf16 %v10678_v3 }
 0x272   : > { %v10673_v4 = vpop.permute.xlu1 %10672  ;;  %9891 = vmatprep.subr.bf16.mxu1 %v9890_v61  ;;  %v9894_v7 = vpack.c.bf16 %v2727_v5, %v2724_v1 }
 0x273   : > { %v10675_v11 = vunpack.i.h.bf16 %v10673_v4  ;;  %v10674_v12 = vunpack.i.l.bf16 %v10673_v4  ;;  %v2730_v37 = vsel %vm599_vm2, %v10679_v21, %v10680_v20  ;;  %v2424_v4 = vld [vmem:[%s13348_s4 + $0x8] sm:$0xff] }
 0x274   : > { %8989 = vmatmul.mubr.msk.f32.gmra.mrb[8].mxu1 %vm2504_vm12, %v8985_v63  ;;  %v10688_v13 = vpop.permute.xlu0 %10687 }
 0x275   : > { %9893 = vmatpush3.bf16.msra.mxu1 %v9890_v61  ;;  %2593 = vmatprep.mubr.f32.mxu1 %v12150_v59  ;;  %v2723_v23 = vsel %vm599_vm2, %v10674_v12, %v10664_v60  ;;  %v2726_v24 = vsel %vm599_vm2, %v10675_v11, %v10669_v57  ;;  %v10690_v25 = vunpack.i.h.bf16 %v10688_v13  ;;  %v10689_v34 = vunpack.i.l.bf16 %v10688_v13  ;;  %v2425_v12 = vld [vmem:[%s13348_s4 + $0x10] sm:$0xff] }
 0x276   : > { %v10683_v10 = vpop.permute.xlu1 %10682  ;;  %9895 = vmatprep.subr.bf16.mxu1 %v9894_v7  ;;  %v9896_v36 = vpack.c.bf16 %v2726_v24, %v2723_v23 }
 0x277   : > { %v10685_v14 = vunpack.i.h.bf16 %v10683_v10  ;;  %v10684_v16 = vunpack.i.l.bf16 %v10683_v10  ;;  %v2729_v52 = vsel %vm599_vm2, %v10689_v34, %v10679_v21 }
 0x278   : > { %8990 = vmatmul.mubr.msk.f32.gmra.mrb[10].mxu1 %vm2504_vm12, %v8986_v8  ;;  %v10698_v35 = vpop.permute.xlu0 %10697 }
 0x279   : > { %2599 = vmatprep.mubr.f32.mxu1 %v12150_v59  ;;  %v2733_v33 = vsel %vm599_vm2, %v10684_v16, %v10685_v14  ;;  %v2732_v38 = vsel %vm599_vm2, %v10690_v25, %v10684_v16  ;;  %v10700_v48 = vunpack.i.h.bf16 %v10698_v35  ;;  %v10699_v49 = vunpack.i.l.bf16 %v10698_v35 }
 0x27a   : > { %v10693_v19 = vpop.permute.xlu1 %10692  ;;  %v9898_v44 = vpack.c.bf16 %v2733_v33, %v2730_v37  ;;  %v9900_v0 = vpack.c.bf16 %v2732_v38, %v2729_v52 }
 0x27b   : > { %v10695_v28 = vunpack.i.h.bf16 %v10693_v19  ;;  %v10694_v29 = vunpack.i.l.bf16 %v10693_v19  ;;  %v2734_v60 = vsel %vm599_vm2, %v10685_v14, %v10700_v48 }
 0x27c   : > { %8991 = vmatmul.mubr.msk.f32.gmra.mrb[12].mxu1 %vm2504_vm12, %v8987_v17  ;;  %v12182_v53 = vpop.permute.xlu0 %10707 }
 0x27d   : > { %9535 = vmatprep.mubr.msk.f32.mxu1 %vm2504_vm12, %v8984_v50  ;;  %v2725_v50 = vsel %vm599_vm2, %v10665_v58, %v10694_v29  ;;  %v2728_v51 = vsel %vm599_vm2, %v10670_v56, %v10695_v28  ;;  %v2423_v56 = vld [vmem:[%s13348_s4] sm:$0xff]  ;;  %v2731_v58 = vsel %vm599_vm2, %v10680_v20, %v10699_v49  ;;  %v10709_v1 = vunpack.i.l.bf16 %v12182_v53  ;;  %v2426_v20 = vld [vmem:[%s13348_s4 + $0x18] sm:$0xff] }
 0x27e   : > { %v12175_v42 = vpop.permute.xlu1 %10702  ;;  %v9902_v54 = vpack.c.bf16 %v2728_v51, %v2725_v50  ;;  %v9906_v3 = vpack.c.bf16 %v2734_v60, %v2731_v58 }
 0x27f   : > { %v10705_v55 = vunpack.i.h.bf16 %v12175_v42  ;;  %v10704_v57 = vunpack.i.l.bf16 %v12175_v42 }
 0x280   : > { %9536 = vmatmul.mubr.msk.f32.vlgmr.msra.gmra.mrb[14].mxu1 %vm2504_vm12, %v8985_v63  ;;  %v10710_v63 = vunpack.i.h.bf16 %v12182_v53  ;;  %v10718_v7 = vpop.permute.xlu0 %10717 }
 0x281   : > { %9897 = vmatpush1.bf16.msra.mxu1 %v9896_v36  ;;  %9538 = vmatprep.mubr.msk.f32.mxu1 %vm2504_vm12, %v8986_v8  ;;  %v2971_v5 = vsel %vm808_vm4, %v10704_v57, %v10705_v55  ;;  %v10720_v23 = vunpack.i.h.bf16 %v10718_v7  ;;  %v10719_v24 = vunpack.i.l.bf16 %v10718_v7  ;;  %v9005_v7 = vld [vmem:[%s13348_s4 + $0x48] sm:$0xff] }
 0x282   : > { %9899 = vmatprep.subr.bf16.mxu1 %v9898_v44  ;;  %v10713_v61 = vpop.permute.xlu1 %10712  ;;  %v2974_v8 = vsel %vm808_vm4, %v10709_v1, %v10710_v63 }
 0x283   : > { %v9910_v11 = vpack.c.bf16 %v2974_v8, %v2971_v5  ;;  %v10715_v13 = vunpack.i.h.bf16 %v10713_v61  ;;  %v10714_v14 = vunpack.i.l.bf16 %v10713_v61  ;;  %v2977_v42 = vsel %vm808_vm4, %v10719_v24, %v10720_v23 }
 0x284   : > { %9539 = vmatmul.mubr.msk.f32.gmra.mrb[16].mxu1 %vm2504_vm12, %v8987_v17  ;;  %v10728_v16 = vpop.permute.xlu0 %10727 }
 0x285   : > { %9901 = vmatpush1.bf16.msra.mxu1 %v9900_v0  ;;  %2823 = vmatprep.mubr.f32.mxu1 %v12150_v59  ;;  %v2970_v25 = vsel %vm808_vm4, %v10714_v14, %v10704_v57  ;;  %v2973_v28 = vsel %vm808_vm4, %v10715_v13, %v10709_v1  ;;  %v10730_v29 = vunpack.i.h.bf16 %v10728_v16  ;;  %v10729_v36 = vunpack.i.l.bf16 %v10728_v16  ;;  %v9006_v14 = vld [vmem:[%s13348_s4 + $0x50] sm:$0xff] }
 0x286   : > { %9903 = vmatprep.subr.bf16.mxu1 %v9902_v54  ;;  %v10723_v10 = vpop.permute.xlu1 %10722  ;;  %v9912_v38 = vpack.c.bf16 %v2973_v28, %v2970_v25 }
 0x287   : > { %v10725_v17 = vunpack.i.h.bf16 %v10723_v10  ;;  %v10724_v19 = vunpack.i.l.bf16 %v10723_v10  ;;  %v2976_v53 = vsel %vm808_vm4, %v10729_v36, %v10719_v24 }
 0x288   : > { %8996 = vmatmul.mubr.msk.f32.vlgmr.msra.gmra.mrb[6].mxu1 %vm2504_vm12, %v2423_v56  ;;  %v10738_v37 = vpop.permute.xlu0 %10737 }
 0x289   : > { %9905 = vmatpush3.bf16.msra.mxu1 %v9902_v54  ;;  %2829 = vmatprep.mubr.f32.mxu1 %v12150_v59  ;;  %v2980_v35 = vsel %vm808_vm4, %v10724_v19, %v10725_v17  ;;  %v2979_v44 = vsel %vm808_vm4, %v10730_v29, %v10724_v19  ;;  %v10740_v50 = vunpack.i.h.bf16 %v10738_v37  ;;  %v10739_v51 = vunpack.i.l.bf16 %v10738_v37 }
 0x28a   : > { %9907 = vmatprep.subr.bf16.mxu1 %v9906_v3  ;;  %v10733_v21 = vpop.permute.xlu1 %10732  ;;  %v9914_v49 = vpack.c.bf16 %v2980_v35, %v2977_v42  ;;  %v9916_v54 = vpack.c.bf16 %v2979_v44, %v2976_v53 }
 0x28b   : > { %v10735_v33 = vunpack.i.h.bf16 %v10733_v21  ;;  %v10734_v34 = vunpack.i.l.bf16 %v10733_v21  ;;  %v2978_v61 = vsel %vm808_vm4, %v10720_v23, %v10739_v51  ;;  %v9007_v23 = vld [vmem:[%s13348_s4 + $0x58] sm:$0xff] }
 0x28c   : > { %8997 = vmatmul.mubr.msk.f32.gmra.mrb[8].mxu1 %vm2504_vm12, %v2424_v4  ;;  %v12226_v57 = vpop.permute.xlu0 %10747 }
 0x28d   : > { %9909 = vmatpush3.bf16.msra.mxu1 %v9906_v3  ;;  %2835 = vmatprep.mubr.f32.mxu1 %v12150_v59  ;;  %v2972_v52 = vsel %vm808_vm4, %v10705_v55, %v10734_v34  ;;  %v2975_v0 = vsel %vm808_vm4, %v10710_v63, %v10735_v33  ;;  %v9004_v55 = vld [vmem:[%s13348_s4 + $0x40] sm:$0xff]  ;;  %v2981_v63 = vsel %vm808_vm4, %v10725_v17, %v10740_v50  ;;  %v10750_v3 = vunpack.i.h.bf16 %v12226_v57 }
 0x28e   : > { %9911 = vmatprep.subr.bf16.mxu1 %v9910_v11  ;;  %v12219_v48 = vpop.permute.xlu1 %10742  ;;  %v9922_v5 = vpack.c.bf16 %v2981_v63, %v2978_v61  ;;  %v9017_v63 = vld [vmem:[%s13348_s4 + $0x68] sm:$0xff] }
 0x28f   : > { %v10745_v58 = vunpack.i.h.bf16 %v12219_v48  ;;  %v10744_v60 = vunpack.i.l.bf16 %v12219_v48 }
 0x290   : > { %8998 = vmatmul.mubr.msk.f32.gmra.mrb[10].mxu1 %vm2504_vm12, %v2425_v12  ;;  %v10758_v10 = vpop.permute.xlu0 %10757 }
 0x291   : > { %2841 = vmatprep.mubr.f32.mxu1 %v12150_v59  ;;  %v3230_v8 = vsel %vm1029_vm5, %v10744_v60, %v10745_v58  ;;  %v10760_v25 = vunpack.i.h.bf16 %v10758_v10  ;;  %v10759_v28 = vunpack.i.l.bf16 %v10758_v10 }
 0x292   : > { %v10753_v1 = vpop.permute.xlu1 %10752 }
 0x293   : > { %v10755_v16 = vunpack.i.h.bf16 %v10753_v1  ;;  %v10754_v17 = vunpack.i.l.bf16 %v10753_v1  ;;  %v3236_v48 = vsel %vm1029_vm5, %v10759_v28, %v10760_v25  ;;  %v9018_v1 = vld [vmem:[%s13348_s4 + $0x70] sm:$0xff] }
 0x294   : > { %8999 = vmatmul.mubr.msk.f32.gmra.mrb[12].mxu1 %vm2504_vm12, %v2426_v20  ;;  %v10768_v19 = vpop.permute.xlu0 %10767 }
 0x295   : > { %9549 = vmatprep.mubr.msk.f32.mxu1 %vm2504_vm12, %v2423_v56  ;;  %v9918_v56 = vpack.c.bf16 %v2975_v0, %v2972_v52  ;;  %v3229_v29 = vsel %vm1029_vm5, %v10754_v17, %v10744_v60  ;;  %v10770_v34 = vunpack.i.h.bf16 %v10768_v19  ;;  %v9016_v60 = vld [vmem:[%s13348_s4 + $0x60] sm:$0xff] }
 0x298   : > { %9550 = vmatmul.mubr.msk.f32.vlgmr.msra.gmra.mrb[14].mxu1 %vm2504_vm12, %v2424_v4  ;;  %v10749_v4 = vunpack.i.l.bf16 %v12226_v57  ;;  %v10778_v42 = vpop.permute.xlu0 %10777 }
 0x299   : > { %9913 = vmatpush1.bf16.msra.mxu1 %v9912_v38  ;;  %9552 = vmatprep.mubr.msk.f32.mxu1 %vm2504_vm12, %v2425_v12  ;;  %v10763_v12 = vpop.permute.xlu1 %10762  ;;  %v10769_v38 = vunpack.i.l.bf16 %v10768_v19  ;;  %v10780_v51 = vunpack.i.h.bf16 %v10778_v42  ;;  %v10779_v52 = vunpack.i.l.bf16 %v10778_v42  ;;  %v9040_v42 = vld [vmem:[%s13348_s4 + $0xa0] sm:$0xff] }
 0x29a   : > { %9915 = vmatprep.subr.bf16.mxu1 %v9914_v49  ;;  %v3233_v11 = vsel %vm1029_vm5, %v10749_v4, %v10750_v3  ;;  %v10764_v21 = vunpack.i.l.bf16 %v10763_v12  ;;  %v3232_v33 = vsel %vm1029_vm5, %v10755_v16, %v10749_v4 }
 0x29b   : > { %v9926_v13 = vpack.c.bf16 %v3233_v11, %v3230_v8  ;;  %v9928_v44 = vpack.c.bf16 %v3232_v33, %v3229_v29  ;;  %v9031_v11 = vld [vmem:[%s13348_s4 + $0x98] sm:$0xff] }
 0x29c   : > { %9553 = vmatmul.mubr.msk.f32.gmra.mrb[16].mxu1 %vm2504_vm12, %v2426_v20  ;;  %v10765_v20 = vunpack.i.h.bf16 %v10763_v12  ;;  %v3238_v49 = vsel %vm1029_vm5, %v10770_v34, %v10764_v21  ;;  %v10788_v18 = vpop.permute.xlu0 %10787 }
 0x29d   : > { %9917 = vmatpush1.bf16.msra.mxu1 %v9916_v54  ;;  %3070 = vmatprep.mubr.f32.mxu1 %v12150_v59  ;;  %v10773_v24 = vpop.permute.xlu1 %10772  ;;  %v3235_v54 = vsel %vm1029_vm5, %v10769_v38, %v10759_v28  ;;  %v10790_v15 = vunpack.i.h.bf16 %v10788_v18 }
 0x29e   : > { %9919 = vmatprep.subr.bf16.mxu1 %v9918_v56  ;;  %v10775_v35 = vunpack.i.h.bf16 %v10773_v24  ;;  %v10774_v36 = vunpack.i.l.bf16 %v10773_v24  ;;  %v3239_v37 = vsel %vm1029_vm5, %v10764_v21, %v10765_v20  ;;  %v9932_v57 = vpack.c.bf16 %v3238_v49, %v3235_v54 }
 0x29f   : > { %v9930_v50 = vpack.c.bf16 %v3239_v37, %v3236_v48 }
 0x2a0   : > { %9008 = vmatmul.mubr.msk.f32.vlgmr.msra.gmra.mrb[6].mxu1 %vm2504_vm12, %v9004_v55  ;;  %v3231_v0 = vsel %vm1029_vm5, %v10745_v58, %v10774_v36  ;;  %v3234_v53 = vsel %vm1029_vm5, %v10750_v3, %v10775_v35  ;;  %v3240_v58 = vsel %vm1029_vm5, %v10765_v20, %v10780_v51  ;;  %v9019_v3 = vld [vmem:[%s13348_s4 + $0x78] sm:$0xff]  ;;  %v9041_v51 = vld [vmem:[%s13348_s4 + $0xa8] sm:$0xff] }
 0x2a1   : > { %9921 = vmatpush3.bf16.msra.mxu1 %v9918_v56  ;;  %3076 = vmatprep.mubr.f32.mxu1 %v12150_v59  ;;  %v9934_v56 = vpack.c.bf16 %v3234_v53, %v3231_v0  ;;  %v10783_v9 = vpop.permute.xlu1 %10782 }
 0x2a2   : > { %9923 = vmatprep.subr.bf16.mxu1 %v9922_v5  ;;  %v10785_v4 = vunpack.i.h.bf16 %v10783_v9 }
 0x2a4   : > { %9009 = vmatmul.mubr.msk.f32.gmra.mrb[8].mxu1 %vm2504_vm12, %v9005_v7  ;;  %v9966_v36 = vpack.c.bf16 %v10790_v15, %v10785_v4 }
 0x2a5   : > { %9925 = vmatpush3.bf16.msra.mxu1 %v9922_v5  ;;  %3082 = vmatprep.mubr.f32.mxu1 %v12150_v59  ;;  %v10784_v5 = vunpack.i.l.bf16 %v10783_v9  ;;  %v10793_v30 = vpop.permute.xlu1 %10792 }
 0x2a6   : > { %9927 = vmatprep.subr.bf16.mxu1 %v9926_v13 }
 0x2a7   : > { %v3684_v39 = vsel %vm1457_vm6, %v10784_v5, %v10785_v4 }
 0x2a8   : > { %9010 = vmatmul.mubr.msk.f32.gmra.mrb[10].mxu1 %vm2504_vm12, %v9006_v14 }
 0x2a9   : > { %3088 = vmatprep.mubr.f32.mxu1 %v12150_v59  ;;  %v10803_v32 = vpop.permute.xlu1 %10802 }
 0x2aa   : > { %v10805_v8 = vunpack.i.h.bf16 %v10803_v32  ;;  %v10804_v10 = vunpack.i.l.bf16 %v10803_v32 }
 0x2ac   : > { %9011 = vmatmul.mubr.msk.f32.gmra.mrb[12].mxu1 %vm2504_vm12, %v9007_v23  ;;  %v3690_v19 = vsel %vm1457_vm6, %v10804_v10, %v10805_v8 }
 0x2ad   : > { %9563 = vmatprep.mubr.msk.f32.mxu1 %vm2504_vm12, %v9004_v55  ;;  %v3237_v55 = vsel %vm1029_vm5, %v10760_v25, %v10779_v52  ;;  %v10813_v33 = vpop.permute.xlu1 %10812 }
 0x2ae   : > { %v9938_v61 = vpack.c.bf16 %v3240_v58, %v3237_v55  ;;  %v10815_v37 = vunpack.i.h.bf16 %v10813_v33  ;;  %v10814_v38 = vunpack.i.l.bf16 %v10813_v33 }
 0x2b0   : > { %9564 = vmatmul.mubr.msk.f32.vlgmr.msra.gmra.mrb[14].mxu1 %vm2504_vm12, %v9005_v7  ;;  %v10794_v7 = vunpack.i.l.bf16 %v10793_v30  ;;  %v3931_v52 = vsel %vm1675_vm7, %v10814_v38, %v10815_v37 }
 0x2b1   : > { %9929 = vmatpush1.bf16.msra.mxu1 %v9928_v44  ;;  %9566 = vmatprep.mubr.msk.f32.mxu1 %vm2504_vm12, %v9006_v14  ;;  %v10823_v49 = vpop.permute.xlu1 %10822 }
 0x2b2   : > { %9931 = vmatprep.subr.bf16.mxu1 %v9930_v50  ;;  %v3683_v16 = vsel %vm1457_vm6, %v10794_v7, %v10784_v5  ;;  %v10824_v55 = vunpack.i.l.bf16 %v10823_v49 }
 0x2b4   : > { %9567 = vmatmul.mubr.msk.f32.gmra.mrb[16].mxu1 %vm2504_vm12, %v9007_v23 }
 0x2b5   : > { %9933 = vmatpush1.bf16.msra.mxu1 %v9932_v57  ;;  %3329 = vmatprep.mubr.f32.mxu1 %v12150_v59  ;;  %v9042_v57 = vld [vmem:[%s13348_s4 + $0xb0] sm:$0xff] }
 0x2b6   : > { %9935 = vmatprep.subr.bf16.mxu1 %v9934_v56 }
 0x2b8   : > { %9020 = vmatmul.mubr.msk.f32.vlgmr.msra.gmra.mrb[6].mxu1 %vm2504_vm12, %v9016_v60 }
 0x2b9   : > { %9937 = vmatpush3.bf16.msra.mxu1 %v9934_v56  ;;  %3335 = vmatprep.mubr.f32.mxu1 %v12150_v59  ;;  %v10833_v56 = vpop.permute.xlu1 %10832 }
 0x2ba   : > { %9939 = vmatprep.subr.bf16.mxu1 %v9938_v61  ;;  %v10835_v58 = vunpack.i.h.bf16 %v10833_v56 }
 0x2bc   : > { %9021 = vmatmul.mubr.msk.f32.gmra.mrb[8].mxu1 %vm2504_vm12, %v9017_v63 }
 0x2bd   : > { %9941 = vmatpush3.bf16.msra.mxu1 %v9938_v61  ;;  %3341 = vmatprep.mubr.f32.mxu1 %v12150_v59  ;;  %v10834_v61 = vunpack.i.l.bf16 %v10833_v56 }
 0x2be   : > { %9943 = vmatprep.subr.bf16.mxu1 %v9942_v26  ;;  %v9950_v26 = vpack.c.bf16 %v12043_v47, %v12041_v46  ;;  %v10798_v46 = vpop.permute.xlu0 %10797  ;;  %v10795_v47 = vunpack.i.h.bf16 %v10793_v30 }
 0x2bf   : > { %v10800_v12 = vunpack.i.h.bf16 %v10798_v46  ;;  %v10799_v13 = vunpack.i.l.bf16 %v10798_v46  ;;  %v3937_v4 = vsel %vm1675_vm7, %v10834_v61, %v10835_v58 }
 0x2c0   : > { %9022 = vmatmul.mubr.msk.f32.gmra.mrb[10].mxu1 %vm2504_vm12, %v9018_v1 }
 0x2c1   : > { %3347 = vmatprep.mubr.f32.mxu1 %v12150_v59  ;;  %v3688_v24 = vsel %vm1457_vm6, %v10799_v13, %v10800_v12  ;;  %v9970_v50 = vpack.c.bf16 %v10805_v8, %v10800_v12  ;;  %v9053_v12 = vld [vmem:[%s13348_s4 + $0xc8] sm:$0xff] }
 0x2c2   : > { %v10808_v14 = vpop.permute.xlu0 %10807  ;;  %v9962_v28 = vpack.c.bf16 %v3690_v19, %v3688_v24  ;;  %v9054_v19 = vld [vmem:[%s13348_s4 + $0xd0] sm:$0xff] }
 0x2c3   : > { %v10810_v20 = vunpack.i.h.bf16 %v10808_v14  ;;  %v10809_v21 = vunpack.i.l.bf16 %v10808_v14 }
 0x2c4   : > { %9023 = vmatmul.mubr.msk.f32.gmra.mrb[12].mxu1 %vm2504_vm12, %v9019_v3 }
 0x2c5   : > { %9577 = vmatprep.mubr.msk.f32.mxu1 %vm2504_vm12, %v9016_v60  ;;  %v3689_v25 = vsel %vm1457_vm6, %v10810_v20, %v10804_v10  ;;  %v3687_v29 = vsel %vm1457_vm6, %v10809_v21, %v10799_v13  ;;  %v10825_v60 = vunpack.i.h.bf16 %v10823_v49 }
 0x2c6   : > { %v9964_v34 = vpack.c.bf16 %v3689_v25, %v3687_v29  ;;  %v10818_v35 = vpop.permute.xlu0 %10817 }
 0x2c7   : > { %v10820_v44 = vunpack.i.h.bf16 %v10818_v35  ;;  %v10819_v48 = vunpack.i.l.bf16 %v10818_v35 }
 0x2c8   : > { %9578 = vmatmul.mubr.msk.f32.vlgmr.msra.gmra.mrb[14].mxu1 %vm2504_vm12, %v9017_v63  ;;  %v9043_v63 = vld [vmem:[%s13348_s4 + $0xb8] sm:$0xff] }
 0x2c9   : > { %9945 = vmatpush1.bf16.msra.mxu1 %v9944_v22  ;;  %9580 = vmatprep.mubr.msk.f32.mxu1 %vm2504_vm12, %v9018_v1  ;;  %v10789_v22 = vunpack.i.l.bf16 %v10788_v18  ;;  %v3933_v0 = vsel %vm1675_vm7, %v10819_v48, %v10820_v44  ;;  %v3930_v18 = vsel %vm1675_vm7, %v10824_v55, %v10814_v38  ;;  %v9982_v46 = vpack.c.bf16 %v10820_v44, %v10815_v37 }
 0x2ca   : > { %9947 = vmatprep.subr.bf16.mxu1 %v9946_v45  ;;  %v9974_v53 = vpack.c.bf16 %v3933_v0, %v3931_v52  ;;  %v10828_v54 = vpop.permute.xlu0 %10827 }
 0x2cb   : > { %v3685_v17 = vsel %vm1457_vm6, %v10795_v47, %v10789_v22  ;;  %v10830_v1 = vunpack.i.h.bf16 %v10828_v54  ;;  %v9052_v47 = vld [vmem:[%s13348_s4 + $0xc0] sm:$0xff] }
 0x2cc   : > { %9581 = vmatmul.mubr.msk.f32.gmra.mrb[16].mxu1 %vm2504_vm12, %v9019_v3  ;;  %v9960_v23 = vpack.c.bf16 %v3685_v17, %v3683_v16  ;;  %v10829_v3 = vunpack.i.l.bf16 %v10828_v54 }
 0x2cd   : > { %9949 = vmatpush1.bf16.msra.mxu1 %v9948_v43  ;;  %3532 = vmatprep.mubr.f32.mxu1 %v12150_v59  ;;  %v3686_v43 = vsel %vm1457_vm6, %v10789_v22, %v10790_v15 }
 0x2ce   : > { %9951 = vmatprep.subr.bf16.mxu1 %v9950_v26  ;;  %v9958_v45 = vpack.c.bf16 %v3686_v43, %v3684_v39  ;;  %v10838_v9 = vpop.permute.xlu0 %10837  ;;  %v3935_v22 = vsel %vm1675_vm7, %v10829_v3, %v10830_v1  ;;  %v10843_v39 = vpop.permute.xlu1 %10842 }
 0x2cf   : > { %v10840_v5 = vunpack.i.h.bf16 %v10838_v9  ;;  %v10844_v32 = vunpack.i.l.bf16 %v10843_v39 }
 0x2d0   : > { %9032 = vmatmul.mubr.msk.f32.vlgmr.msra.gmra.mrb[6].mxu1 %vm2504_vm12, %v9028_v6 }
 0x2d1   : > { %9953 = vmatpush3.bf16.msra.mxu1 %v9950_v26  ;;  %3538 = vmatprep.mubr.f32.mxu1 %v12150_v59  ;;  %v3932_v26 = vsel %vm1675_vm7, %v10825_v60, %v10819_v48  ;;  %v3936_v30 = vsel %vm1675_vm7, %v10840_v5, %v10834_v61  ;;  %v9064_v60 = vld [vmem:[%s13348_s4 + $0xe0] sm:$0xff] }
 0x2d2   : > { %9955 = vmatprep.subr.bf16.mxu1 %v9954_v31  ;;  %v9976_v15 = vpack.c.bf16 %v3932_v26, %v3930_v18  ;;  %v10853_v10 = vpop.permute.xlu1 %10852 }
 0x2d3   : > { %v10855_v21 = vunpack.i.h.bf16 %v10853_v10 }
 0x2d4   : > { %9033 = vmatmul.mubr.msk.f32.gmra.mrb[8].mxu1 %vm2504_vm12, %v9029_v27 }
 0x2d5   : > { %9957 = vmatpush3.bf16.msra.mxu1 %v9954_v31  ;;  %3544 = vmatprep.mubr.f32.mxu1 %v12150_v59  ;;  %v9978_v31 = vpack.c.bf16 %v3937_v4, %v3935_v22  ;;  %v9066_v4 = vld [vmem:[%s13348_s4 + $0xf0] sm:$0xff] }
 0x2d6   : > { %9959 = vmatprep.subr.bf16.mxu1 %v9958_v45  ;;  %v10848_v45 = vpop.permute.xlu0 %10847  ;;  %v10863_v20 = vpop.permute.xlu1 %10862 }
 0x2d7   : > { %v10850_v7 = vunpack.i.h.bf16 %v10848_v45  ;;  %v10849_v8 = vunpack.i.l.bf16 %v10848_v45  ;;  %v10865_v24 = vunpack.i.h.bf16 %v10863_v20  ;;  %v10864_v25 = vunpack.i.l.bf16 %v10863_v20  ;;  %v9078_v20 = vld [vmem:[%s13348_s4 + $0x110] sm:$0xff] }
 0x2d8   : > { %9034 = vmatmul.mubr.msk.f32.gmra.mrb[10].mxu1 %vm2504_vm12, %v9030_v40 }
 0x2d9   : > { %3550 = vmatprep.mubr.f32.mxu1 %v12150_v59  ;;  %v4180_v14 = vsel %vm1893_vm8, %v10849_v8, %v10850_v7  ;;  %v4184_v37 = vsel %vm1893_vm8, %v10864_v25, %v10865_v24 }
 0x2da   : > { %v10858_v17 = vpop.permute.xlu0 %10857  ;;  %v10873_v52 = vpop.permute.xlu1 %10872 }
 0x2db   : > { %v10860_v29 = vunpack.i.h.bf16 %v10858_v17  ;;  %v10859_v33 = vunpack.i.l.bf16 %v10858_v17  ;;  %v10874_v56 = vunpack.i.l.bf16 %v10873_v52 }
 0x2dc   : > { %9035 = vmatmul.mubr.msk.f32.gmra.mrb[12].mxu1 %vm2504_vm12, %v9031_v11 }
 0x2dd   : > { %9591 = vmatprep.mubr.msk.f32.mxu1 %vm2504_vm12, %v9028_v6  ;;  %v10839_v6 = vunpack.i.l.bf16 %v10838_v9  ;;  %v4182_v48 = vsel %vm1893_vm8, %v10859_v33, %v10860_v29 }
 0x2de   : > { %v10883_v61 = vpop.permute.xlu1 %10882 }
 0x2e0   : > { %9592 = vmatmul.mubr.msk.f32.vlgmr.msra.gmra.mrb[14].mxu1 %vm2504_vm12, %v9029_v27  ;;  %v3934_v27 = vsel %vm1675_vm7, %v10839_v6, %v10829_v3  ;;  %v10885_v6 = vunpack.i.h.bf16 %v10883_v61 }
 0x2e1   : > { %9961 = vmatpush1.bf16.msra.mxu1 %v9960_v23  ;;  %9594 = vmatprep.mubr.msk.f32.mxu1 %vm2504_vm12, %v9030_v40  ;;  %v9980_v43 = vpack.c.bf16 %v3936_v30, %v3934_v27  ;;  %v10845_v40 = vunpack.i.h.bf16 %v10843_v39  ;;  %v10854_v23 = vunpack.i.l.bf16 %v10853_v10 }
 0x2e2   : > { %9963 = vmatprep.subr.bf16.mxu1 %v9962_v28  ;;  %v9055_v28 = vld [vmem:[%s13348_s4 + $0xd8] sm:$0xff]  ;;  %v10893_v5 = vpop.permute.xlu1 %10892 }
 0x2e3   : > { %v4178_v13 = vsel %vm1893_vm8, %v10844_v32, %v10845_v40  ;;  %v4177_v35 = vsel %vm1893_vm8, %v10854_v23, %v10844_v32  ;;  %v9998_v54 = vpack.c.bf16 %v10850_v7, %v10845_v40  ;;  %v10895_v22 = vunpack.i.h.bf16 %v10893_v5 }
 0x2e4   : > { %9595 = vmatmul.mubr.msk.f32.gmra.mrb[16].mxu1 %vm2504_vm12, %v9031_v11  ;;  %v9986_v11 = vpack.c.bf16 %v10835_v58, %v10830_v1  ;;  %v9990_v16 = vpack.c.bf16 %v4180_v14, %v4178_v13  ;;  %v9065_v1 = vld [vmem:[%s13348_s4 + $0xe8] sm:$0xff]  ;;  %v10894_v30 = vunpack.i.l.bf16 %v10893_v5  ;;  %v12466_v23 = vpack.i.bf16 %v12150_v59, %v12150_v59 }
 0x2e5   : > { %9965 = vmatpush1.bf16.msra.mxu1 %v9964_v34  ;;  %3779 = vmatprep.mubr.f32.mxu1 %v12150_v59  ;;  %v10868_v34 = vpop.permute.xlu0 %10867 }
 0x2e6   : > { %9967 = vmatprep.subr.bf16.mxu1 %v9966_v36  ;;  %v10870_v38 = vunpack.i.h.bf16 %v10868_v34  ;;  %v4431_v40 = vsel %vm2111_vm10, %v10894_v30, %v10895_v22  ;;  %10902 = vrot.lane.b32.xlu1 %v12466_v23, %s11475_s19 }
 0x2e8   : > { %9044 = vmatmul.mubr.msk.f32.vlgmr.msra.gmra.mrb[6].mxu1 %vm2504_vm12, %v9040_v42  ;;  %v4183_v49 = vsel %vm1893_vm8, %v10870_v38, %v10864_v25 }
 0x2e9   : > { %9969 = vmatpush3.bf16.msra.mxu1 %v9966_v36  ;;  %3785 = vmatprep.mubr.f32.mxu1 %v12150_v59  ;;  %v4179_v36 = vsel %vm1893_vm8, %v10855_v21, %v10849_v8  ;;  %v9079_v21 = vld [vmem:[%s13348_s4 + $0x118] sm:$0xff] }
 0x2ea   : > { %9971 = vmatprep.subr.bf16.mxu1 %v9970_v50  ;;  %v9992_v44 = vpack.c.bf16 %v4179_v36, %v4177_v35 }
 0x2ec   : > { %9045 = vmatmul.mubr.msk.f32.gmra.mrb[8].mxu1 %vm2504_vm12, %v9041_v51 }
 0x2ed   : > { %9973 = vmatpush3.bf16.msra.mxu1 %v9970_v50  ;;  %3791 = vmatprep.mubr.f32.mxu1 %v12150_v59  ;;  %v9994_v50 = vpack.c.bf16 %v4184_v37, %v4182_v48 }
 0x2ee   : > { %9975 = vmatprep.subr.bf16.mxu1 %v9974_v53  ;;  %v10878_v53 = vpop.permute.xlu0 %10877 }
 0x2ef   : > { %v10880_v55 = vunpack.i.h.bf16 %v10878_v53  ;;  %v10879_v58 = vunpack.i.l.bf16 %v10878_v53 }
 0x2f0   : > { %9046 = vmatmul.mubr.msk.f32.gmra.mrb[10].mxu1 %vm2504_vm12, %v9042_v57 }
 0x2f1   : > { %3797 = vmatprep.mubr.f32.mxu1 %v12150_v59  ;;  %v4427_v9 = vsel %vm2111_vm10, %v10879_v58, %v10880_v55 }
 0x2f2   : > { %v10888_v26 = vpop.permute.xlu0 %10887 }
 0x2f3   : > { %v10890_v27 = vunpack.i.h.bf16 %v10888_v26  ;;  %v10889_v39 = vunpack.i.l.bf16 %v10888_v26 }
 0x2f4   : > { %9047 = vmatmul.mubr.msk.f32.gmra.mrb[12].mxu1 %vm2504_vm12, %v9043_v63 }
 0x2f5   : > { %9605 = vmatprep.mubr.msk.f32.mxu1 %vm2504_vm12, %v9040_v42  ;;  %v10869_v42 = vunpack.i.l.bf16 %v10868_v34  ;;  %v4429_v8 = vsel %vm2111_vm10, %v10889_v39, %v10890_v27  ;;  %v10018_v17 = vpack.c.bf16 %v10895_v22, %v10890_v27 }
 0x2f8   : > { %9606 = vmatmul.mubr.msk.f32.vlgmr.msra.gmra.mrb[14].mxu1 %vm2504_vm12, %v9041_v51  ;;  %v4181_v51 = vsel %vm1893_vm8, %v10869_v42, %v10859_v33 }
 0x2f9   : > { %9977 = vmatpush1.bf16.msra.mxu1 %v9976_v15  ;;  %9608 = vmatprep.mubr.msk.f32.mxu1 %vm2504_vm12, %v9042_v57  ;;  %v9996_v0 = vpack.c.bf16 %v4183_v49, %v4181_v51  ;;  %v10875_v57 = vunpack.i.h.bf16 %v10873_v52  ;;  %v10884_v15 = vunpack.i.l.bf16 %v10883_v61 }
 0x2fa   : > { %9979 = vmatprep.subr.bf16.mxu1 %v9978_v31  ;;  %v9067_v31 = vld [vmem:[%s13348_s4 + $0xf8] sm:$0xff] }
 0x2fb   : > { %v4425_v3 = vsel %vm2111_vm10, %v10874_v56, %v10875_v57  ;;  %v4424_v45 = vsel %vm2111_vm10, %v10884_v15, %v10874_v56  ;;  %v10014_v14 = vpack.c.bf16 %v10880_v55, %v10875_v57 }
 0x2fc   : > { %9609 = vmatmul.mubr.msk.f32.gmra.mrb[16].mxu1 %vm2504_vm12, %v9043_v63  ;;  %v10002_v63 = vpack.c.bf16 %v10865_v24, %v10860_v29  ;;  %v10006_v18 = vpack.c.bf16 %v4427_v9, %v4425_v3  ;;  %v4649_v24 = vpop.permute.xlu1 %4648 }
 0x2fd   : > { %9981 = vmatpush1.bf16.msra.mxu1 %v9980_v43  ;;  %4026 = vmatprep.mubr.f32.mxu1 %v12150_v59  ;;  %v10898_v43 = vpop.permute.xlu0 %10897 }
 0x2fe   : > { %9983 = vmatprep.subr.bf16.mxu1 %v9982_v46  ;;  %v10900_v32 = vunpack.i.h.bf16 %v10898_v43 }
 0x300   : > { %9056 = vmatmul.mubr.msk.f32.vlgmr.msra.gmra.mrb[6].mxu1 %vm2504_vm12, %v9052_v47  ;;  %v4430_v10 = vsel %vm2111_vm10, %v10900_v32, %v10894_v30  ;;  %v4659_v49 = vpop.permute.xlu1 %4658 }
 0x301   : > { %9985 = vmatpush3.bf16.msra.mxu1 %v9982_v46  ;;  %4032 = vmatprep.mubr.f32.mxu1 %v12150_v59  ;;  %v4426_v46 = vsel %vm2111_vm10, %v10885_v6, %v10879_v58  ;;  %v4654_v35 = vpop.permute.xlu0 %4653 }
 0x302   : > { %9987 = vmatprep.subr.bf16.mxu1 %v9986_v11  ;;  %v10008_v7 = vpack.c.bf16 %v4426_v46, %v4424_v45 }
 0x304   : > { %9057 = vmatmul.mubr.msk.f32.gmra.mrb[8].mxu1 %vm2504_vm12, %v9053_v12 }
 0x305   : > { %9989 = vmatpush3.bf16.msra.mxu1 %v9986_v11  ;;  %4038 = vmatprep.mubr.f32.mxu1 %v12150_v59  ;;  %v10010_v11 = vpack.c.bf16 %v4431_v40, %v4429_v8  ;;  %v4664_v58 = vpop.permute.xlu0 %4663 }
 0x306   : > { %9991 = vmatprep.subr.bf16.mxu1 %v9990_v16  ;;  %v9076_v16 = vld [vmem:[%s13348_s4 + $0x100] sm:$0xff] }
 0x308   : > { %9058 = vmatmul.mubr.msk.f32.gmra.mrb[10].mxu1 %vm2504_vm12, %v9054_v19 }
 0x309   : > { %4044 = vmatprep.mubr.f32.mxu1 %v12150_v59 }
 0x30c   : > { %9059 = vmatmul.mubr.msk.f32.gmra.mrb[12].mxu1 %vm2504_vm12, %v9055_v28 }
 0x30d   : > { %9619 = vmatprep.mubr.msk.f32.mxu1 %vm2504_vm12, %v9052_v47  ;;  %v10899_v47 = vunpack.i.l.bf16 %v10898_v43 }
 0x310   : > { %9620 = vmatmul.mubr.msk.f32.vlgmr.msra.gmra.mrb[14].mxu1 %vm2504_vm12, %v9053_v12  ;;  %v4428_v12 = vsel %vm2111_vm10, %v10899_v47, %v10889_v39 }
 0x311   : > { %9993 = vmatpush1.bf16.msra.mxu1 %v9992_v44  ;;  %9622 = vmatprep.mubr.msk.f32.mxu1 %vm2504_vm12, %v9054_v19  ;;  %v10012_v13 = vpack.c.bf16 %v4430_v10, %v4428_v12  ;;  %v9077_v19 = vld [vmem:[%s13348_s4 + $0x108] sm:$0xff] }
 0x312   : > { %9995 = vmatprep.subr.bf16.mxu1 %v9994_v50 }
 0x314   : > { %9623 = vmatmul.mubr.msk.f32.gmra.mrb[16].mxu1 %vm2504_vm12, %v9055_v28 }
 0x315   : > { %9997 = vmatpush1.bf16.msra.mxu1 %v9996_v0  ;;  %4273 = vmatprep.mubr.f32.mxu1 %v12150_v59 }
 0x316   : > { %9999 = vmatprep.subr.bf16.mxu1 %v9998_v54 }
 0x318   : > { %9068 = vmatmul.mubr.msk.f32.vlgmr.msra.gmra.mrb[6].mxu1 %vm2504_vm12, %v9064_v60 }
 0x319   : > { %10001 = vmatpush3.bf16.msra.mxu1 %v9998_v54  ;;  %4279 = vmatprep.mubr.f32.mxu1 %v12150_v59 }
 0x31a   : > { %10003 = vmatprep.subr.bf16.mxu1 %v10002_v63 }
 0x31c   : > { %9069 = vmatmul.mubr.msk.f32.gmra.mrb[8].mxu1 %vm2504_vm12, %v9065_v1 }
 0x31d   : > { %10005 = vmatpush3.bf16.msra.mxu1 %v10002_v63  ;;  %4285 = vmatprep.mubr.f32.mxu1 %v12150_v59 }
 0x31e   : > { %10007 = vmatprep.subr.bf16.mxu1 %v10006_v18 }
 0x320   : > { %9070 = vmatmul.mubr.msk.f32.gmra.mrb[10].mxu1 %vm2504_vm12, %v9066_v4 }
 0x321   : > { %4291 = vmatprep.mubr.f32.mxu1 %v12150_v59 }
 0x324   : > { %9071 = vmatmul.mubr.msk.f32.gmra.mrb[12].mxu1 %vm2504_vm12, %v9067_v31 }
 0x325   : > { %9633 = vmatprep.mubr.msk.f32.mxu1 %vm2504_vm12, %v9064_v60 }
 0x328   : > { %9634 = vmatmul.mubr.msk.f32.vlgmr.msra.gmra.mrb[14].mxu1 %vm2504_vm12, %v9065_v1 }
 0x329   : > { %10009 = vmatpush1.bf16.msra.mxu1 %v10008_v7  ;;  %9636 = vmatprep.mubr.msk.f32.mxu1 %vm2504_vm12, %v9066_v4 }
 0x32a   : > { %10011 = vmatprep.subr.bf16.mxu1 %v10010_v11 }
 0x32c   : > { %9637 = vmatmul.mubr.msk.f32.gmra.mrb[16].mxu1 %vm2504_vm12, %v9067_v31 }
 0x32d   : > { %10013 = vmatpush1.bf16.msra.mxu1 %v10012_v13  ;;  %4520 = vmatprep.mubr.f32.mxu1 %v12150_v59 }
 0x32e   : > { %10015 = vmatprep.subr.bf16.mxu1 %v10014_v14 }
 0x330   : > { %9080 = vmatmul.mubr.msk.f32.vlgmr.msra.gmra.mrb[6].mxu1 %vm2504_vm12, %v9076_v16 }
 0x331   : > { %10017 = vmatpush3.bf16.msra.mxu1 %v10014_v14  ;;  %4526 = vmatprep.mubr.f32.mxu1 %v12150_v59 }
 0x332   : > { %10019 = vmatprep.subr.bf16.mxu1 %v10018_v17 }
 0x334   : > { %9081 = vmatmul.mubr.msk.f32.gmra.mrb[8].mxu1 %vm2504_vm12, %v9077_v19 }
 0x335   : > { %10021 = vmatpush3.bf16.msra.mxu1 %v10018_v17  ;;  %4532 = vmatprep.mubr.f32.mxu1 %v12150_v59 }
 0x338   : > { %9082 = vmatmul.mubr.msk.f32.gmra.mrb[10].mxu1 %vm2504_vm12, %v9078_v20 }
 0x339   : > { %4538 = vmatprep.mubr.f32.mxu1 %v12150_v59 }
 0x33c   : > { %9083 = vmatmul.mubr.msk.f32.gmra.mrb[12].mxu1 %vm2504_vm12, %v9079_v21 }
 0x33d   : > { %9647 = vmatprep.mubr.msk.f32.mxu1 %vm2504_vm12, %v9076_v16 }
 0x340   : > { %9648 = vmatmul.mubr.msk.f32.vlgmr.msra.gmra.mrb[14].mxu1 %vm2504_vm12, %v9077_v19 }
 0x341   : > { %9650 = vmatprep.mubr.msk.f32.mxu1 %vm2504_vm12, %v9078_v20 }
 0x344   : > { %9651 = vmatmul.mubr.msk.f32.gmra.mrb[16].mxu1 %vm2504_vm12, %v9079_v21 }
 0x345   : > { %7166 = vmatprep.mubr.f32.mxu1 %v12150_v59 }
 0x403   : > { %v4522_v25 = vpop.f32.mrb[6].mxu1 }
 0x404   : > { %v4666_v28 = vadd.f32 %v4649_v24, %v4522_v25  ;;  %v4524_v29 = vpop.f32.mrb[7].mxu1 }
 0x405   : > { %v4667_v33 = vadd.f32 %v4649_v24, %v4524_v29 }
 0x406   : > { %v12471_v34 = vmul.f32 %v4666_v28, %v11980_v62 }
 0x407   : > { %v12474_v36 = vmul.f32 %v4667_v33, %v11982_v2  ;;  %v4528_v37 = vpop.f32.mrb[8].mxu1 }
 0x408   : > { %v4669_v38 = vadd.f32 %v4654_v35, %v4528_v37  ;;  %v4530_v42 = vpop.f32.mrb[9].mxu1 }
 0x409   : > { %v4670_v59 = vadd.f32 %v4654_v35, %v4530_v42  ;;  %v12478_v44 = vpack.i.bf16 %v12474_v36, %v12471_v34 }
 0x40a   : > { %v12481_v48 = vmul.f32 %v4669_v38, %v11980_v62 }
 0x40b   : > { %v12484_v50 = vmul.f32 %v4670_v59, %v11982_v2  ;;  %v4534_v51 = vpop.f32.mrb[10].mxu1  ;;  %10907 = vrot.lane.b32.xlu1 %v12478_v44, %s11475_s19  ;;  %v6936_v59 = vld [vmem:[%s13351_s7] sm:$0xff] }
 0x40c   : > { %v4672_v52 = vadd.f32 %v4659_v49, %v4534_v51  ;;  %v4536_v0 = vpop.f32.mrb[11].mxu1  ;;  %v12490_v53 = vpack.i.bf16 %v12481_v48, %v12471_v34  ;;  %v10088_v54 = vpack.c.bf16 %v12481_v48, %v12471_v34  ;;  %v9132_v34 = vld [vmem:[%s13350_s6 + $0x80] sm:$0xff] }
 0x40d   : > { %v4673_v57 = vadd.f32 %v4659_v49, %v4536_v0  ;;  %v10911_v56 = vpack.i.bf16 %v12484_v50, %v12481_v48  ;;  %v10086_v60 = vpack.c.bf16 %v12484_v50, %v12474_v36 }
 0x40e   : > { %v12499_v55 = vmul.f32 %v4672_v52, %v11980_v62 }
 0x40f   : > { %v12502_v61 = vmul.f32 %v4673_v57, %v11982_v2  ;;  %v4540_v63 = vpop.f32.mrb[12].mxu1  ;;  %10912 = vrot.lane.b32.xlu0 %v10911_v56, %s11475_s19  ;;  %v6938_v57 = vld [vmem:[%s13351_s7 + $0x10] sm:$0xff] }
 0x410   : > { %v4675_v1 = vadd.f32 %v4664_v58, %v4540_v63  ;;  %v4542_v3 = vpop.f32.mrb[13].mxu1 }
 0x411   : > { %v4676_v9 = vadd.f32 %v4664_v58, %v4542_v3  ;;  %v10916_v18 = vpack.i.bf16 %v12502_v61, %v12499_v55 }
 0x412   : > { %v12508_v26 = vmul.f32 %v4675_v1, %v11980_v62 }
 0x413   : > { %v12511_v4 = vmul.f32 %v4676_v9, %v11982_v2  ;;  %v9649_v5 = vpop.f32.mrb[14].mxu1  ;;  %10917 = vrot.lane.b32.xlu0 %v10916_v18, %s11475_s19 }
 0x414   : > { %v4671_v6 = vadd.f32 %v9649_v5, %v4654_v35  ;;  %v4611_v15 = vpop.f32.mrb[15].mxu1  ;;  %v12516_v22 = vpack.i.bf16 %v12508_v26, %v12499_v55  ;;  %v10092_v30 = vpack.c.bf16 %v12508_v26, %v12499_v55  ;;  %v9133_v55 = vld [vmem:[%s13350_s6 + $0x88] sm:$0xff] }
 0x415   : > { %v4668_v31 = vadd.f32 %v4649_v24, %v4611_v15  ;;  %v10921_v27 = vpack.i.bf16 %v12511_v4, %v12508_v26  ;;  %v10090_v39 = vpack.c.bf16 %v12511_v4, %v12502_v61  ;;  %v6939_v15 = vld [vmem:[%s13351_s7 + $0x18] sm:$0xff] }
 0x416   : > { %v4683_v43 = vmul.f32 %v4671_v6, %v11970_v41 }
 0x417   : > { %v4680_v45 = vmul.f32 %v4668_v31, %v11970_v41  ;;  %v9652_v46 = vpop.f32.mrb[16].mxu1  ;;  %10927 = vrot.lane.b32.xlu0 %v12466_v23, %s11475_s19  ;;  %10922 = vrot.lane.b32.xlu1 %v10921_v27, %s11475_s19 }
 0x418   : > { %4695 = vst.msk [vmem:[#allocation2 + $0x38] sm:$0xff] %vm2396_vm11, %v4683_v43  ;;  %v4677_v40 = vadd.f32 %v9652_v46, %v4664_v58  ;;  %v4621_v32 = vpop.f32.mrb[17].mxu1 }
 0x419   : > { %4692 = vst.msk [vmem:[#allocation2 + $0x18] sm:$0xff] %vm2396_vm11, %v4680_v45  ;;  %v4674_v47 = vadd.f32 %v4659_v49, %v4621_v32  ;;  %v12646_v32 = vld [vmem:[#allocation2] sm:$0xff] }
 0x41a   : > { %v4689_v7 = vmul.f32 %v4677_v40, %v11970_v41  ;;  %v9088_v40 = vld [vmem:[%s13350_s6 + $0x20] sm:$0xff] }
 0x41b   : > { %v4686_v8 = vmul.f32 %v4674_v47, %v11970_v41  ;;  %v9089_v47 = vld [vmem:[%s13350_s6 + $0x28] sm:$0xff] }
 0x41c   : > { %4701 = vst.msk [vmem:[#allocation2 + $0x78] sm:$0xff] %vm2396_vm11, %v4689_v7 }
 0x41d   : > { %4698 = vst.msk [vmem:[#allocation2 + $0x58] sm:$0xff] %vm2396_vm11, %v4686_v8 }
 0x41f   : > { %v12535_v10 = vld [vmem:[#allocation2 + $0x38] sm:$0xff] }
 0x420   : > { %v12537_v11 = vld [vmem:[#allocation2 + $0x18] sm:$0xff]  ;;  %v11066_v19 = vpack.i.bf16 %v12535_v10, %v12484_v50 }
 0x421   : > { %v10931_v12 = vpack.i.bf16 %v12535_v10, %v12537_v11  ;;  %v11061_v17 = vpack.i.bf16 %v12537_v11, %v12474_v36 }
 0x423   : > { %10932 = vrot.lane.b32.xlu1 %v10931_v12, %s11475_s19  ;;  %v12542_v13 = vld [vmem:[#allocation2 + $0x78] sm:$0xff] }
 0x424   : > { %v12544_v14 = vld [vmem:[#allocation2 + $0x58] sm:$0xff]  ;;  %v11076_v20 = vpack.i.bf16 %v12542_v13, %v12511_v4 }
 0x425   : > { %v10941_v16 = vpack.i.bf16 %v12542_v13, %v12544_v14  ;;  %v11081_v21 = vpack.i.bf16 %v12544_v14, %v12502_v61  ;;  %v10098_v4 = vpack.c.bf16 %v12542_v13, %v12544_v14 }
 0x427   : > { %10937 = vrot.lane.b32.xlu1 %v12478_v44, %s11476_s20  ;;  %10942 = vrot.lane.b32.xlu0 %v10941_v16, %s11475_s19 }
 0x42b   : > { %10952 = vrot.lane.b32.xlu1 %v12466_v23, %s11476_s20  ;;  %10947 = vrot.lane.b32.xlu0 %v10911_v56, %s11476_s20 }
 0x42f   : > { %10962 = vrot.lane.b32.xlu1 %v10921_v27, %s11476_s20  ;;  %10957 = vrot.lane.b32.xlu0 %v10916_v18, %s11476_s20 }
 0x433   : > { %10972 = vrot.lane.b32.xlu1 %v10931_v12, %s11476_s20  ;;  %10967 = vrot.lane.b32.xlu0 %v12466_v23, %s11476_s20 }
 0x437   : > { %10977 = vrot.lane.b32.xlu1 %v12478_v44, %s11477_s21  ;;  %10982 = vrot.lane.b32.xlu0 %v10941_v16, %s11476_s20 }
 0x43b   : > { %10992 = vrot.lane.b32.xlu1 %v12466_v23, %s11477_s21  ;;  %10987 = vrot.lane.b32.xlu0 %v10911_v56, %s11477_s21 }
 0x43f   : > { %11002 = vrot.lane.b32.xlu1 %v10921_v27, %s11477_s21  ;;  %10997 = vrot.lane.b32.xlu0 %v10916_v18, %s11477_s21 }
 0x443   : > { %11012 = vrot.lane.b32.xlu1 %v10931_v12, %s11477_s21  ;;  %11007 = vrot.lane.b32.xlu0 %v12466_v23, %s11477_s21 }
 0x447   : > { %11017 = vrot.lane.b32.xlu1 %v12478_v44, %s11478_s22  ;;  %11022 = vrot.lane.b32.xlu0 %v10941_v16, %s11477_s21 }
 0x44b   : > { %11032 = vrot.lane.b32.xlu1 %v12466_v23, %s11478_s22  ;;  %11027 = vrot.lane.b32.xlu0 %v10911_v56, %s11478_s22  ;;  %v6937_v56 = vld [vmem:[%s13351_s7 + $0x8] sm:$0xff] }
 0x44f   : > { %11042 = vrot.lane.b32.xlu1 %v10921_v27, %s11478_s22  ;;  %11037 = vrot.lane.b32.xlu0 %v10916_v18, %s11478_s22 }
 0x453   : > { %11052 = vrot.lane.b32.xlu1 %v10931_v12, %s11478_s22  ;;  %11047 = vrot.lane.b32.xlu0 %v12466_v23, %s11478_s22  ;;  %v10903_v23 = vpop.permute.xlu1 %10902 }
 0x454   : > { %v10905_v25 = vunpack.i.h.bf16 %v10903_v23  ;;  %v10904_v28 = vunpack.i.l.bf16 %v10903_v23 }
 0x457   : > { %11062 = vrot.lane.b32.xlu1 %v11061_v17, %s11479_s23  ;;  %11057 = vrot.lane.b32.xlu0 %v10941_v16, %s11478_s22 }
 0x45b   : > { %11072 = vrot.lane.b32.xlu1 %v12490_v53, %s11479_s23  ;;  %11067 = vrot.lane.b32.xlu0 %v11066_v19, %s11479_s23 }
 0x45f   : > { %11077 = vrot.lane.b32.xlu1 %v11076_v20, %s11479_s23  ;;  %11082 = vrot.lane.b32.xlu0 %v11081_v21, %s11479_s23 }
 0x463   : > { %11092 = vrot.lane.b32.xlu1 %v11061_v17, %s11480_s24  ;;  %11087 = vrot.lane.b32.xlu0 %v12516_v22, %s11479_s23 }
 0x467   : > { %11102 = vrot.lane.b32.xlu1 %v12490_v53, %s11480_s24  ;;  %11097 = vrot.lane.b32.xlu0 %v11066_v19, %s11480_s24 }
 0x46b   : > { %11107 = vrot.lane.b32.xlu1 %v11076_v20, %s11480_s24  ;;  %11112 = vrot.lane.b32.xlu0 %v11081_v21, %s11480_s24 }
 0x46f   : > { %11122 = vrot.lane.b32.xlu1 %v11061_v17, %s11481_s25  ;;  %11117 = vrot.lane.b32.xlu0 %v12516_v22, %s11480_s24 }
 0x473   : > { %11132 = vrot.lane.b32.xlu1 %v12490_v53, %s11481_s25  ;;  %11127 = vrot.lane.b32.xlu0 %v11066_v19, %s11481_s25 }
 0x477   : > { %11137 = vrot.lane.b32.xlu1 %v11076_v20, %s11481_s25  ;;  %11142 = vrot.lane.b32.xlu0 %v11081_v21, %s11481_s25 }
 0x47b   : > { %11152 = vrot.lane.b32.xlu1 %v11061_v17, %s11482_s26  ;;  %11147 = vrot.lane.b32.xlu0 %v12516_v22, %s11481_s25 }
 0x47d   : > { %v10908_v24 = vpop.permute.xlu1 %10907 }
 0x47e   : > { %v10910_v29 = vunpack.i.h.bf16 %v10908_v24  ;;  %v10909_v33 = vunpack.i.l.bf16 %v10908_v24 }
 0x47f   : > { %11162 = vrot.lane.b32.xlu1 %v12490_v53, %s11482_s26  ;;  %11157 = vrot.lane.b32.xlu0 %v11066_v19, %s11482_s26  ;;  %v9090_v19 = vld [vmem:[%s13350_s6 + $0x30] sm:$0xff] }
 0x480   : > { %v4775_v42 = vsel %vm393_vm0, %v10904_v28, %v10909_v33  ;;  %v4776_v49 = vsel %vm393_vm0, %v10909_v33, %v10910_v29 }
 0x481   : > { %v10913_v35 = vpop.permute.xlu0 %10912 }
 0x482   : > { %v10915_v37 = vunpack.i.h.bf16 %v10913_v35  ;;  %v10914_v38 = vunpack.i.l.bf16 %v10913_v35 }
 0x483   : > { %11167 = vrot.lane.b32.xlu1 %v11076_v20, %s11482_s26  ;;  %11172 = vrot.lane.b32.xlu0 %v11081_v21, %s11482_s26 }
 0x484   : > { %v4778_v44 = vsel %vm393_vm0, %v10905_v25, %v10914_v38  ;;  %v4779_v51 = vsel %vm393_vm0, %v10914_v38, %v10915_v37 }
 0x485   : > { %v10918_v52 = vpop.permute.xlu0 %10917  ;;  %v10022_v0 = vpack.c.bf16 %v4779_v51, %v4776_v49  ;;  %v10024_v53 = vpack.c.bf16 %v4778_v44, %v4775_v42 }
 0x486   : > { %v10920_v58 = vunpack.i.h.bf16 %v10918_v52  ;;  %v10919_v63 = vunpack.i.l.bf16 %v10918_v52 }
 0x487   : > { %6942 = vperm.xlu1 %10620, %v6936_v59   ;;  %11177 = vrot.lane.b32.xlu0 %v12516_v22, %s11482_s26 }
 0x488   : > { %10023 = vmatprep.subr.bf16.mxu0 %v10022_v0  ;;  %v4782_v27 = vsel %vm393_vm0, %v10919_v63, %v10920_v58 }
 0x489   : > { %10025 = vmatpush1.bf16.msra.mxu0 %v10024_v53  ;;  %v10928_v1 = vpop.permute.xlu0 %10927  ;;  %v10923_v3 = vpop.permute.xlu1 %10922 }
 0x48a   : > { %v10930_v9 = vunpack.i.h.bf16 %v10928_v1  ;;  %v10929_v18 = vunpack.i.l.bf16 %v10928_v1  ;;  %v10925_v5 = vunpack.i.h.bf16 %v10923_v3  ;;  %v10924_v6 = vunpack.i.l.bf16 %v10923_v3 }
 0x48b   : > { %6952 = vperm.xlu1 %10620, %v6938_v57   ;;  %6947 = vperm.xlu0 %10619, %v6937_v56  }
 0x48c   : > { %v4781_v22 = vsel %vm393_vm0, %v10929_v18, %v10919_v63  ;;  %v4784_v31 = vsel %vm393_vm0, %v10930_v9, %v10924_v6  ;;  %v4785_v43 = vsel %vm393_vm0, %v10924_v6, %v10925_v5 }
 0x48d   : > { %v10026_v45 = vpack.c.bf16 %v4785_v43, %v4782_v27  ;;  %v10028_v46 = vpack.c.bf16 %v4784_v31, %v4781_v22 }
 0x48f   : > { %6957 = vperm.xlu0 %10619, %v6939_v15   ;;  %10027 = vmatprep.subr.bf16.mxu0 %v10026_v45 }
 0x490   : > { %10029 = vmatpush1.bf16.msra.mxu0 %v10028_v46 }
 0x493   : > { %9092 = vmatmul.mubr.msk.f32.vlgmr.msra.gmra.mrb[8].mxu0 %vm2504_vm12, %v9088_v40 }
 0x494   : > { %4881 = vmatprep.mubr.f32.mxu0 %v12646_v32 }
 0x495   : > { %v10933_v7 = vpop.permute.xlu1 %10932 }
 0x496   : > { %v10935_v8 = vunpack.i.h.bf16 %v10933_v7  ;;  %v10934_v12 = vunpack.i.l.bf16 %v10933_v7 }
 0x497   : > { %9093 = vmatmul.mubr.msk.f32.gmra.mrb[10].mxu0 %vm2504_vm12, %v9089_v47 }
 0x498   : > { %v4777_v16 = vsel %vm393_vm0, %v10910_v29, %v10934_v12  ;;  %v4780_v17 = vsel %vm393_vm0, %v10915_v37, %v10935_v8  ;;  %4887 = vmatprep.mubr.f32.mxu0 %v12646_v32  ;;  %v9091_v37 = vld [vmem:[%s13350_s6 + $0x38] sm:$0xff] }
 0x499   : > { %v10938_v20 = vpop.permute.xlu1 %10937  ;;  %v10943_v21 = vpop.permute.xlu0 %10942  ;;  %v10030_v23 = vpack.c.bf16 %v4780_v17, %v4777_v16 }
 0x49a   : > { %v10945_v24 = vunpack.i.h.bf16 %v10943_v21  ;;  %v10944_v25 = vunpack.i.l.bf16 %v10943_v21  ;;  %v10940_v28 = vunpack.i.h.bf16 %v10938_v20  ;;  %v10939_v33 = vunpack.i.l.bf16 %v10938_v20 }
 0x49b   : > { %10031 = vmatprep.subr.bf16.mxu0 %v10030_v23  ;;  %9094 = vmatmul.mubr.msk.f32.gmra.mrb[12].mxu0 %vm2504_vm12, %v9090_v19 }
 0x49c   : > { %10033 = vmatpush3.bf16.msra.mxu0 %v10030_v23  ;;  %v4783_v29 = vsel %vm393_vm0, %v10920_v58, %v10944_v25  ;;  %v4786_v35 = vsel %vm393_vm0, %v10925_v5, %v10945_v24  ;;  %4893 = vmatprep.mubr.f32.mxu0 %v12646_v32  ;;  %v5018_v0 = vsel %vm599_vm2, %v10939_v33, %v10940_v28  ;;  %v4718_v25 = vld [vmem:[%s13350_s6] sm:$0xff] }
 0x49d   : > { %v10953_v38 = vpop.permute.xlu1 %10952  ;;  %v10948_v42 = vpop.permute.xlu0 %10947  ;;  %v10034_v59 = vpack.c.bf16 %v4786_v35, %v4783_v29 }
 0x49e   : > { %v10955_v44 = vunpack.i.h.bf16 %v10953_v38  ;;  %v10954_v49 = vunpack.i.l.bf16 %v10953_v38  ;;  %v10950_v51 = vunpack.i.h.bf16 %v10948_v42  ;;  %v10949_v52 = vunpack.i.l.bf16 %v10948_v42 }
 0x49f   : > { %10035 = vmatprep.subr.bf16.mxu0 %v10034_v59  ;;  %9095 = vmatmul.mubr.msk.f32.gmra.mrb[14].mxu0 %vm2504_vm12, %v9091_v37 }
 0x4a0   : > { %v5017_v53 = vsel %vm599_vm2, %v10954_v49, %v10939_v33  ;;  %v5020_v57 = vsel %vm599_vm2, %v10955_v44, %v10949_v52  ;;  %10037 = vmatpush3.bf16.msra.mxu0 %v10034_v59  ;;  %v5021_v56 = vsel %vm599_vm2, %v10949_v52, %v10950_v51  ;;  %9661 = vmatprep.mubr.msk.f32.mxu0 %vm2504_vm12, %v9088_v40  ;;  %v4719_v49 = vld [vmem:[%s13350_s6 + $0x8] sm:$0xff] }
 0x4a1   : > { %v10963_v58 = vpop.permute.xlu1 %10962  ;;  %v10958_v63 = vpop.permute.xlu0 %10957  ;;  %v10038_v1 = vpack.c.bf16 %v5021_v56, %v5018_v0  ;;  %v10040_v3 = vpack.c.bf16 %v5020_v57, %v5017_v53  ;;  %v4720_v56 = vld [vmem:[%s13350_s6 + $0x10] sm:$0xff] }
 0x4a2   : > { %v10965_v9 = vunpack.i.h.bf16 %v10963_v58  ;;  %v10964_v18 = vunpack.i.l.bf16 %v10963_v58  ;;  %v10960_v5 = vunpack.i.h.bf16 %v10958_v63  ;;  %v10959_v6 = vunpack.i.l.bf16 %v10958_v63 }
 0x4a3   : > { %10039 = vmatprep.subr.bf16.mxu0 %v10038_v1  ;;  %9662 = vmatmul.mubr.msk.f32.vlgmr.msra.gmra.mrb[16].mxu0 %vm2504_vm12, %v9089_v47 }
 0x4a4   : > { %10041 = vmatpush1.bf16.msra.mxu0 %v10040_v3  ;;  %v5024_v15 = vsel %vm599_vm2, %v10959_v6, %v10960_v5  ;;  %v5027_v22 = vsel %vm599_vm2, %v10964_v18, %v10965_v9  ;;  %9664 = vmatprep.mubr.msk.f32.mxu0 %vm2504_vm12, %v9090_v19 }
 0x4a5   : > { %v10973_v31 = vpop.permute.xlu1 %10972  ;;  %v10968_v27 = vpop.permute.xlu0 %10967  ;;  %v10042_v43 = vpack.c.bf16 %v5027_v22, %v5024_v15 }
 0x4a6   : > { %v10975_v45 = vunpack.i.h.bf16 %v10973_v31  ;;  %v10974_v46 = vunpack.i.l.bf16 %v10973_v31  ;;  %v10970_v40 = vunpack.i.h.bf16 %v10968_v27  ;;  %v10969_v7 = vunpack.i.l.bf16 %v10968_v27 }
 0x4a7   : > { %10043 = vmatprep.subr.bf16.mxu0 %v10042_v43  ;;  %9665 = vmatmul.mubr.msk.f32.gmra.mrb[18].mxu0 %vm2504_vm12, %v9091_v37 }
 0x4a8   : > { %v5026_v8 = vsel %vm599_vm2, %v10970_v40, %v10964_v18  ;;  %v5023_v47 = vsel %vm599_vm2, %v10969_v7, %v10959_v6  ;;  %v5019_v12 = vsel %vm599_vm2, %v10940_v28, %v10974_v46  ;;  %v5022_v16 = vsel %vm599_vm2, %v10950_v51, %v10975_v45  ;;  %5117 = vmatprep.mubr.f32.mxu0 %v12646_v32  ;;  %v4721_v6 = vld [vmem:[%s13350_s6 + $0x18] sm:$0xff] }
 0x4a9   : > { %v12682_v17 = vpop.permute.xlu1 %10977  ;;  %v10983_v19 = vpop.permute.xlu0 %10982  ;;  %v10044_v20 = vpack.c.bf16 %v5026_v8, %v5023_v47  ;;  %v10046_v21 = vpack.c.bf16 %v5022_v16, %v5019_v12 }
 0x4aa   : > { %v10985_v23 = vunpack.i.h.bf16 %v10983_v19  ;;  %v10984_v24 = vunpack.i.l.bf16 %v10983_v19  ;;  %v10980_v33 = vunpack.i.h.bf16 %v12682_v17  ;;  %v10979_v28 = vunpack.i.l.bf16 %v12682_v17 }
 0x4ab   : > { %10045 = vmatpush1.bf16.msra.mxu0 %v10044_v20 }
 0x4ac   : > { %10047 = vmatprep.subr.bf16.mxu0 %v10046_v21  ;;  %v5025_v29 = vsel %vm599_vm2, %v10960_v5, %v10984_v24  ;;  %v5028_v35 = vsel %vm599_vm2, %v10965_v9, %v10985_v23  ;;  %v5265_v51 = vsel %vm808_vm4, %v10979_v28, %v10980_v33 }
 0x4ad   : > { %v10993_v37 = vpop.permute.xlu1 %10992  ;;  %v10988_v38 = vpop.permute.xlu0 %10987  ;;  %v10050_v42 = vpack.c.bf16 %v5028_v35, %v5025_v29 }
 0x4ae   : > { %v10990_v59 = vunpack.i.h.bf16 %v10988_v38  ;;  %v10989_v44 = vunpack.i.l.bf16 %v10988_v38  ;;  %9100 = vmatmul.mubr.msk.f32.vlgmr.msra.gmra.mrb[8].mxu0 %vm2504_vm12, %v4718_v25  ;;  %v10995_v63 = vunpack.i.h.bf16 %v10993_v37  ;;  %v10994_v1 = vunpack.i.l.bf16 %v10993_v37 }
 0x4af   : > { %10049 = vmatpush3.bf16.msra.mxu0 %v10046_v21  ;;  %5123 = vmatprep.mubr.f32.mxu0 %v12646_v32 }
 0x4b0   : > { %10051 = vmatprep.subr.bf16.mxu0 %v10050_v42  ;;  %v5268_v52 = vsel %vm808_vm4, %v10989_v44, %v10990_v59  ;;  %v5264_v22 = vsel %vm808_vm4, %v10994_v1, %v10979_v28  ;;  %v5267_v31 = vsel %vm808_vm4, %v10995_v63, %v10989_v44  ;;  %v9110_v63 = vld [vmem:[%s13350_s6 + $0x50] sm:$0xff] }
 0x4b1   : > { %v10998_v0 = vpop.permute.xlu0 %10997  ;;  %v10054_v53 = vpack.c.bf16 %v5268_v52, %v5265_v51  ;;  %v11003_v57 = vpop.permute.xlu1 %11002  ;;  %v10056_v47 = vpack.c.bf16 %v5267_v31, %v5264_v22  ;;  %v9109_v52 = vld [vmem:[%s13350_s6 + $0x48] sm:$0xff]  ;;  %v9111_v22 = vld [vmem:[%s13350_s6 + $0x58] sm:$0xff] }
 0x4b2   : > { %9101 = vmatmul.mubr.msk.f32.gmra.mrb[10].mxu0 %vm2504_vm12, %v4719_v49  ;;  %v11005_v3 = vunpack.i.h.bf16 %v11003_v57  ;;  %v11004_v9 = vunpack.i.l.bf16 %v11003_v57  ;;  %v11000_v18 = vunpack.i.h.bf16 %v10998_v0  ;;  %v10999_v5 = vunpack.i.l.bf16 %v10998_v0 }
 0x4b3   : > { %10053 = vmatpush3.bf16.msra.mxu0 %v10050_v42  ;;  %5129 = vmatprep.mubr.f32.mxu0 %v12646_v32 }
 0x4b4   : > { %10055 = vmatprep.subr.bf16.mxu0 %v10054_v53  ;;  %v5271_v7 = vsel %vm808_vm4, %v10999_v5, %v11000_v18  ;;  %v5274_v8 = vsel %vm808_vm4, %v11004_v9, %v11005_v3 }
 0x4b5   : > { %v11008_v58 = vpop.permute.xlu0 %11007  ;;  %v11013_v15 = vpop.permute.xlu1 %11012  ;;  %v10058_v19 = vpack.c.bf16 %v5274_v8, %v5271_v7 }
 0x4b6   : > { %9102 = vmatmul.mubr.msk.f32.gmra.mrb[12].mxu0 %vm2504_vm12, %v4720_v56  ;;  %v11010_v27 = vunpack.i.h.bf16 %v11008_v58  ;;  %v11009_v43 = vunpack.i.l.bf16 %v11008_v58  ;;  %v11015_v46 = vunpack.i.h.bf16 %v11013_v15  ;;  %v11014_v40 = vunpack.i.l.bf16 %v11013_v15 }
 0x4b7   : > { %5135 = vmatprep.mubr.f32.mxu0 %v12646_v32 }
 0x4b8   : > { %v5273_v12 = vsel %vm808_vm4, %v11010_v27, %v11004_v9  ;;  %v5270_v16 = vsel %vm808_vm4, %v11009_v43, %v10999_v5  ;;  %v5266_v23 = vsel %vm808_vm4, %v10980_v33, %v11014_v40  ;;  %v5269_v24 = vsel %vm808_vm4, %v10990_v59, %v11015_v46  ;;  %v9108_v33 = vld [vmem:[%s13350_s6 + $0x40] sm:$0xff] }
 0x4b9   : > { %v11023_v45 = vpop.permute.xlu0 %11022  ;;  %v12716_v17 = vpop.permute.xlu1 %11017  ;;  %v10060_v28 = vpack.c.bf16 %v5273_v12, %v5270_v16  ;;  %v10062_v29 = vpack.c.bf16 %v5269_v24, %v5266_v23 }
 0x4ba   : > { %9103 = vmatmul.mubr.msk.f32.gmra.mrb[14].mxu0 %vm2504_vm12, %v4721_v6  ;;  %v11025_v20 = vunpack.i.h.bf16 %v11023_v45  ;;  %v11024_v21 = vunpack.i.l.bf16 %v11023_v45  ;;  %v11020_v44 = vunpack.i.h.bf16 %v12716_v17 }
 0x4bb   : > { %9675 = vmatprep.mubr.msk.f32.mxu0 %vm2504_vm12, %v4718_v25 }
 0x4bc   : > { %v5272_v38 = vsel %vm808_vm4, %v11000_v18, %v11024_v21  ;;  %v5275_v42 = vsel %vm808_vm4, %v11005_v3, %v11025_v20 }
 0x4bd   : > { %v12722_v25 = vpop.permute.xlu0 %11027  ;;  %v11033_v59 = vpop.permute.xlu1 %11032  ;;  %v10066_v51 = vpack.c.bf16 %v5275_v42, %v5272_v38  ;;  %v9121_v42 = vld [vmem:[%s13350_s6 + $0x68] sm:$0xff] }
 0x4be   : > { %9676 = vmatmul.mubr.msk.f32.vlgmr.msra.gmra.mrb[16].mxu0 %vm2504_vm12, %v4719_v49  ;;  %v11030_v35 = vunpack.i.h.bf16 %v12722_v25  ;;  %v11029_v37 = vunpack.i.l.bf16 %v12722_v25  ;;  %v11019_v49 = vunpack.i.l.bf16 %v12716_v17  ;;  %v11035_v1 = vunpack.i.h.bf16 %v11033_v59 }
 0x4bf   : > { %10057 = vmatpush1.bf16.msra.mxu0 %v10056_v47  ;;  %9678 = vmatprep.mubr.msk.f32.mxu0 %vm2504_vm12, %v4720_v56  ;;  %v11034_v3 = vunpack.i.l.bf16 %v11033_v59  ;;  %v9122_v59 = vld [vmem:[%s13350_s6 + $0x70] sm:$0xff] }
 0x4c0   : > { %10059 = vmatprep.subr.bf16.mxu0 %v10058_v19  ;;  %v5527_v0 = vsel %vm1029_vm5, %v11029_v37, %v11030_v35  ;;  %v5524_v57 = vsel %vm1029_vm5, %v11019_v49, %v11020_v44  ;;  %v5526_v43 = vsel %vm1029_vm5, %v11035_v1, %v11029_v37  ;;  %v9120_v37 = vld [vmem:[%s13350_s6 + $0x60] sm:$0xff] }
 0x4c1   : > { %v11038_v53 = vpop.permute.xlu0 %11037  ;;  %v11043_v56 = vpop.permute.xlu1 %11042  ;;  %v10070_v58 = vpack.c.bf16 %v5527_v0, %v5524_v57  ;;  %v5523_v27 = vsel %vm1029_vm5, %v11034_v3, %v11019_v49 }
 0x4c2   : > { %9679 = vmatmul.mubr.msk.f32.gmra.mrb[18].mxu0 %vm2504_vm12, %v4721_v6  ;;  %v11045_v18 = vunpack.i.h.bf16 %v11043_v56  ;;  %v11044_v5 = vunpack.i.l.bf16 %v11043_v56  ;;  %v11040_v6 = vunpack.i.h.bf16 %v11038_v53  ;;  %v11039_v15 = vunpack.i.l.bf16 %v11038_v53 }
 0x4c3   : > { %10061 = vmatpush1.bf16.msra.mxu0 %v10060_v28  ;;  %5364 = vmatprep.mubr.f32.mxu0 %v12646_v32  ;;  %v10072_v16 = vpack.c.bf16 %v5526_v43, %v5523_v27 }
 0x4c4   : > { %10063 = vmatprep.subr.bf16.mxu0 %v10062_v29  ;;  %v5530_v8 = vsel %vm1029_vm5, %v11039_v15, %v11040_v6  ;;  %v5533_v47 = vsel %vm1029_vm5, %v11044_v5, %v11045_v18 }
 0x4c5   : > { %v11048_v9 = vpop.permute.xlu0 %11047  ;;  %v11053_v31 = vpop.permute.xlu1 %11052  ;;  %v10074_v20 = vpack.c.bf16 %v5533_v47, %v5530_v8  ;;  %v9144_v47 = vld [vmem:[%s13350_s6 + $0xa0] sm:$0xff] }
 0x4c6   : > { %9112 = vmatmul.mubr.msk.f32.vlgmr.msra.gmra.mrb[8].mxu0 %vm2504_vm12, %v9108_v33  ;;  %v11050_v45 = vunpack.i.h.bf16 %v11048_v9  ;;  %v11049_v46 = vunpack.i.l.bf16 %v11048_v9  ;;  %v11055_v40 = vunpack.i.h.bf16 %v11053_v31  ;;  %v11054_v7 = vunpack.i.l.bf16 %v11053_v31 }
 0x4c7   : > { %10065 = vmatpush3.bf16.msra.mxu0 %v10062_v29  ;;  %5370 = vmatprep.mubr.f32.mxu0 %v12646_v32 }
 0x4c8   : > { %10067 = vmatprep.subr.bf16.mxu0 %v10066_v51  ;;  %v5532_v17 = vsel %vm1029_vm5, %v11050_v45, %v11044_v5  ;;  %v5529_v19 = vsel %vm1029_vm5, %v11049_v46, %v11039_v15  ;;  %v5525_v24 = vsel %vm1029_vm5, %v11020_v44, %v11054_v7  ;;  %v5528_v25 = vsel %vm1029_vm5, %v11030_v35, %v11055_v40  ;;  %v9123_v44 = vld [vmem:[%s13350_s6 + $0x78] sm:$0xff] }
 0x4c9   : > { %v11058_v12 = vpop.permute.xlu0 %11057  ;;  %v10076_v28 = vpack.c.bf16 %v5532_v17, %v5529_v19  ;;  %v10078_v29 = vpack.c.bf16 %v5528_v25, %v5525_v24  ;;  %v11063_v36 = vpop.permute.xlu1 %11062 }
 0x4ca   : > { %9113 = vmatmul.mubr.msk.f32.gmra.mrb[10].mxu0 %vm2504_vm12, %v9109_v52  ;;  %v11060_v21 = vunpack.i.h.bf16 %v11058_v12  ;;  %v11059_v23 = vunpack.i.l.bf16 %v11058_v12  ;;  %v11065_v48 = vunpack.i.h.bf16 %v11063_v36 }
 0x4cb   : > { %10069 = vmatpush3.bf16.msra.mxu0 %v10066_v51  ;;  %5376 = vmatprep.mubr.f32.mxu0 %v12646_v32 }
 0x4cc   : > { %10071 = vmatprep.subr.bf16.mxu0 %v10070_v58  ;;  %v5534_v38 = vsel %vm1029_vm5, %v11045_v18, %v11060_v21 }
 0x4cd   : > { %v11068_v50 = vpop.permute.xlu0 %11067  ;;  %v11073_v61 = vpop.permute.xlu1 %11072 }
 0x4ce   : > { %9114 = vmatmul.mubr.msk.f32.gmra.mrb[12].mxu0 %vm2504_vm12, %v9110_v63  ;;  %v11070_v49 = vunpack.i.h.bf16 %v11068_v50  ;;  %v11069_v51 = vunpack.i.l.bf16 %v11068_v50  ;;  %v11075_v14 = vunpack.i.h.bf16 %v11073_v61 }
 0x4cf   : > { %5382 = vmatprep.mubr.f32.mxu0 %v12646_v32 }
 0x4d0   : > { %v5980_v26 = vsel %vm1457_vm6, %v11069_v51, %v11070_v49  ;;  %v5979_v3 = vsel %vm1457_vm6, %v11075_v14, %v11069_v51  ;;  %v10110_v40 = vpack.c.bf16 %v11070_v49, %v11065_v48  ;;  %v9156_v14 = vld [vmem:[%s13350_s6 + $0xc0] sm:$0xff] }
 0x4d1   : > { %v11078_v13 = vpop.permute.xlu1 %11077 }
 0x4d2   : > { %9115 = vmatmul.mubr.msk.f32.gmra.mrb[14].mxu0 %vm2504_vm12, %v9111_v22  ;;  %v11080_v0 = vunpack.i.h.bf16 %v11078_v13  ;;  %v11079_v53 = vunpack.i.l.bf16 %v11078_v13 }
 0x4d3   : > { %9689 = vmatprep.mubr.msk.f32.mxu0 %vm2504_vm12, %v9108_v33  ;;  %v5531_v33 = vsel %vm1029_vm5, %v11040_v6, %v11059_v23 }
 0x4d4   : > { %v10082_v35 = vpack.c.bf16 %v5534_v38, %v5531_v33  ;;  %v5984_v6 = vsel %vm1457_vm6, %v11079_v53, %v11080_v0 }
 0x4d5   : > { %v11093_v43 = vpop.permute.xlu1 %11092 }
 0x4d6   : > { %9690 = vmatmul.mubr.msk.f32.vlgmr.msra.gmra.mrb[16].mxu0 %vm2504_vm12, %v9109_v52  ;;  %v11074_v52 = vunpack.i.l.bf16 %v11073_v61  ;;  %v11095_v12 = vunpack.i.h.bf16 %v11093_v43 }
 0x4d7   : > { %10073 = vmatpush1.bf16.msra.mxu0 %v10072_v16  ;;  %9692 = vmatprep.mubr.msk.f32.mxu0 %vm2504_vm12, %v9110_v63  ;;  %v9135_v63 = vld [vmem:[%s13350_s6 + $0x98] sm:$0xff]  ;;  %v11094_v16 = vunpack.i.l.bf16 %v11093_v43 }
 0x4d8   : > { %10075 = vmatprep.subr.bf16.mxu0 %v10074_v20  ;;  %v9145_v20 = vld [vmem:[%s13350_s6 + $0xa8] sm:$0xff] }
 0x4d9   : > { %v11103_v19 = vpop.permute.xlu1 %11102  ;;  %v6225_v24 = vsel %vm1675_vm7, %v11094_v16, %v11095_v12 }
 0x4da   : > { %9693 = vmatmul.mubr.msk.f32.gmra.mrb[18].mxu0 %vm2504_vm12, %v9111_v22  ;;  %v11104_v33 = vunpack.i.l.bf16 %v11103_v19 }
 0x4db   : > { %10077 = vmatpush1.bf16.msra.mxu0 %v10076_v28  ;;  %5623 = vmatprep.mubr.f32.mxu0 %v12646_v32  ;;  %v9146_v28 = vld [vmem:[%s13350_s6 + $0xb0] sm:$0xff] }
 0x4dc   : > { %10079 = vmatprep.subr.bf16.mxu0 %v10078_v29  ;;  %v6224_v50 = vsel %vm1675_vm7, %v11104_v33, %v11094_v16 }
 0x4de   : > { %9124 = vmatmul.mubr.msk.f32.vlgmr.msra.gmra.mrb[8].mxu0 %vm2504_vm12, %v9120_v37 }
 0x4df   : > { %10081 = vmatpush3.bf16.msra.mxu0 %v10078_v29  ;;  %5629 = vmatprep.mubr.f32.mxu0 %v12646_v32  ;;  %v11108_v29 = vpop.permute.xlu1 %11107 }
 0x4e0   : > { %10083 = vmatprep.subr.bf16.mxu0 %v10082_v35  ;;  %v11110_v38 = vunpack.i.h.bf16 %v11108_v29 }
 0x4e2   : > { %9125 = vmatmul.mubr.msk.f32.gmra.mrb[10].mxu0 %vm2504_vm12, %v9121_v42 }
 0x4e3   : > { %10085 = vmatpush3.bf16.msra.mxu0 %v10082_v35  ;;  %5635 = vmatprep.mubr.f32.mxu0 %v12646_v32  ;;  %v11109_v35 = vunpack.i.l.bf16 %v11108_v29 }
 0x4e4   : > { %10087 = vmatprep.subr.bf16.mxu0 %v10086_v60  ;;  %v10094_v60 = vpack.c.bf16 %v12535_v10, %v12537_v11  ;;  %v9134_v11 = vld [vmem:[%s13350_s6 + $0x90] sm:$0xff] }
 0x4e6   : > { %9126 = vmatmul.mubr.msk.f32.gmra.mrb[12].mxu0 %vm2504_vm12, %v9122_v59 }
 0x4e7   : > { %5641 = vmatprep.mubr.f32.mxu0 %v12646_v32 }
 0x4ea   : > { %9127 = vmatmul.mubr.msk.f32.gmra.mrb[14].mxu0 %vm2504_vm12, %v9123_v44 }
 0x4eb   : > { %9703 = vmatprep.mubr.msk.f32.mxu0 %vm2504_vm12, %v9120_v37  ;;  %v11105_v37 = vunpack.i.h.bf16 %v11103_v19 }
 0x4ee   : > { %9704 = vmatmul.mubr.msk.f32.vlgmr.msra.gmra.mrb[16].mxu0 %vm2504_vm12, %v9121_v42 }
 0x4ef   : > { %10089 = vmatpush1.bf16.msra.mxu0 %v10088_v54  ;;  %9706 = vmatprep.mubr.msk.f32.mxu0 %vm2504_vm12, %v9122_v59  ;;  %v11064_v54 = vunpack.i.l.bf16 %v11063_v36  ;;  %v9147_v36 = vld [vmem:[%s13350_s6 + $0xb8] sm:$0xff] }
 0x4f0   : > { %10091 = vmatprep.subr.bf16.mxu0 %v10090_v39 }
 0x4f1   : > { %v5978_v39 = vsel %vm1457_vm6, %v11064_v54, %v11065_v48  ;;  %v5977_v1 = vsel %vm1457_vm6, %v11074_v52, %v11064_v54  ;;  %v6231_v48 = vsel %vm1675_vm7, %v11109_v35, %v11110_v38 }
 0x4f2   : > { %9707 = vmatmul.mubr.msk.f32.gmra.mrb[18].mxu0 %vm2504_vm12, %v9123_v44  ;;  %v10102_v10 = vpack.c.bf16 %v5980_v26, %v5978_v39  ;;  %v10104_v15 = vpack.c.bf16 %v5979_v3, %v5977_v1  ;;  %v11123_v26 = vpop.permute.xlu1 %11122 }
 0x4f3   : > { %10093 = vmatpush1.bf16.msra.mxu0 %v10092_v30  ;;  %5826 = vmatprep.mubr.f32.mxu0 %v12646_v32  ;;  %v11083_v30 = vpop.permute.xlu0 %11082  ;;  %v11125_v52 = vunpack.i.h.bf16 %v11123_v26 }
 0x4f4   : > { %10095 = vmatprep.subr.bf16.mxu0 %v10094_v60  ;;  %v11085_v57 = vunpack.i.h.bf16 %v11083_v30  ;;  %v11084_v56 = vunpack.i.l.bf16 %v11083_v30 }
 0x4f6   : > { %9136 = vmatmul.mubr.msk.f32.vlgmr.msra.gmra.mrb[8].mxu0 %vm2504_vm12, %v9132_v34  ;;  %v5982_v5 = vsel %vm1457_vm6, %v11084_v56, %v11085_v57  ;;  %v10114_v17 = vpack.c.bf16 %v11080_v0, %v11085_v57  ;;  %v11124_v0 = vunpack.i.l.bf16 %v11123_v26  ;;  %v11133_v57 = vpop.permute.xlu1 %11132 }
 0x4f7   : > { %10097 = vmatpush3.bf16.msra.mxu0 %v10094_v60  ;;  %5832 = vmatprep.mubr.f32.mxu0 %v12646_v32  ;;  %v11088_v58 = vpop.permute.xlu0 %11087  ;;  %v10106_v27 = vpack.c.bf16 %v5984_v6, %v5982_v5  ;;  %v11135_v5 = vunpack.i.h.bf16 %v11133_v57  ;;  %v11134_v6 = vunpack.i.l.bf16 %v11133_v57 }
 0x4f8   : > { %10099 = vmatprep.subr.bf16.mxu0 %v10098_v4  ;;  %v11090_v9 = vunpack.i.h.bf16 %v11088_v58  ;;  %v11089_v18 = vunpack.i.l.bf16 %v11088_v58  ;;  %v6472_v1 = vsel %vm1893_vm8, %v11124_v0, %v11125_v52 }
 0x4fa   : > { %9137 = vmatmul.mubr.msk.f32.gmra.mrb[10].mxu0 %vm2504_vm12, %v9133_v55  ;;  %v5983_v22 = vsel %vm1457_vm6, %v11090_v9, %v11079_v53  ;;  %v5981_v31 = vsel %vm1457_vm6, %v11089_v18, %v11084_v56  ;;  %v9157_v56 = vld [vmem:[%s13350_s6 + $0xc8] sm:$0xff]  ;;  %v9158_v9 = vld [vmem:[%s13350_s6 + $0xd0] sm:$0xff]  ;;  %v11138_v18 = vpop.permute.xlu1 %11137 }
 0x4fb   : > { %10101 = vmatpush3.bf16.msra.mxu0 %v10098_v4  ;;  %5838 = vmatprep.mubr.f32.mxu0 %v12646_v32  ;;  %v11098_v45 = vpop.permute.xlu0 %11097  ;;  %v10108_v46 = vpack.c.bf16 %v5983_v22, %v5981_v31  ;;  %v11139_v22 = vunpack.i.l.bf16 %v11138_v18 }
 0x4fc   : > { %10103 = vmatprep.subr.bf16.mxu0 %v10102_v10  ;;  %v11100_v7 = vunpack.i.h.bf16 %v11098_v45  ;;  %v11099_v8 = vunpack.i.l.bf16 %v11098_v45  ;;  %v9159_v45 = vld [vmem:[%s13350_s6 + $0xd8] sm:$0xff] }
 0x4fe   : > { %9138 = vmatmul.mubr.msk.f32.gmra.mrb[12].mxu0 %vm2504_vm12, %v9134_v11  ;;  %v6227_v21 = vsel %vm1675_vm7, %v11099_v8, %v11100_v7  ;;  %v6226_v60 = vsel %vm1675_vm7, %v11105_v37, %v11099_v8  ;;  %v10126_v10 = vpack.c.bf16 %v11100_v7, %v11095_v12  ;;  %v9168_v37 = vld [vmem:[%s13350_s6 + $0xe0] sm:$0xff] }
 0x4ff   : > { %5844 = vmatprep.mubr.f32.mxu0 %v12646_v32  ;;  %v11113_v23 = vpop.permute.xlu0 %11112  ;;  %v10118_v25 = vpack.c.bf16 %v6227_v21, %v6225_v24  ;;  %v10120_v54 = vpack.c.bf16 %v6226_v60, %v6224_v50  ;;  %v11153_v21 = vpop.permute.xlu1 %11152 }
 0x500   : > { %v11115_v42 = vunpack.i.h.bf16 %v11113_v23  ;;  %v11114_v59 = vunpack.i.l.bf16 %v11113_v23  ;;  %v11155_v33 = vunpack.i.h.bf16 %v11153_v21 }
 0x502   : > { %9139 = vmatmul.mubr.msk.f32.gmra.mrb[14].mxu0 %vm2504_vm12, %v9135_v63  ;;  %v10130_v53 = vpack.c.bf16 %v11110_v38, %v11115_v42  ;;  %v11154_v38 = vunpack.i.l.bf16 %v11153_v21 }
 0x503   : > { %9717 = vmatprep.mubr.msk.f32.mxu0 %vm2504_vm12, %v9132_v34  ;;  %v11118_v44 = vpop.permute.xlu0 %11117  ;;  %v6229_v34 = vsel %vm1675_vm7, %v11114_v59, %v11115_v42  ;;  %v11163_v42 = vpop.permute.xlu1 %11162 }
 0x504   : > { %v11120_v49 = vunpack.i.h.bf16 %v11118_v44  ;;  %v11119_v51 = vunpack.i.l.bf16 %v11118_v44  ;;  %v6719_v50 = vsel %vm2111_vm10, %v11154_v38, %v11155_v33 }
 0x506   : > { %9718 = vmatmul.mubr.msk.f32.vlgmr.msra.gmra.mrb[16].mxu0 %vm2504_vm12, %v9133_v55  ;;  %v6230_v61 = vsel %vm1675_vm7, %v11120_v49, %v11109_v35  ;;  %v6228_v4 = vsel %vm1675_vm7, %v11119_v51, %v11114_v59  ;;  %v10122_v55 = vpack.c.bf16 %v6231_v48, %v6229_v34  ;;  %v9169_v59 = vld [vmem:[%s13350_s6 + $0xe8] sm:$0xff]  ;;  %v9170_v49 = vld [vmem:[%s13350_s6 + $0xf0] sm:$0xff]  ;;  %v11165_v34 = vunpack.i.h.bf16 %v11163_v42 }
 0x507   : > { %10105 = vmatpush1.bf16.msra.mxu0 %v10104_v15  ;;  %9720 = vmatprep.mubr.msk.f32.mxu0 %vm2504_vm12, %v9134_v11  ;;  %v11128_v30 = vpop.permute.xlu0 %11127  ;;  %v10124_v39 = vpack.c.bf16 %v6230_v61, %v6228_v4  ;;  %v11140_v15 = vunpack.i.h.bf16 %v11138_v18  ;;  %v11168_v51 = vpop.permute.xlu1 %11167  ;;  %v11164_v48 = vunpack.i.l.bf16 %v11163_v42  ;;  %v9182_v18 = vld [vmem:[%s13350_s6 + $0x110] sm:$0xff] }
 0x508   : > { %10107 = vmatprep.subr.bf16.mxu0 %v10106_v27  ;;  %v11130_v11 = vunpack.i.h.bf16 %v11128_v30  ;;  %v11129_v13 = vunpack.i.l.bf16 %v11128_v30  ;;  %v11169_v61 = vunpack.i.l.bf16 %v11168_v51  ;;  %v9171_v30 = vld [vmem:[%s13350_s6 + $0xf8] sm:$0xff] }
 0x509   : > { %v6478_v12 = vsel %vm1893_vm8, %v11139_v22, %v11140_v15 }
 0x50a   : > { %9721 = vmatmul.mubr.msk.f32.gmra.mrb[18].mxu0 %vm2504_vm12, %v9135_v63  ;;  %v6474_v58 = vsel %vm1893_vm8, %v11129_v13, %v11130_v11 }
 0x50b   : > { %10109 = vmatpush1.bf16.msra.mxu0 %v10108_v46  ;;  %6073 = vmatprep.mubr.f32.mxu0 %v12646_v32  ;;  %v11143_v63 = vpop.permute.xlu0 %11142  ;;  %v10134_v3 = vpack.c.bf16 %v6474_v58, %v6472_v1  ;;  %v6471_v46 = vsel %vm1893_vm8, %v11134_v6, %v11124_v0  ;;  %v9180_v1 = vld [vmem:[%s13350_s6 + $0x100] sm:$0xff]  ;;  %v12961_v6 = vpack.i.bf16 %v12646_v32, %v12646_v32 }
 0x50c   : > { %10111 = vmatprep.subr.bf16.mxu0 %v10110_v40  ;;  %v11145_v31 = vunpack.i.h.bf16 %v11143_v63  ;;  %v11144_v27 = vunpack.i.l.bf16 %v11143_v63 }
 0x50d   : > { %11182 = vrot.lane.b32.xlu1 %v12961_v6, %s11475_s19  ;;  %11187 = vrot.lane.b32.xlu0 %v12961_v6, %s11475_s19 }
 0x50e   : > { %9148 = vmatmul.mubr.msk.f32.vlgmr.msra.gmra.mrb[8].mxu0 %vm2504_vm12, %v9144_v47  ;;  %v10146_v35 = vpack.c.bf16 %v11140_v15, %v11145_v31  ;;  %v11484_v15 = vmov 0.0|0.0  }
 0x50f   : > { %10113 = vmatpush3.bf16.msra.mxu0 %v10110_v40  ;;  %6079 = vmatprep.mubr.f32.mxu0 %v12646_v32  ;;  %v11148_v43 = vpop.permute.xlu0 %11147  ;;  %v6473_v40 = vsel %vm1893_vm8, %v11135_v5, %v11129_v13  ;;  %v9183_v5 = vld [vmem:[%s13350_s6 + $0x118] sm:$0xff] }
 0x510   : > { %10115 = vmatprep.subr.bf16.mxu0 %v10114_v17  ;;  %v11150_v7 = vunpack.i.h.bf16 %v11148_v43  ;;  %v11149_v8 = vunpack.i.l.bf16 %v11148_v43  ;;  %v10136_v16 = vpack.c.bf16 %v6473_v40, %v6471_v46 }
 0x512   : > { %9149 = vmatmul.mubr.msk.f32.gmra.mrb[10].mxu0 %vm2504_vm12, %v9145_v20  ;;  %v6475_v19 = vsel %vm1893_vm8, %v11149_v8, %v11144_v27 }
 0x513   : > { %10117 = vmatpush3.bf16.msra.mxu0 %v10114_v17  ;;  %6085 = vmatprep.mubr.f32.mxu0 %v12646_v32  ;;  %v6477_v17 = vsel %vm1893_vm8, %v11150_v7, %v11139_v22  ;;  %v11158_v23 = vpop.permute.xlu0 %11157  ;;  %v6943_v22 = vpop.permute.xlu1 %6942 }
 0x514   : > { %10119 = vmatprep.subr.bf16.mxu0 %v10118_v25  ;;  %v10140_v24 = vpack.c.bf16 %v6477_v17, %v6475_v19  ;;  %v10142_v25 = vpack.c.bf16 %v11130_v11, %v11125_v52  ;;  %v11159_v29 = vunpack.i.l.bf16 %v11158_v23 }
 0x516   : > { %9150 = vmatmul.mubr.msk.f32.gmra.mrb[12].mxu0 %vm2504_vm12, %v9146_v28 }
 0x517   : > { %6091 = vmatprep.mubr.f32.mxu0 %v12646_v32 }
 0x51a   : > { %9151 = vmatmul.mubr.msk.f32.gmra.mrb[14].mxu0 %vm2504_vm12, %v9147_v36 }
 0x51b   : > { %9731 = vmatprep.mubr.msk.f32.mxu0 %vm2504_vm12, %v9144_v47  ;;  %v6476_v47 = vsel %vm1893_vm8, %v11144_v27, %v11145_v31 }
 0x51e   : > { %9732 = vmatmul.mubr.msk.f32.vlgmr.msra.gmra.mrb[16].mxu0 %vm2504_vm12, %v9145_v20  ;;  %v10138_v20 = vpack.c.bf16 %v6478_v12, %v6476_v47 }
 0x51f   : > { %10121 = vmatpush1.bf16.msra.mxu0 %v10120_v54  ;;  %9734 = vmatprep.mubr.msk.f32.mxu0 %vm2504_vm12, %v9146_v28  ;;  %v11160_v28 = vunpack.i.h.bf16 %v11158_v23  ;;  %v11170_v54 = vunpack.i.h.bf16 %v11168_v51 }
 0x520   : > { %10123 = vmatprep.subr.bf16.mxu0 %v10122_v55 }
 0x521   : > { %v6721_v44 = vsel %vm2111_vm10, %v11159_v29, %v11160_v28  ;;  %v6725_v52 = vsel %vm2111_vm10, %v11169_v61, %v11170_v54  ;;  %v10158_v63 = vpack.c.bf16 %v11160_v28, %v11155_v33 }
 0x522   : > { %9735 = vmatmul.mubr.msk.f32.gmra.mrb[18].mxu0 %vm2504_vm12, %v9147_v36  ;;  %v11173_v36 = vpop.permute.xlu0 %11172  ;;  %v10150_v60 = vpack.c.bf16 %v6721_v44, %v6719_v50 }
 0x523   : > { %10125 = vmatpush1.bf16.msra.mxu0 %v10124_v39  ;;  %6320 = vmatprep.mubr.f32.mxu0 %v12646_v32  ;;  %v11175_v4 = vunpack.i.h.bf16 %v11173_v36  ;;  %v11174_v55 = vunpack.i.l.bf16 %v11173_v36  ;;  %v6718_v39 = vsel %vm2111_vm10, %v11164_v48, %v11154_v38 }
 0x524   : > { %10127 = vmatprep.subr.bf16.mxu0 %v10126_v10 }
 0x526   : > { %9160 = vmatmul.mubr.msk.f32.vlgmr.msra.gmra.mrb[8].mxu0 %vm2504_vm12, %v9156_v14  ;;  %v11178_v26 = vpop.permute.xlu0 %11177 }
 0x527   : > { %10129 = vmatpush3.bf16.msra.mxu0 %v10126_v10  ;;  %6326 = vmatprep.mubr.f32.mxu0 %v12646_v32  ;;  %v6720_v10 = vsel %vm2111_vm10, %v11165_v34, %v11159_v29  ;;  %v11180_v11 = vunpack.i.h.bf16 %v11178_v26  ;;  %v11179_v13 = vunpack.i.l.bf16 %v11178_v26 }
 0x528   : > { %10131 = vmatprep.subr.bf16.mxu0 %v10130_v53  ;;  %v10152_v0 = vpack.c.bf16 %v6720_v10, %v6718_v39 }
 0x529   : > { %v6722_v57 = vsel %vm2111_vm10, %v11179_v13, %v11174_v55 }
 0x52a   : > { %9161 = vmatmul.mubr.msk.f32.gmra.mrb[10].mxu0 %vm2504_vm12, %v9157_v56  ;;  %v6948_v40 = vpop.permute.xlu0 %6947 }
 0x52b   : > { %10133 = vmatpush3.bf16.msra.mxu0 %v10130_v53  ;;  %6332 = vmatprep.mubr.f32.mxu0 %v12646_v32  ;;  %v6724_v53 = vsel %vm2111_vm10, %v11180_v11, %v11169_v61 }
 0x52c   : > { %10135 = vmatprep.subr.bf16.mxu0 %v10134_v3  ;;  %v10156_v58 = vpack.c.bf16 %v6724_v53, %v6722_v57  ;;  %v10162_v3 = vpack.c.bf16 %v11170_v54, %v11175_v4 }
 0x52e   : > { %9162 = vmatmul.mubr.msk.f32.gmra.mrb[12].mxu0 %vm2504_vm12, %v9158_v9 }
 0x52f   : > { %6338 = vmatprep.mubr.f32.mxu0 %v12646_v32 }
 0x532   : > { %9163 = vmatmul.mubr.msk.f32.gmra.mrb[14].mxu0 %vm2504_vm12, %v9159_v45 }
 0x533   : > { %9745 = vmatprep.mubr.msk.f32.mxu0 %vm2504_vm12, %v9156_v14  ;;  %v6723_v14 = vsel %vm2111_vm10, %v11174_v55, %v11175_v4 }
 0x536   : > { %9746 = vmatmul.mubr.msk.f32.vlgmr.msra.gmra.mrb[16].mxu0 %vm2504_vm12, %v9157_v56  ;;  %v10154_v56 = vpack.c.bf16 %v6725_v52, %v6723_v14 }
 0x537   : > { %10137 = vmatpush1.bf16.msra.mxu0 %v10136_v16  ;;  %9748 = vmatprep.mubr.msk.f32.mxu0 %vm2504_vm12, %v9158_v9  ;;  %v9181_v9 = vld [vmem:[%s13350_s6 + $0x108] sm:$0xff] }
 0x538   : > { %10139 = vmatprep.subr.bf16.mxu0 %v10138_v20  ;;  %v6953_v20 = vpop.permute.xlu1 %6952 }
 0x53a   : > { %9749 = vmatmul.mubr.msk.f32.gmra.mrb[18].mxu0 %vm2504_vm12, %v9159_v45 }
 0x53b   : > { %10141 = vmatpush1.bf16.msra.mxu0 %v10140_v24  ;;  %6567 = vmatprep.mubr.f32.mxu0 %v12646_v32 }
 0x53c   : > { %10143 = vmatprep.subr.bf16.mxu0 %v10142_v25 }
 0x53e   : > { %9172 = vmatmul.mubr.msk.f32.vlgmr.msra.gmra.mrb[8].mxu0 %vm2504_vm12, %v9168_v37 }
 0x53f   : > { %10145 = vmatpush3.bf16.msra.mxu0 %v10142_v25  ;;  %6573 = vmatprep.mubr.f32.mxu0 %v12646_v32 }
 0x540   : > { %10147 = vmatprep.subr.bf16.mxu0 %v10146_v35 }
 0x542   : > { %9173 = vmatmul.mubr.msk.f32.gmra.mrb[10].mxu0 %vm2504_vm12, %v9169_v59 }
 0x543   : > { %10149 = vmatpush3.bf16.msra.mxu0 %v10146_v35  ;;  %6579 = vmatprep.mubr.f32.mxu0 %v12646_v32 }
 0x544   : > { %10151 = vmatprep.subr.bf16.mxu0 %v10150_v60 }
 0x546   : > { %9174 = vmatmul.mubr.msk.f32.gmra.mrb[12].mxu0 %vm2504_vm12, %v9170_v49 }
 0x547   : > { %6585 = vmatprep.mubr.f32.mxu0 %v12646_v32 }
 0x54a   : > { %9175 = vmatmul.mubr.msk.f32.gmra.mrb[14].mxu0 %vm2504_vm12, %v9171_v30 }
 0x54b   : > { %9759 = vmatprep.mubr.msk.f32.mxu0 %vm2504_vm12, %v9168_v37 }
 0x54e   : > { %9760 = vmatmul.mubr.msk.f32.vlgmr.msra.gmra.mrb[16].mxu0 %vm2504_vm12, %v9169_v59  ;;  %v6958_v59 = vpop.permute.xlu0 %6957 }
 0x54f   : > { %10153 = vmatpush1.bf16.msra.mxu0 %v10152_v0  ;;  %9762 = vmatprep.mubr.msk.f32.mxu0 %vm2504_vm12, %v9170_v49 }
 0x550   : > { %10155 = vmatprep.subr.bf16.mxu0 %v10154_v56 }
 0x552   : > { %9763 = vmatmul.mubr.msk.f32.gmra.mrb[18].mxu0 %vm2504_vm12, %v9171_v30 }
 0x553   : > { %10157 = vmatpush1.bf16.msra.mxu0 %v10156_v58  ;;  %6814 = vmatprep.mubr.f32.mxu0 %v12646_v32 }
 0x554   : > { %10159 = vmatprep.subr.bf16.mxu0 %v10158_v63 }
 0x556   : > { %9184 = vmatmul.mubr.msk.f32.vlgmr.msra.gmra.mrb[8].mxu0 %vm2504_vm12, %v9180_v1 }
 0x557   : > { %10161 = vmatpush3.bf16.msra.mxu0 %v10158_v63  ;;  %6820 = vmatprep.mubr.f32.mxu0 %v12646_v32 }
 0x558   : > { %10163 = vmatprep.subr.bf16.mxu0 %v10162_v3 }
 0x55a   : > { %9185 = vmatmul.mubr.msk.f32.gmra.mrb[10].mxu0 %vm2504_vm12, %v9181_v9 }
 0x55b   : > { %10165 = vmatpush3.bf16.msra.mxu0 %v10162_v3  ;;  %6826 = vmatprep.mubr.f32.mxu0 %v12646_v32 }
 0x55c   : > { %10230 = vmatprep.subr.bf16.mxu0 %v11484_v15 }
 0x55e   : > { %9186 = vmatmul.mubr.msk.f32.gmra.mrb[12].mxu0 %vm2504_vm12, %v9182_v18 }
 0x55f   : > { %6832 = vmatprep.mubr.f32.mxu0 %v12646_v32 }
 0x562   : > { %9187 = vmatmul.mubr.msk.f32.gmra.mrb[14].mxu0 %vm2504_vm12, %v9183_v5 }
 0x563   : > { %9773 = vmatprep.mubr.msk.f32.mxu0 %vm2504_vm12, %v9180_v1 }
 0x566   : > { %9774 = vmatmul.mubr.msk.f32.vlgmr.msra.gmra.mrb[16].mxu0 %vm2504_vm12, %v9181_v9 }
 0x567   : > { %9776 = vmatprep.mubr.msk.f32.mxu0 %vm2504_vm12, %v9182_v18 }
 0x56a   : > { %9777 = vmatmul.mubr.msk.f32.gmra.mrb[18].mxu0 %vm2504_vm12, %v9183_v5 }
 0x629   : > { %v6816_v31 = vpop.f32.mrb[8].mxu0 }
 0x62a   : > { %v6960_v27 = vadd.f32 %v6943_v22, %v6816_v31  ;;  %v6818_v43 = vpop.f32.mrb[9].mxu0 }
 0x62b   : > { %v6961_v45 = vadd.f32 %v6943_v22, %v6818_v43 }
 0x62c   : > { %v6972_v46 = vmax.f32 %v6960_v27, 0.0 }
 0x62d   : > { %v6973_v7 = vmax.f32 %v6961_v45, 0.0  ;;  %v6822_v8 = vpop.f32.mrb[10].mxu0 }
 0x62e   : > { %v12969_v32 = vmul.f32 %v6972_v46, %v11980_v62  ;;  %v6963_v47 = vadd.f32 %v6948_v40, %v6822_v8  ;;  %v6824_v12 = vpop.f32.mrb[11].mxu0 }
 0x62f   : > { %v12972_v16 = vmul.f32 %v6973_v7, %v11982_v2  ;;  %v6964_v17 = vadd.f32 %v6948_v40, %v6824_v12  ;;  %v13041_v7 = vld [vmem:[#allocation2] sm:$0xff] }
 0x630   : > { %v6975_v19 = vmax.f32 %v6963_v47, 0.0  ;;  %9831 = vmatprep.mubr.msk.f32.mxu0 %vm11485_vm13, %v13041_v7  ;;  %v13076_v47 = vld [vmem:[%s13352_s8 + $0x10] sm:$0xf] }
 0x631   : > { %v6976_v21 = vmax.f32 %v6964_v17, 0.0  ;;  %v6828_v23 = vpop.f32.mrb[12].mxu0  ;;  %v12976_v24 = vpack.i.bf16 %v12972_v16, %v12969_v32 }
 0x632   : > { %v12979_v25 = vmul.f32 %v6975_v19, %v11980_v62  ;;  %v6966_v28 = vadd.f32 %v6953_v20, %v6828_v23  ;;  %v6830_v29 = vpop.f32.mrb[13].mxu0 }
 0x633   : > { %v12982_v37 = vmul.f32 %v6976_v21, %v11982_v2  ;;  %v6967_v33 = vadd.f32 %v6953_v20, %v6830_v29  ;;  %11192 = vrot.lane.b32.xlu1 %v12976_v24, %s11475_s19  ;;  %v11188_v21 = vpop.permute.xlu0 %11187  ;;  %v8774_v29 = vld [vmem:[%s13353_s9] sm:$0xf] }
 0x634   : > { %v6978_v38 = vmax.f32 %v6966_v28, 0.0  ;;  %v12988_v35 = vpack.i.bf16 %v12979_v25, %v12969_v32  ;;  %v10224_v42 = vpack.c.bf16 %v12979_v25, %v12969_v32 }
 0x635   : > { %v6979_v44 = vmax.f32 %v6967_v33, 0.0  ;;  %v6834_v36 = vpop.f32.mrb[14].mxu0  ;;  %v12994_v50 = vpack.i.bf16 %v12982_v37, %v12979_v25  ;;  %v10222_v60 = vpack.c.bf16 %v12982_v37, %v12972_v16 }
 0x636   : > { %v12999_v49 = vmul.f32 %v6978_v38, %v11980_v62  ;;  %v6969_v51 = vadd.f32 %v6958_v59, %v6834_v36  ;;  %v6836_v34 = vpop.f32.mrb[15].mxu0 }
 0x637   : > { %v13002_v48 = vmul.f32 %v6979_v44, %v11982_v2  ;;  %v6970_v54 = vadd.f32 %v6958_v59, %v6836_v34  ;;  %11197 = vrot.lane.b32.xlu1 %v12976_v24, %s11476_s20  ;;  %11202 = vrot.lane.b32.xlu0 %v12994_v50, %s11475_s19 }
 0x638   : > { %v6981_v61 = vmax.f32 %v6969_v51, 0.0 }
 0x639   : > { %v6982_v4 = vmax.f32 %v6970_v54, 0.0  ;;  %v9775_v55 = vpop.f32.mrb[16].mxu0  ;;  %v11206_v26 = vpack.i.bf16 %v13002_v48, %v12999_v49 }
 0x63a   : > { %v13011_v30 = vmul.f32 %v6981_v61, %v11980_v62  ;;  %v6965_v39 = vadd.f32 %v9775_v55, %v6948_v40  ;;  %v6905_v10 = vpop.f32.mrb[17].mxu0 }
 0x63b   : > { %v13014_v11 = vmul.f32 %v6982_v4, %v11982_v2  ;;  %v6962_v13 = vadd.f32 %v6943_v22, %v6905_v10  ;;  %11207 = vrot.lane.b32.xlu0 %v11206_v26, %s11475_s19 }
 0x63c   : > { %v6977_v14 = vmax.f32 %v6965_v39, 0.0  ;;  %v13019_v52 = vpack.i.bf16 %v13011_v30, %v12999_v49  ;;  %v10228_v0 = vpack.c.bf16 %v13011_v30, %v12999_v49 }
 0x63d   : > { %v6974_v53 = vmax.f32 %v6962_v13, 0.0  ;;  %v9778_v57 = vpop.f32.mrb[18].mxu0  ;;  %v11216_v62 = vpack.i.bf16 %v13014_v11, %v13011_v30  ;;  %v10226_v2 = vpack.c.bf16 %v13014_v11, %v13002_v48  ;;  %v9206_v30 = vld [vmem:[%s13352_s8 + $0x14] sm:$0xf] }
 0x63e   : > { %v6989_v56 = vmul.f32 %v6977_v14, %v11970_v41  ;;  %v6971_v58 = vadd.f32 %v9778_v57, %v6958_v59  ;;  %v6915_v63 = vpop.f32.mrb[19].mxu0  ;;  %v11190_v14 = vunpack.i.h.bf16 %v11188_v21 }
 0x63f   : > { %v6986_v1 = vmul.f32 %v6974_v53, %v11970_v41  ;;  %v6968_v3 = vadd.f32 %v6953_v20, %v6915_v63  ;;  %11212 = vrot.lane.b32.xlu0 %v12994_v50, %s11476_s20  ;;  %11217 = vrot.lane.b32.xlu1 %v11216_v62, %s11475_s19  ;;  %v11183_v20 = vpop.permute.xlu1 %11182 }
 0x640   : > { %7001 = vst.msk [vmem:[#allocation2 + $0x38] sm:$0xff] %vm2396_vm11, %v6989_v56  ;;  %v6983_v9 = vmax.f32 %v6971_v58, 0.0  ;;  %v11184_v28 = vunpack.i.l.bf16 %v11183_v20 }
 0x641   : > { %6998 = vst.msk [vmem:[#allocation2 + $0x18] sm:$0xff] %vm2396_vm11, %v6986_v1  ;;  %v6980_v18 = vmax.f32 %v6968_v3, 0.0 }
 0x642   : > { %v6995_v5 = vmul.f32 %v6983_v9, %v11970_v41  ;;  %v9192_v9 = vld [vmem:[%s13352_s8 + $0x4] sm:$0xf] }
 0x643   : > { %v6992_v22 = vmul.f32 %v6980_v18, %v11970_v41  ;;  %11232 = vrot.lane.b32.xlu0 %v11206_v26, %s11476_s20 }
 0x644   : > { %7007 = vst.msk [vmem:[#allocation2 + $0x78] sm:$0xff] %vm2396_vm11, %v6995_v5 }
 0x645   : > { %7004 = vst.msk [vmem:[#allocation2 + $0x58] sm:$0xff] %vm2396_vm11, %v6992_v22 }
 0x647   : > { %v7015_v31 = vld [vmem:[#allocation2 + $0x38] sm:$0xff] }
 0x648   : > { %v7011_v27 = vld [vmem:[#allocation2 + $0x18] sm:$0xff]  ;;  %v11341_v12 = vpack.i.bf16 %v7015_v31, %v12982_v37 }
 0x649   : > { %v11221_v43 = vpack.i.bf16 %v7015_v31, %v7011_v27  ;;  %v10231_v45 = vpack.c.bf16 %v7015_v31, %v7011_v27  ;;  %v11336_v17 = vpack.i.bf16 %v7011_v27, %v12972_v16 }
 0x64b   : > { %11222 = vrot.lane.b32.xlu1 %v11221_v43, %s11475_s19  ;;  %10232 = vmatpush3.bf16.msra.mxu0 %v10231_v45  ;;  %v7023_v46 = vld [vmem:[#allocation2 + $0x78] sm:$0xff] }
 0x64c   : > { %10233 = vmatprep.subr.bf16.mxu0 %v11484_v15  ;;  %v7019_v40 = vld [vmem:[#allocation2 + $0x58] sm:$0xff] }
 0x64d   : > { %v11241_v41 = vpack.i.bf16 %v7023_v46, %v7019_v40  ;;  %v10234_v8 = vpack.c.bf16 %v7023_v46, %v7019_v40  ;;  %v11396_v19 = vpack.i.bf16 %v7019_v40, %v13002_v48 }
 0x64f   : > { %11227 = vrot.lane.b32.xlu1 %v12961_v6, %s11476_s20  ;;  %11242 = vrot.lane.b32.xlu0 %v11241_v41, %s11475_s19 }
 0x650   : > { %10235 = vmatpush3.bf16.msra.mxu0 %v10234_v8 }
 0x651   : > { %10244 = vmatprep.subr.bf16.mxu0 %v11484_v15 }
 0x653   : > { %11237 = vrot.lane.b32.xlu1 %v11216_v62, %s11476_s20  ;;  %11247 = vrot.lane.b32.xlu0 %v12961_v6, %s11476_s20 }
 0x654   : > { %9832 = vmatmul.mubr.msk.f32.vlgmr.msra.gmra.mrb[20].mxu0 %vm2504_vm12, %v13076_v47 }
 0x655   : > { %9842 = vmatprep.mubr.msk.f32.mxu0 %vm11485_vm13, %v13041_v7 }
 0x657   : > { %11252 = vrot.lane.b32.xlu1 %v11221_v43, %s11476_s20  ;;  %11262 = vrot.lane.b32.xlu0 %v12994_v50, %s11477_s21 }
 0x65b   : > { %11257 = vrot.lane.b32.xlu1 %v12976_v24, %s11477_s21  ;;  %11272 = vrot.lane.b32.xlu0 %v11206_v26, %s11477_s21 }
 0x65f   : > { %11267 = vrot.lane.b32.xlu1 %v12961_v6, %s11477_s21  ;;  %11282 = vrot.lane.b32.xlu0 %v11241_v41, %s11476_s20 }
 0x663   : > { %11277 = vrot.lane.b32.xlu1 %v11216_v62, %s11477_s21  ;;  %11287 = vrot.lane.b32.xlu0 %v12961_v6, %s11477_s21 }
 0x667   : > { %11292 = vrot.lane.b32.xlu1 %v11221_v43, %s11477_s21  ;;  %11302 = vrot.lane.b32.xlu0 %v12994_v50, %s11478_s22 }
 0x66b   : > { %11297 = vrot.lane.b32.xlu1 %v12976_v24, %s11478_s22  ;;  %11312 = vrot.lane.b32.xlu0 %v11206_v26, %s11478_s22  ;;  %v11185_v24 = vunpack.i.h.bf16 %v11183_v20  ;;  %v11189_v26 = vunpack.i.l.bf16 %v11188_v21 }
 0x66f   : > { %11307 = vrot.lane.b32.xlu1 %v12961_v6, %s11478_s22  ;;  %11322 = vrot.lane.b32.xlu0 %v11241_v41, %s11477_s21  ;;  %s10598_s21 = smul.u32 12, %s13356_s14 }
 0x673   : > { %11317 = vrot.lane.b32.xlu1 %v11216_v62, %s11478_s22  ;;  %11327 = vrot.lane.b32.xlu0 %v12961_v6, %s11478_s22  ;;  %v11351_v6 = vpack.i.bf16 %v7023_v46, %v13014_v11 }
 0x677   : > { %11332 = vrot.lane.b32.xlu1 %v11221_v43, %s11478_s22  ;;  %11342 = vrot.lane.b32.xlu0 %v11341_v12, %s11479_s23 }
 0x67b   : > { %11337 = vrot.lane.b32.xlu1 %v11336_v17, %s11479_s23  ;;  %11357 = vrot.lane.b32.xlu0 %v13019_v52, %s11479_s23 }
 0x67f   : > { %11347 = vrot.lane.b32.xlu1 %v12988_v35, %s11479_s23  ;;  %11367 = vrot.lane.b32.xlu0 %v11241_v41, %s11478_s22 }
 0x683   : > { %11352 = vrot.lane.b32.xlu1 %v11351_v6, %s11479_s23  ;;  %11372 = vrot.lane.b32.xlu0 %v11341_v12, %s11480_s24 }
 0x687   : > { %11362 = vrot.lane.b32.xlu1 %v11336_v17, %s11480_s24  ;;  %11387 = vrot.lane.b32.xlu0 %v13019_v52, %s11480_s24 }
 0x68b   : > { %11377 = vrot.lane.b32.xlu1 %v12988_v35, %s11480_s24  ;;  %11397 = vrot.lane.b32.xlu0 %v11396_v19, %s11479_s23 }
 0x68f   : > { %11382 = vrot.lane.b32.xlu1 %v11351_v6, %s11480_s24  ;;  %11402 = vrot.lane.b32.xlu0 %v11341_v12, %s11481_s25 }
 0x693   : > { %11392 = vrot.lane.b32.xlu1 %v11336_v17, %s11481_s25  ;;  %11417 = vrot.lane.b32.xlu0 %v11396_v19, %s11480_s24  ;;  %s359_s24 = scalar_lea.vmem %s13354_s10, %s10598_s21 }
 0x697   : > { %11407 = vrot.lane.b32.xlu1 %v12988_v35, %s11481_s25  ;;  %11422 = vrot.lane.b32.xlu0 %v13019_v52, %s11481_s25 }
 0x69b   : > { %11412 = vrot.lane.b32.xlu1 %v11351_v6, %s11481_s25  ;;  %11432 = vrot.lane.b32.xlu0 %v11396_v19, %s11481_s25 }
 0x69f   : > { %11427 = vrot.lane.b32.xlu1 %v11336_v17, %s11482_s26  ;;  %11437 = vrot.lane.b32.xlu0 %v11341_v12, %s11482_s26 }
 0x6a3   : > { %11442 = vrot.lane.b32.xlu1 %v12988_v35, %s11482_s26  ;;  %11452 = vrot.lane.b32.xlu0 %v11396_v19, %s11482_s26 }
 0x6a5   : > { %v11193_v23 = vpop.permute.xlu1 %11192 }
 0x6a6   : > { %v11195_v33 = vunpack.i.h.bf16 %v11193_v23  ;;  %v11194_v38 = vunpack.i.l.bf16 %v11193_v23 }
 0x6a7   : > { %11447 = vrot.lane.b32.xlu1 %v11351_v6, %s11482_s26  ;;  %11457 = vrot.lane.b32.xlu0 %v13019_v52, %s11482_s26 }
 0x6a8   : > { %v7075_v36 = vsel %vm393_vm0, %v11184_v28, %v11194_v38  ;;  %v7076_v51 = vsel %vm393_vm0, %v11194_v38, %v11195_v33 }
 0x6a9   : > { %v11203_v59 = vpop.permute.xlu0 %11202  ;;  %v13130_v54 = vpop.permute.xlu1 %11197 }
 0x6aa   : > { %v11205_v44 = vunpack.i.h.bf16 %v11203_v59  ;;  %v11204_v35 = vunpack.i.l.bf16 %v11203_v59  ;;  %v11200_v45 = vunpack.i.h.bf16 %v13130_v54  ;;  %v11199_v46 = vunpack.i.l.bf16 %v13130_v54 }
 0x6ab   : > { %8777 = vperm.xlu1 %10620, %v8774_v29  }
 0x6ac   : > { %v7078_v50 = vsel %vm393_vm0, %v11185_v24, %v11204_v35  ;;  %v7079_v34 = vsel %vm393_vm0, %v11204_v35, %v11205_v44  ;;  %v7276_v24 = vsel %vm599_vm2, %v11199_v46, %v11200_v45 }
 0x6ad   : > { %v10168_v61 = vpack.c.bf16 %v7078_v50, %v7075_v36  ;;  %v11208_v4 = vpop.permute.xlu0 %11207  ;;  %v10166_v55 = vpack.c.bf16 %v7079_v34, %v7076_v51 }
 0x6ae   : > { %v11210_v39 = vunpack.i.h.bf16 %v11208_v4  ;;  %v11209_v10 = vunpack.i.l.bf16 %v11208_v4 }
 0x6af   : > { %10167 = vmatprep.subr.bf16.mxu1 %v10166_v55 }
 0x6b0   : > { %10169 = vmatpush1.bf16.msra.mxu1 %v10168_v61  ;;  %v7081_v57 = vsel %vm393_vm0, %v11189_v26, %v11209_v10  ;;  %v7082_v56 = vsel %vm393_vm0, %v11209_v10, %v11210_v39 }
 0x6b1   : > { %v11218_v13 = vpop.permute.xlu1 %11217  ;;  %v13136_v3 = vpop.permute.xlu0 %11212 }
 0x6b2   : > { %v11220_v52 = vunpack.i.h.bf16 %v11218_v13  ;;  %v11219_v53 = vunpack.i.l.bf16 %v11218_v13  ;;  %v11215_v18 = vunpack.i.h.bf16 %v13136_v3  ;;  %v11214_v5 = vunpack.i.l.bf16 %v13136_v3 }
 0x6b4   : > { %v7084_v62 = vsel %vm393_vm0, %v11190_v14, %v11219_v53  ;;  %v7085_v58 = vsel %vm393_vm0, %v11219_v53, %v11220_v52  ;;  %v7279_v6 = vsel %vm599_vm2, %v11214_v5, %v11215_v18 }
 0x6b5   : > { %v10172_v63 = vpack.c.bf16 %v7084_v62, %v7081_v57  ;;  %v10170_v1 = vpack.c.bf16 %v7085_v58, %v7082_v56  ;;  %v13147_v22 = vpop.permute.xlu0 %11232  ;;  %v10180_v51 = vpack.c.bf16 %v7279_v6, %v7276_v24 }
 0x6b6   : > { %v11235_v28 = vunpack.i.h.bf16 %v13147_v22  ;;  %v11234_v29 = vunpack.i.l.bf16 %v13147_v22 }
 0x6b7   : > { %10171 = vmatprep.subr.bf16.mxu1 %v10170_v1 }
 0x6b8   : > { %10173 = vmatpush1.bf16.msra.mxu1 %v10172_v63  ;;  %v7282_v55 = vsel %vm599_vm2, %v11234_v29, %v11235_v28 }
 0x6b9   : > { %10174 = vmatprep.subr.bf16.mxu1 %v11484_v15 }
 0x6bb   : > { %9193 = vmatmul.mubr.msk.f32.vlgmr.msra.gmra.mrb[18].mxu1 %vm2504_vm12, %v9192_v9 }
 0x6bc   : > { %9787 = vmatprep.mubr.msk.f32.mxu1 %vm11485_vm13, %v13041_v7 }
 0x6bd   : > { %v11223_v31 = vpop.permute.xlu1 %11222 }
 0x6be   : > { %v11225_v27 = vunpack.i.h.bf16 %v11223_v31  ;;  %v11224_v43 = vunpack.i.l.bf16 %v11223_v31 }
 0x6c0   : > { %v7080_v40 = vsel %vm393_vm0, %v11205_v44, %v11225_v27  ;;  %v7077_v41 = vsel %vm393_vm0, %v11195_v33, %v11224_v43 }
 0x6c1   : > { %v10175_v8 = vpack.c.bf16 %v7080_v40, %v7077_v41  ;;  %v11228_v12 = vpop.permute.xlu1 %11227  ;;  %v11243_v17 = vpop.permute.xlu0 %11242 }
 0x6c2   : > { %v11230_v19 = vunpack.i.h.bf16 %v11228_v12  ;;  %v11229_v20 = vunpack.i.l.bf16 %v11228_v12  ;;  %v11245_v21 = vunpack.i.h.bf16 %v11243_v17  ;;  %v11244_v23 = vunpack.i.l.bf16 %v11243_v17 }
 0x6c3   : > { %10176 = vmatpush3.bf16.msra.mxu1 %v10175_v8 }
 0x6c4   : > { %v7086_v38 = vsel %vm393_vm0, %v11220_v52, %v11245_v21  ;;  %v7083_v33 = vsel %vm393_vm0, %v11210_v39, %v11244_v23  ;;  %10177 = vmatprep.subr.bf16.mxu1 %v11484_v15  ;;  %v7278_v59 = vsel %vm599_vm2, %v11230_v19, %v11214_v5  ;;  %v7275_v44 = vsel %vm599_vm2, %v11229_v20, %v11199_v46 }
 0x6c5   : > { %v10178_v35 = vpack.c.bf16 %v7086_v38, %v7083_v33  ;;  %v11238_v36 = vpop.permute.xlu1 %11237  ;;  %v11248_v50 = vpop.permute.xlu0 %11247  ;;  %v10182_v39 = vpack.c.bf16 %v7278_v59, %v7275_v44 }
 0x6c6   : > { %v11240_v34 = vunpack.i.h.bf16 %v11238_v36  ;;  %v11239_v54 = vunpack.i.l.bf16 %v11238_v36  ;;  %v11250_v61 = vunpack.i.h.bf16 %v11248_v50  ;;  %v11249_v4 = vunpack.i.l.bf16 %v11248_v50 }
 0x6c7   : > { %10179 = vmatpush3.bf16.msra.mxu1 %v10178_v35 }
 0x6c8   : > { %10181 = vmatprep.subr.bf16.mxu1 %v10180_v51  ;;  %v7285_v26 = vsel %vm599_vm2, %v11239_v54, %v11240_v34  ;;  %v7284_v52 = vsel %vm599_vm2, %v11250_v61, %v11239_v54  ;;  %v7281_v53 = vsel %vm599_vm2, %v11249_v4, %v11234_v29 }
 0x6c9   : > { %v11253_v10 = vpop.permute.xlu1 %11252  ;;  %v13164_v13 = vpop.permute.xlu0 %11262  ;;  %v10184_v14 = vpack.c.bf16 %v7285_v26, %v7282_v55  ;;  %v10186_v56 = vpack.c.bf16 %v7284_v52, %v7281_v53 }
 0x6ca   : > { %v11255_v57 = vunpack.i.h.bf16 %v11253_v10  ;;  %v11254_v62 = vunpack.i.l.bf16 %v11253_v10  ;;  %9788 = vmatmul.mubr.msk.f32.vlgmr.msra.gmra.mrb[20].mxu1 %vm2504_vm12, %v9192_v9  ;;  %v11265_v31 = vunpack.i.h.bf16 %v13164_v13  ;;  %v11264_v27 = vunpack.i.l.bf16 %v13164_v13  ;;  %v7024_v9 = vld [vmem:[%s13352_s8] sm:$0xf] }
 0x6cb   : > { %10183 = vmatpush1.bf16.msra.mxu1 %v10182_v39  ;;  %7366 = vmatprep.mubr.f32.mxu1 %v13041_v7 }
 0x6cc   : > { %10185 = vmatprep.subr.bf16.mxu1 %v10184_v14  ;;  %v7280_v1 = vsel %vm599_vm2, %v11215_v18, %v11255_v57  ;;  %v7277_v3 = vsel %vm599_vm2, %v11200_v45, %v11254_v62  ;;  %v7481_v17 = vsel %vm808_vm4, %v11264_v27, %v11265_v31 }
 0x6cd   : > { %v11258_v58 = vpop.permute.xlu1 %11257  ;;  %v13170_v63 = vpop.permute.xlu0 %11272  ;;  %v10189_v43 = vpack.c.bf16 %v7280_v1, %v7277_v3  ;;  %v9197_v1 = vld [vmem:[%s13352_s8 + $0x8] sm:$0xf] }
 0x6ce   : > { %v11260_v5 = vunpack.i.h.bf16 %v11258_v58  ;;  %v11259_v22 = vunpack.i.l.bf16 %v11258_v58  ;;  %v11275_v6 = vunpack.i.h.bf16 %v13170_v63  ;;  %v11274_v19 = vunpack.i.l.bf16 %v13170_v63 }
 0x6cf   : > { %10187 = vmatpush1.bf16.msra.mxu1 %v10186_v56 }
 0x6d0   : > { %10188 = vmatprep.subr.bf16.mxu1 %v11484_v15  ;;  %v7478_v18 = vsel %vm808_vm4, %v11259_v22, %v11260_v5  ;;  %v7484_v51 = vsel %vm808_vm4, %v11274_v19, %v11275_v6 }
 0x6d1   : > { %v11268_v46 = vpop.permute.xlu1 %11267  ;;  %v11283_v40 = vpop.permute.xlu0 %11282  ;;  %v10194_v59 = vpack.c.bf16 %v7481_v17, %v7478_v18 }
 0x6d2   : > { %v11270_v41 = vunpack.i.h.bf16 %v11268_v46  ;;  %v11269_v45 = vunpack.i.l.bf16 %v11268_v46  ;;  %v11285_v8 = vunpack.i.h.bf16 %v11283_v40  ;;  %v11284_v12 = vunpack.i.l.bf16 %v11283_v40  ;;  %9195 = vmatmul.mubr.msk.f32.vlgmr.msra.gmra.mrb[18].mxu1 %vm2504_vm12, %v7024_v9 }
 0x6d3   : > { %10190 = vmatpush3.bf16.msra.mxu1 %v10189_v43  ;;  %9798 = vmatprep.mubr.msk.f32.mxu1 %vm11485_vm13, %v13041_v7 }
 0x6d4   : > { %v7286_v20 = vsel %vm599_vm2, %v11240_v34, %v11285_v8  ;;  %v7283_v21 = vsel %vm599_vm2, %v11235_v28, %v11284_v12  ;;  %10191 = vmatprep.subr.bf16.mxu1 %v11484_v15  ;;  %v7477_v23 = vsel %vm808_vm4, %v11269_v45, %v11259_v22  ;;  %v7480_v24 = vsel %vm808_vm4, %v11270_v41, %v11264_v27 }
 0x6d5   : > { %v10192_v29 = vpack.c.bf16 %v7286_v20, %v7283_v21  ;;  %v11278_v38 = vpop.permute.xlu1 %11277  ;;  %v11288_v33 = vpop.permute.xlu0 %11287  ;;  %v10196_v34 = vpack.c.bf16 %v7480_v24, %v7477_v23 }
 0x6d6   : > { %v11280_v44 = vunpack.i.h.bf16 %v11278_v38  ;;  %v11279_v35 = vunpack.i.l.bf16 %v11278_v38  ;;  %v11290_v36 = vunpack.i.h.bf16 %v11288_v33  ;;  %v11289_v50 = vunpack.i.l.bf16 %v11288_v33 }
 0x6d7   : > { %10193 = vmatpush3.bf16.msra.mxu1 %v10192_v29 }
 0x6d8   : > { %10195 = vmatprep.subr.bf16.mxu1 %v10194_v59  ;;  %v7487_v28 = vsel %vm808_vm4, %v11279_v35, %v11280_v44  ;;  %v7486_v55 = vsel %vm808_vm4, %v11290_v36, %v11279_v35  ;;  %v7483_v26 = vsel %vm808_vm4, %v11289_v50, %v11274_v19 }
 0x6d9   : > { %v11293_v54 = vpop.permute.xlu1 %11292  ;;  %v13194_v61 = vpop.permute.xlu0 %11302  ;;  %v10198_v4 = vpack.c.bf16 %v7487_v28, %v7484_v51  ;;  %v10200_v13 = vpack.c.bf16 %v7486_v55, %v7483_v26 }
 0x6da   : > { %v11295_v39 = vunpack.i.h.bf16 %v11293_v54  ;;  %v11294_v10 = vunpack.i.l.bf16 %v11293_v54  ;;  %9799 = vmatmul.mubr.msk.f32.vlgmr.msra.gmra.mrb[22].mxu1 %vm2504_vm12, %v7024_v9  ;;  %v11305_v58 = vunpack.i.h.bf16 %v13194_v61  ;;  %v11304_v63 = vunpack.i.l.bf16 %v13194_v61 }
 0x6db   : > { %10197 = vmatpush1.bf16.msra.mxu1 %v10196_v34  ;;  %7568 = vmatprep.mubr.f32.mxu1 %v13041_v7 }
 0x6dc   : > { %10199 = vmatprep.subr.bf16.mxu1 %v10198_v4  ;;  %v7479_v53 = vsel %vm808_vm4, %v11260_v5, %v11294_v10  ;;  %v7482_v57 = vsel %vm808_vm4, %v11265_v31, %v11295_v39  ;;  %v7686_v40 = vsel %vm1029_vm5, %v11304_v63, %v11305_v58 }
 0x6dd   : > { %v11298_v14 = vpop.permute.xlu1 %11297  ;;  %v13200_v52 = vpop.permute.xlu0 %11312  ;;  %v10203_v3 = vpack.c.bf16 %v7482_v57, %v7479_v53 }
 0x6de   : > { %v11300_v62 = vunpack.i.h.bf16 %v11298_v14  ;;  %v11299_v56 = vunpack.i.l.bf16 %v11298_v14  ;;  %v11315_v18 = vunpack.i.h.bf16 %v13200_v52  ;;  %v11314_v41 = vunpack.i.l.bf16 %v13200_v52  ;;  %v9200_v14 = vld [vmem:[%s13352_s8 + $0xc] sm:$0xf] }
 0x6df   : > { %10201 = vmatpush1.bf16.msra.mxu1 %v10200_v13 }
 0x6e0   : > { %10202 = vmatprep.subr.bf16.mxu1 %v11484_v15  ;;  %v7683_v5 = vsel %vm1029_vm5, %v11299_v56, %v11300_v62  ;;  %v7689_v59 = vsel %vm1029_vm5, %v11314_v41, %v11315_v18 }
 0x6e1   : > { %v11308_v22 = vpop.permute.xlu1 %11307  ;;  %v11323_v27 = vpop.permute.xlu0 %11322  ;;  %v10208_v23 = vpack.c.bf16 %v7686_v40, %v7683_v5 }
 0x6e2   : > { %v11310_v9 = vunpack.i.h.bf16 %v11308_v22  ;;  %v11309_v31 = vunpack.i.l.bf16 %v11308_v22  ;;  %v11325_v43 = vunpack.i.h.bf16 %v11323_v27  ;;  %v11324_v46 = vunpack.i.l.bf16 %v11323_v27  ;;  %9198 = vmatmul.mubr.msk.f32.vlgmr.msra.gmra.mrb[18].mxu1 %vm2504_vm12, %v9197_v1 }
 0x6e3   : > { %10204 = vmatpush3.bf16.msra.mxu1 %v10203_v3  ;;  %9809 = vmatprep.mubr.msk.f32.mxu1 %vm11485_vm13, %v13041_v7 }
 0x6e4   : > { %v7488_v45 = vsel %vm808_vm4, %v11280_v44, %v11325_v43  ;;  %v7485_v8 = vsel %vm808_vm4, %v11275_v6, %v11324_v46  ;;  %10205 = vmatprep.subr.bf16.mxu1 %v11484_v15  ;;  %v7682_v12 = vsel %vm1029_vm5, %v11309_v31, %v11299_v56  ;;  %v7685_v17 = vsel %vm1029_vm5, %v11310_v9, %v11304_v63 }
 0x6e5   : > { %v10206_v19 = vpack.c.bf16 %v7488_v45, %v7485_v8  ;;  %v11318_v20 = vpop.permute.xlu1 %11317  ;;  %v11328_v21 = vpop.permute.xlu0 %11327  ;;  %v10210_v44 = vpack.c.bf16 %v7685_v17, %v7682_v12 }
 0x6e6   : > { %v11320_v24 = vunpack.i.h.bf16 %v11318_v20  ;;  %v11319_v29 = vunpack.i.l.bf16 %v11318_v20  ;;  %v11330_v38 = vunpack.i.h.bf16 %v11328_v21  ;;  %v11329_v33 = vunpack.i.l.bf16 %v11328_v21 }
 0x6e7   : > { %10207 = vmatpush3.bf16.msra.mxu1 %v10206_v19 }
 0x6e8   : > { %10209 = vmatprep.subr.bf16.mxu1 %v10208_v23  ;;  %v7692_v6 = vsel %vm1029_vm5, %v11319_v29, %v11320_v24  ;;  %v7691_v51 = vsel %vm1029_vm5, %v11330_v38, %v11319_v29  ;;  %v7688_v28 = vsel %vm1029_vm5, %v11329_v33, %v11314_v41 }
 0x6e9   : > { %v11333_v35 = vpop.permute.xlu1 %11332  ;;  %v11343_v36 = vpop.permute.xlu0 %11342  ;;  %v10212_v50 = vpack.c.bf16 %v7692_v6, %v7689_v59  ;;  %v10214_v61 = vpack.c.bf16 %v7691_v51, %v7688_v28 }
 0x6ea   : > { %v11335_v34 = vunpack.i.h.bf16 %v11333_v35  ;;  %v11334_v54 = vunpack.i.l.bf16 %v11333_v35  ;;  %9810 = vmatmul.mubr.msk.f32.vlgmr.msra.gmra.mrb[24].mxu1 %vm2504_vm12, %v9197_v1  ;;  %v11345_v10 = vunpack.i.h.bf16 %v11343_v36  ;;  %v11344_v9 = vunpack.i.l.bf16 %v11343_v36 }
 0x6eb   : > { %10211 = vmatpush1.bf16.msra.mxu1 %v10210_v44  ;;  %7773 = vmatprep.mubr.f32.mxu1 %v13041_v7 }
 0x6ec   : > { %10213 = vmatprep.subr.bf16.mxu1 %v10212_v50  ;;  %v7684_v26 = vsel %vm1029_vm5, %v11300_v62, %v11334_v54  ;;  %v7687_v39 = vsel %vm1029_vm5, %v11305_v58, %v11335_v34  ;;  %v8031_v41 = vsel %vm1457_vm6, %v11344_v9, %v11345_v10 }
 0x6ed   : > { %v11338_v4 = vpop.permute.xlu1 %11337  ;;  %v13228_v55 = vpop.permute.xlu0 %11357  ;;  %v10217_v53 = vpack.c.bf16 %v7687_v39, %v7684_v26 }
 0x6ee   : > { %v11340_v13 = vunpack.i.h.bf16 %v11338_v4  ;;  %v11339_v3 = vunpack.i.l.bf16 %v11338_v4  ;;  %v11360_v48 = vunpack.i.h.bf16 %v13228_v55  ;;  %v11359_v11 = vunpack.i.l.bf16 %v13228_v55 }
 0x6ef   : > { %10215 = vmatpush1.bf16.msra.mxu1 %v10214_v61 }
 0x6f0   : > { %v10245_v52 = vpack.c.bf16 %v11345_v10, %v11340_v13  ;;  %10216 = vmatprep.subr.bf16.mxu1 %v11484_v15 }
 0x6f1   : > { %v11348_v57 = vpop.permute.xlu1 %11347  ;;  %v11368_v56 = vpop.permute.xlu0 %11367 }
 0x6f2   : > { %v11370_v63 = vunpack.i.h.bf16 %v11368_v56  ;;  %v11369_v1 = vunpack.i.l.bf16 %v11368_v56  ;;  %10246 = vmatpush3.bf16.msra.mxu0 %v10245_v52  ;;  %9201 = vmatmul.mubr.msk.f32.vlgmr.msra.gmra.mrb[18].mxu1 %vm2504_vm12, %v9200_v14  ;;  %v11350_v31 = vunpack.i.h.bf16 %v11348_v57  ;;  %v11349_v43 = vunpack.i.l.bf16 %v11348_v57 }
 0x6f3   : > { %10218 = vmatpush3.bf16.msra.mxu1 %v10217_v53  ;;  %9820 = vmatprep.mubr.msk.f32.mxu1 %vm11485_vm13, %v13041_v7 }
 0x6f4   : > { %v7693_v62 = vsel %vm1029_vm5, %v11320_v24, %v11370_v63  ;;  %v7690_v58 = vsel %vm1029_vm5, %v11315_v18, %v11369_v1  ;;  %10219 = vmatprep.subr.bf16.mxu1 %v11484_v15  ;;  %10247 = vmatprep.subr.bf16.mxu0 %v11484_v15  ;;  %v8029_v18 = vsel %vm1457_vm6, %v11339_v3, %v11340_v13 }
 0x6f5   : > { %v10220_v22 = vpack.c.bf16 %v7693_v62, %v7690_v58  ;;  %v11353_v27 = vpop.permute.xlu1 %11352  ;;  %v11373_v5 = vpop.permute.xlu0 %11372  ;;  %v10236_v16 = vpack.c.bf16 %v8031_v41, %v8029_v18  ;;  %v8028_v37 = vsel %vm1457_vm6, %v11349_v43, %v11339_v3 }
 0x6f6   : > { %v11355_v19 = vunpack.i.h.bf16 %v11353_v27  ;;  %v11354_v32 = vunpack.i.l.bf16 %v11353_v27  ;;  %v11375_v20 = vunpack.i.h.bf16 %v11373_v5  ;;  %v11374_v21 = vunpack.i.l.bf16 %v11373_v5 }
 0x6f7   : > { %10221 = vmatpush3.bf16.msra.mxu1 %v10220_v22 }
 0x6f8   : > { %10223 = vmatprep.subr.bf16.mxu1 %v10222_v60  ;;  %v8030_v60 = vsel %vm1457_vm6, %v11350_v31, %v11344_v9  ;;  %v8035_v49 = vsel %vm1457_vm6, %v11354_v32, %v11355_v19  ;;  %v8224_v36 = vsel %vm1675_vm7, %v11374_v21, %v11375_v20  ;;  %v9209_v31 = vld [vmem:[%s13352_s8 + $0x18] sm:$0xf] }
 0x6f9   : > { %v11363_v46 = vpop.permute.xlu1 %11362  ;;  %v13246_v40 = vpop.permute.xlu0 %11387 }
 0x6fa   : > { %9821 = vmatmul.mubr.msk.f32.vlgmr.msra.gmra.mrb[26].mxu1 %vm2504_vm12, %v9200_v14  ;;  %v11365_v45 = vunpack.i.h.bf16 %v11363_v46  ;;  %v11364_v8 = vunpack.i.l.bf16 %v11363_v46  ;;  %v11389_v14 = vunpack.i.l.bf16 %v13246_v40  ;;  %v11390_v1 = vunpack.i.h.bf16 %v13246_v40 }
 0x6fb   : > { %10225 = vmatpush1.bf16.msra.mxu1 %v10224_v42  ;;  %7922 = vmatprep.mubr.f32.mxu1 %v13041_v7 }
 0x6fc   : > { %10227 = vmatprep.subr.bf16.mxu1 %v10226_v2  ;;  %v10238_v2 = vpack.c.bf16 %v8030_v60, %v8028_v37  ;;  %v8222_v6 = vsel %vm1675_vm7, %v11364_v8, %v11365_v45  ;;  %v10259_v50 = vpack.c.bf16 %v11375_v20, %v11365_v45 }
 0x6fd   : > { %v11378_v12 = vpop.permute.xlu1 %11377  ;;  %v11398_v17 = vpop.permute.xlu0 %11397  ;;  %v10250_v34 = vpack.c.bf16 %v8224_v36, %v8222_v6 }
 0x6fe   : > { %v11400_v25 = vunpack.i.h.bf16 %v11398_v17  ;;  %v11399_v42 = vunpack.i.l.bf16 %v11398_v17  ;;  %v11380_v24 = vunpack.i.h.bf16 %v11378_v12  ;;  %v11379_v29 = vunpack.i.l.bf16 %v11378_v12 }
 0x6ff   : > { %10229 = vmatpush1.bf16.msra.mxu1 %v10228_v0  ;;  %v8034_v0 = vsel %vm1457_vm6, %v11360_v48, %v11354_v32 }
 0x700   : > { %v10248_v23 = vpack.c.bf16 %v11355_v19, %v11400_v25  ;;  %10237 = vmatprep.subr.bf16.mxu1 %v10236_v16  ;;  %v8033_v59 = vsel %vm1457_vm6, %v11399_v42, %v11400_v25  ;;  %v8032_v44 = vsel %vm1457_vm6, %v11359_v11, %v11399_v42  ;;  %v8223_v54 = vsel %vm1675_vm7, %v11380_v24, %v11374_v21 }
 0x701   : > { %v11383_v38 = vpop.permute.xlu1 %11382  ;;  %v13265_v33 = vpop.permute.xlu0 %11402  ;;  %v10240_v35 = vpack.c.bf16 %v8035_v49, %v8033_v59  ;;  %v10242_v61 = vpack.c.bf16 %v8034_v0, %v8032_v44  ;;  %v9212_v44 = vld [vmem:[%s13352_s8 + $0x1c] sm:$0xf] }
 0x702   : > { %10249 = vmatpush3.bf16.msra.mxu0 %v10248_v23  ;;  %9204 = vmatmul.mubr.msk.f32.vlgmr.msra.gmra.mrb[18].mxu1 %vm2504_vm12, %v13076_v47  ;;  %v11385_v51 = vunpack.i.h.bf16 %v11383_v38  ;;  %v11384_v28 = vunpack.i.l.bf16 %v11383_v38  ;;  %v8221_v47 = vsel %vm1675_vm7, %v11379_v29, %v11364_v8  ;;  %v11405_v52 = vunpack.i.h.bf16 %v13265_v33 }
 0x703   : > { %10239 = vmatpush1.bf16.msra.mxu1 %v10238_v2  ;;  %10258 = vmatprep.subr.bf16.mxu0 %v11484_v15  ;;  %v11404_v53 = vunpack.i.l.bf16 %v13265_v33  ;;  %v10252_v62 = vpack.c.bf16 %v8223_v54, %v8221_v47 }
 0x704   : > { %8115 = vmatprep.mubr.f32.mxu1 %v13041_v7  ;;  %10241 = vmatprep.subr.bf16.mxu1 %v10240_v35  ;;  %v8228_v63 = vsel %vm1675_vm7, %v11384_v28, %v11385_v51  ;;  %v8227_v46 = vsel %vm1675_vm7, %v11390_v1, %v11384_v28 }
 0x705   : > { %v11393_v4 = vpop.permute.xlu1 %11392  ;;  %v11418_v55 = vpop.permute.xlu0 %11417  ;;  %9843 = vmatmul.mubr.msk.f32.vlgmr.msra.gmra.mrb[22].mxu0 %vm2504_vm12, %v9206_v30  ;;  %v8417_v18 = vsel %vm1893_vm8, %v11404_v53, %v11405_v52 }
 0x706   : > { %v11395_v26 = vunpack.i.h.bf16 %v11393_v4  ;;  %v11394_v39 = vunpack.i.l.bf16 %v11393_v4  ;;  %v11420_v10 = vunpack.i.h.bf16 %v11418_v55  ;;  %v11419_v13 = vunpack.i.l.bf16 %v11418_v55  ;;  %10260 = vmatpush3.bf16.msra.mxu0 %v10259_v50  ;;  %9853 = vmatprep.mubr.msk.f32.mxu0 %vm11485_vm13, %v13041_v7 }
 0x707   : > { %10243 = vmatpush1.bf16.msra.mxu1 %v10242_v61  ;;  %10261 = vmatprep.subr.bf16.mxu0 %v11484_v15 }
 0x708   : > { %v10262_v57 = vpack.c.bf16 %v11385_v51, %v11420_v10  ;;  %10251 = vmatprep.subr.bf16.mxu1 %v10250_v34  ;;  %v8226_v56 = vsel %vm1675_vm7, %v11419_v13, %v11420_v10  ;;  %v8225_v27 = vsel %vm1675_vm7, %v11389_v14, %v11419_v13  ;;  %v8415_v43 = vsel %vm1893_vm8, %v11394_v39, %v11395_v26 }
 0x709   : > { %v11408_v58 = vpop.permute.xlu1 %11407  ;;  %v11423_v3 = vpop.permute.xlu0 %11422  ;;  %v10254_v22 = vpack.c.bf16 %v8228_v63, %v8226_v56  ;;  %v10273_v40 = vpack.c.bf16 %v11405_v52, %v11395_v26  ;;  %v10256_v41 = vpack.c.bf16 %v8227_v46, %v8225_v27  ;;  %v10264_v8 = vpack.c.bf16 %v8417_v18, %v8415_v43 }
 0x70a   : > { %v11410_v5 = vunpack.i.h.bf16 %v11408_v58  ;;  %v11409_v9 = vunpack.i.l.bf16 %v11408_v58  ;;  %10263 = vmatpush3.bf16.msra.mxu0 %v10262_v57  ;;  %9207 = vmatmul.mubr.msk.f32.vlgmr.msra.gmra.mrb[18].mxu1 %vm2504_vm12, %v9206_v30  ;;  %v11425_v25 = vunpack.i.h.bf16 %v11423_v3  ;;  %v11424_v42 = vunpack.i.l.bf16 %v11423_v3  ;;  %v9215_v3 = vld [vmem:[%s13352_s8 + $0x20] sm:$0xf] }
 0x70b   : > { %10253 = vmatpush1.bf16.msra.mxu1 %v10252_v62  ;;  %10272 = vmatprep.subr.bf16.mxu0 %v11484_v15 }
 0x70c   : > { %10255 = vmatprep.subr.bf16.mxu1 %v10254_v22  ;;  %8308 = vmatprep.mubr.f32.mxu1 %v13041_v7  ;;  %v8414_v16 = vsel %vm1893_vm8, %v11409_v9, %v11394_v39  ;;  %v8416_v37 = vsel %vm1893_vm8, %v11410_v5, %v11404_v53 }
 0x70d   : > { %v11413_v60 = vpop.permute.xlu1 %11412  ;;  %v11433_v45 = vpop.permute.xlu0 %11432  ;;  %9854 = vmatmul.mubr.msk.f32.vlgmr.msra.gmra.mrb[24].mxu0 %vm2504_vm12, %v9209_v31  ;;  %v10266_v48 = vpack.c.bf16 %v8416_v37, %v8414_v16 }
 0x70e   : > { %v11415_v12 = vunpack.i.h.bf16 %v11413_v60  ;;  %v11414_v17 = vunpack.i.l.bf16 %v11413_v60  ;;  %v11435_v19 = vunpack.i.h.bf16 %v11433_v45  ;;  %v11434_v32 = vunpack.i.l.bf16 %v11433_v45  ;;  %10274 = vmatpush3.bf16.msra.mxu0 %v10273_v40  ;;  %9864 = vmatprep.mubr.msk.f32.mxu0 %vm11485_vm13, %v13041_v7 }
 0x70f   : > { %10257 = vmatpush1.bf16.msra.mxu1 %v10256_v41  ;;  %10275 = vmatprep.subr.bf16.mxu0 %v11484_v15 }
 0x710   : > { %v10276_v20 = vpack.c.bf16 %v11415_v12, %v11435_v19  ;;  %10265 = vmatprep.subr.bf16.mxu1 %v10264_v8  ;;  %v8419_v21 = vsel %vm1893_vm8, %v11434_v32, %v11435_v19  ;;  %v8420_v11 = vsel %vm1893_vm8, %v11425_v25, %v11414_v17  ;;  %v8418_v2 = vsel %vm1893_vm8, %v11424_v42, %v11434_v32 }
 0x711   : > { %v11428_v23 = vpop.permute.xlu1 %11427  ;;  %v11438_v24 = vpop.permute.xlu0 %11437  ;;  %v8421_v29 = vsel %vm1893_vm8, %v11414_v17, %v11415_v12  ;;  %v10270_v36 = vpack.c.bf16 %v8420_v11, %v8418_v2 }
 0x712   : > { %v11430_v38 = vunpack.i.h.bf16 %v11428_v23  ;;  %v11429_v33 = vunpack.i.l.bf16 %v11428_v23  ;;  %v11440_v59 = vunpack.i.h.bf16 %v11438_v24  ;;  %v11439_v6 = vunpack.i.l.bf16 %v11438_v24  ;;  %10277 = vmatpush3.bf16.msra.mxu0 %v10276_v20  ;;  %9210 = vmatmul.mubr.msk.f32.vlgmr.msra.gmra.mrb[18].mxu1 %vm2504_vm12, %v9209_v31 }
 0x713   : > { %10267 = vmatpush1.bf16.msra.mxu1 %v10266_v48  ;;  %v10268_v49 = vpack.c.bf16 %v8421_v29, %v8419_v21  ;;  %10286 = vmatprep.subr.bf16.mxu0 %v11484_v15 }
 0x714   : > { %v10287_v30 = vpack.c.bf16 %v11440_v59, %v11430_v38  ;;  %v8608_v0 = vsel %vm2111_vm10, %v11429_v33, %v11430_v38  ;;  %v8610_v35 = vsel %vm2111_vm10, %v11439_v6, %v11440_v59  ;;  %8501 = vmatprep.mubr.f32.mxu1 %v13041_v7 }
 0x715   : > { %v11443_v50 = vpop.permute.xlu1 %11442  ;;  %v11453_v51 = vpop.permute.xlu0 %11452  ;;  %10269 = vmatprep.subr.bf16.mxu1 %v10268_v49  ;;  %9865 = vmatmul.mubr.msk.f32.vlgmr.msra.gmra.mrb[26].mxu0 %vm2504_vm12, %v9212_v44  ;;  %v10278_v28 = vpack.c.bf16 %v8610_v35, %v8608_v0 }
 0x716   : > { %v11445_v34 = vunpack.i.h.bf16 %v11443_v50  ;;  %v11444_v47 = vunpack.i.l.bf16 %v11443_v50  ;;  %10288 = vmatpush3.bf16.msra.mxu0 %v10287_v30  ;;  %9875 = vmatprep.mubr.msk.f32.mxu0 %vm11485_vm13, %v13041_v7  ;;  %v11455_v54 = vunpack.i.h.bf16 %v11453_v51  ;;  %v11454_v61 = vunpack.i.l.bf16 %v11453_v51 }
 0x717   : > { %10271 = vmatpush1.bf16.msra.mxu1 %v10270_v36  ;;  %10289 = vmatprep.subr.bf16.mxu0 %v11484_v15 }
 0x718   : > { %v8607_v4 = vsel %vm2111_vm10, %v11444_v47, %v11429_v33  ;;  %v8609_v55 = vsel %vm2111_vm10, %v11445_v34, %v11439_v6  ;;  %10279 = vmatprep.subr.bf16.mxu1 %v10278_v28  ;;  %v8612_v57 = vsel %vm2111_vm10, %v11454_v61, %v11455_v54 }
 0x719   : > { %v10280_v26 = vpack.c.bf16 %v8609_v55, %v8607_v4  ;;  %v11448_v39 = vpop.permute.xlu1 %11447  ;;  %v11458_v10 = vpop.permute.xlu0 %11457 }
 0x71a   : > { %v11450_v13 = vunpack.i.h.bf16 %v11448_v39  ;;  %v11449_v14 = vunpack.i.l.bf16 %v11448_v39  ;;  %v11460_v52 = vunpack.i.h.bf16 %v11458_v10  ;;  %v11459_v53 = vunpack.i.l.bf16 %v11458_v10  ;;  %9213 = vmatmul.mubr.msk.f32.vlgmr.msra.gmra.mrb[18].mxu1 %vm2504_vm12, %v9212_v44 }
 0x71b   : > { %10281 = vmatpush1.bf16.msra.mxu1 %v10280_v26  ;;  %8694 = vmatprep.mubr.f32.mxu1 %v13041_v7 }
 0x71c   : > { %v10290_v15 = vpack.c.bf16 %v11450_v13, %v11455_v54  ;;  %v8613_v56 = vsel %vm2111_vm10, %v11460_v52, %v11449_v14  ;;  %v8611_v63 = vsel %vm2111_vm10, %v11459_v53, %v11454_v61  ;;  %v8614_v1 = vsel %vm2111_vm10, %v11449_v14, %v11450_v13 }
 0x71d   : > { %v10284_v62 = vpack.c.bf16 %v8613_v56, %v8611_v63  ;;  %v10282_v58 = vpack.c.bf16 %v8614_v1, %v8612_v57 }
 0x71e   : > { %10291 = vmatpush3.bf16.msra.mxu0 %v10290_v15 }
 0x71f   : > { %10283 = vmatprep.subr.bf16.mxu1 %v10282_v58 }
 0x720   : > { %10285 = vmatpush1.bf16.msra.mxu1 %v10284_v62 }
 0x721   : > { %9876 = vmatmul.mubr.msk.f32.vlgmr.msra.gmra.mrb[28].mxu0 %vm2504_vm12, %v9215_v3 }
 0x723   : > { %9216 = vmatmul.mubr.msk.f32.vlgmr.msra.gmra.mrb[18].mxu1 %vm2504_vm12, %v9215_v3 }
 0x727   : > { %v7995_v7 = vpop.f32.mrb[20].mxu0 }
 0x728   : > { %v9833_v22 = vpop.f32.mrb[21].mxu0 }
 0x72a   : > { %v8778_v2 = vpop.permute.xlu1 %8777 }
 0x79d   : > { %v7239_v27 = vpop.f32.mrb[20].mxu1 }
 0x79e   : > { %v9789_v5 = vpop.f32.mrb[21].mxu1 }
 0x7ad   : > { %v7439_v9 = vpop.f32.mrb[22].mxu1 }
 0x7ae   : > { %v7440_v31 = vadd.f32 %v7439_v9, %v7239_v27  ;;  %v9800_v43 = vpop.f32.mrb[23].mxu1 }
 0x7bd   : > { %v7641_v46 = vpop.f32.mrb[24].mxu1 }
 0x7be   : > { %v7647_v40 = vadd.f32 %v7641_v46, %v7440_v31  ;;  %v9811_v18 = vpop.f32.mrb[25].mxu1 }
 0x7cd   : > { %v7846_v41 = vpop.f32.mrb[26].mxu1 }
 0x7ce   : > { %v7852_v16 = vadd.f32 %v7846_v41, %v7647_v40  ;;  %v9822_v37 = vpop.f32.mrb[27].mxu1 }
 0x7d0   : > { %v8001_v60 = vadd.f32 %v7995_v7, %v7852_v16 }
 0x7d8   : > { %v8188_v45 = vpop.f32.mrb[22].mxu0 }
 0x7d9   : > { %v8194_v8 = vadd.f32 %v8188_v45, %v8001_v60  ;;  %v9844_v12 = vpop.f32.mrb[23].mxu0 }
 0x7e0   : > { %v8381_v17 = vpop.f32.mrb[24].mxu0 }
 0x7e1   : > { %v8387_v19 = vadd.f32 %v8381_v17, %v8194_v8  ;;  %v9855_v32 = vpop.f32.mrb[25].mxu0 }
 0x7e8   : > { %v8574_v25 = vpop.f32.mrb[26].mxu0 }
 0x7e9   : > { %v8580_v42 = vadd.f32 %v8574_v25, %v8387_v19  ;;  %v9866_v20 = vpop.f32.mrb[27].mxu0 }
 0x7f4   : > { %v8767_v21 = vpop.f32.mrb[28].mxu0 }
 0x7f5   : > { %v8773_v48 = vadd.f32 %v8767_v21, %v8580_v42  ;;  %v9877_v11 = vpop.f32.mrb[29].mxu0 }
 0x7f6   : > { %v8696_v23 = vpop.f32.mrb[18].mxu1 }
 0x7f7   : > { %v8782_v24 = vadd.f32 %v8778_v2, %v8773_v48  ;;  %v8780_v29 = vadd.f32 %v8778_v2, %v8696_v23  ;;  %v8698_v38 = vpop.f32.mrb[19].mxu1 }
 0x7f8   : > { %v8781_v33 = vadd.f32 %v8778_v2, %v8698_v38 }
 0x7f9   : > { %8789 = vst.msk [vmem:[%s359_s24 + $0x8] sm:$0xf] %vm8788_vm14, %v8782_v24 }
 0x7fa   : > { %v8785_v59 = vcombine.low %v8780_v29, %v8781_v33 }
 0x7fc   : > { %8787 = vst [vmem:[%s359_s24] sm:$0xff] %v8785_v59 }
 0x7fd PF: > { %s20_s13 = sadd.s32 1, %s11472_s13  }
 0x7fe   : > { %p17_p4 = scmp.ge.s32.totalorder %s20_s13, 4  }
 0x800   :  { %19 = sbr.rel (!%p17_p4) target bundleno = 1 (0x1), region = 122 }

</bundles_post_ra>
